<compile_context>
chip_gen: v7x
topology: tpu7x:2x2x1
jax: 0.10.0
libtpu: 0.0.40
codegen_flags: <defaults>
</compile_context>

<pallas_src>
import math

import jax
import jax.numpy as jnp
from jax.experimental import pallas as pl
from jax.experimental.pallas import tpu as pltpu


# ---------------------------------------------------------------------------
# Helpers
# ---------------------------------------------------------------------------
def _pick_tile_h(H, Wp, target_positions):
    """Largest divisor of H with tile_h*Wp <= target; prefer aligned l_tile."""
    cands = [th for th in range(1, H + 1)
             if H % th == 0 and th * Wp <= target_positions]
    if not cands:
        return 1
    for align in (128, 8):
        aligned = [th for th in cands if (th * Wp) % align == 0]
        if aligned:
            return max(aligned)
    return max(cands)


def _vmem_limit_bytes(needed_bytes):
    """Generation-aware scoped-VMEM request, capped at ~85% of physical VMEM."""
    cap = None
    try:
        cap = getattr(pltpu.get_tpu_info(), "vmem_capacity_bytes", None)
    except Exception:
        cap = None
    if not cap:
        cap = 64 * 1024 * 1024     # v7x per-TC size: safe lower bound everywhere
    return int(min(0.85 * cap, max(32 * 1024 * 1024, 1.5 * needed_bytes)))


# ---------------------------------------------------------------------------
# MergedConv2d forward (grouped conv with per-group dilation), fused kernel.
# ---------------------------------------------------------------------------
def merged_conv2d(x, weight, bias, *, kernel_size=(3, 3),
                  padding=(1, 6, 12, 18), dilation=(1, 6, 12, 18),
                  stride=1, groups=4, tile_h=None, compute_dtype=None,
                  fuse="auto"):
    B, C, H, W = x.shape
    kh, kw = kernel_size
    G = groups
    if stride != 1:
        raise NotImplementedError("merged_conv2d: only stride=1 is supported")
    if len(padding) != G or len(dilation) != G:
        raise ValueError("padding/dilation need one entry per group")
    if C % G or weight.shape[0] % G:
        raise ValueError("channels must be divisible by groups")
    Cg = C // G
    out_ch = weight.shape[0]
    Og = out_ch // G
    # 'same' geometry per group — what the PyTorch module implicitly assumes
    # (its F.fold uses a kh/kw-only o_h/o_w formula).  Guard explicitly: this
    # is also what makes the flat-shift trick below valid.
    for p, d in zip(padding, dilation):
        if 2 * p != d * (kh - 1) or 2 * p != d * (kw - 1):
            raise ValueError(
                "merged_conv2d requires 2*padding[g] == dilation[g]*(k-1)")

    Pmax = int(max(padding))
    Hp, Wp = H + 2 * Pmax, W + 2 * Pmax
    n_tap = kh * kw

    # --- per-(group, tap) flat 1-D shift into the padded, flattened image ----
    tap_off = []
    for g in range(G):
        p_g, d_g = int(padding[g]), int(dilation[g])
        offs = []
        for i in range(kh):
            for j in range(kw):
                dh = Pmax - p_g + d_g * i          # 0 .. 2*Pmax
                dw = Pmax - p_g + d_g * j          # 0 .. 2*Pmax
                offs.append(dh * Wp + dw)
        tap_off.append(offs)

    # --- padded + flattened input.  One extra bottom row keeps the largest
    #     tap shift of the (discarded) junk columns in-bounds. -----------------
    x_pad = jnp.pad(x, ((0, 0), (0, 0), (Pmax, Pmax + 1), (Pmax, Pmax)))
    FL = (Hp + 1) * Wp
    x_flat = x_pad.reshape(B, C, FL)

    # --- fused weights --------------------------------------------------------
    # per-group dense: (G, Og, kh*kw*Cg), K ordered (tap, cg) to match the
    # im2col scratch rows.
    w5 = weight.reshape(G, Og, Cg, kh, kw)
    w_pg = w5.transpose(0, 1, 3, 4, 2).reshape(G, Og, n_tap * Cg)

    K_pg = n_tap * Cg
    K_full = G * K_pg
    if fuse == "auto":
        fuse_all = K_full <= 128           # one MXU pass deep on every chip gen
    elif fuse == "full":
        fuse_all = True
    elif fuse == "group":
        fuse_all = False
    else:
        raise ValueError("fuse must be 'auto', 'full' or 'group'")

    if fuse_all:
        # Lane-dense (out_ch, G*kh*kw*Cg) with zeros on cross-group K columns;
        # with K_full <= one MXU pass the zeros add no passes / result pops.
        # (cost_estimate.flops below counts these zero MACs — advisory only.)
        w_mat = jnp.zeros((out_ch, G, K_pg), weight.dtype)
        for g in range(G):
            w_mat = w_mat.at[g * Og:(g + 1) * Og, g, :].set(w_pg[g])
        w_mat = w_mat.reshape(out_ch, K_full)
        K_col = K_full
    else:
        w_mat = w_pg
        K_col = K_pg

    # Optional bf16 compute (MXU-native on v6e/v7x, halves resident image);
    # accumulation and bias stay f32.  Default keeps the module's dtype.
    if compute_dtype is not None:
        x_flat = x_flat.astype(compute_dtype)
        w_mat = w_mat.astype(compute_dtype)

    if bias is None:
        b_mat = jnp.zeros((out_ch, 1), jnp.float32)
    else:
        b_mat = bias.astype(jnp.float32).reshape(out_ch, 1)

    # --- spatial tiling (static in-kernel loop) -------------------------------
    if tile_h is None:
        # Bound the live dot result (out_ch x l_tile f32) to ~128 KiB of vregs.
        target = min(8192, max(512, (128 * 1024) // (4 * max(1, out_ch))))
        tile_h = _pick_tile_h(H, Wp, target)
    if H % tile_h != 0:
        raise ValueError("tile_h must divide H")
    num_t = H // tile_h
    l_tile = tile_h * Wp                   # flat output positions per tile
    LW = H * Wp                            # flat output positions per image

    x_it = jnp.dtype(x_flat.dtype).itemsize
    o_it = jnp.dtype(x.dtype).itemsize

    # --- kernel ---------------------------------------------------------------
    def kernel(x_ref, w_ref, b_ref, o_ref, col_ref):
        # x_ref:   (C, FL)          padded+flattened image of one batch element
        # w_ref:   (out_ch, K_full) or (G, Og, K_pg) fused weights
        # b_ref:   (out_ch, 1)      f32 bias
        # o_ref:   (out_ch, H*Wp)   output image (padded-width rows, flat)
        # col_ref: (K_col, l_tile)  in-VMEM im2col scratch
        bias_all = b_ref[...]
        w_all = w_ref[...] if fuse_all else None
        for t in range(num_t):             # static unroll -> all offsets static
            q0 = t * l_tile
            if fuse_all:
                for g in range(G):
                    for tl in range(n_tap):
                        off = tap_off[g][tl]
                        r = (g * n_tap + tl) * Cg
                        col_ref[r:r + Cg, :] = x_ref[
                            g * Cg:(g + 1) * Cg, q0 + off:q0 + off + l_tile]
                acc = jnp.dot(w_all, col_ref[...],
                              preferred_element_type=jnp.float32)
                o_ref[:, q0:q0 + l_tile] = (acc + bias_all).astype(o_ref.dtype)
            else:
                for g in range(G):
                    for tl in range(n_tap):
                        off = tap_off[g][tl]
                        r = tl * Cg
                        col_ref[r:r + Cg, :] = x_ref[
                            g * Cg:(g + 1) * Cg, q0 + off:q0 + off + l_tile]
                    # One dot per group, bias added after the dot: pure MXU
                    # chain (MRB in-place accumulation on v7x, no per-tap pops).
                    acc = jnp.dot(w_ref[g], col_ref[...],
                                  preferred_element_type=jnp.float32)
                    o_ref[g * Og:(g + 1) * Og, q0:q0 + l_tile] = (
                        acc + bias_all[g * Og:(g + 1) * Og, :]
                    ).astype(o_ref.dtype)

    # --- cost / VMEM bookkeeping ----------------------------------------------
    k_eff = K_full if fuse_all else K_pg
    flops = 2 * B * out_ch * k_eff * LW
    bytes_accessed = (x_flat.size * x_it + w_mat.size * x_it
                      + b_mat.size * 4 + B * out_ch * LW * o_it)
    needed = (2 * (C * FL * x_it) + 2 * (w_mat.size * x_it)
              + 2 * (out_ch * LW * o_it) + K_col * l_tile * x_it
              + (2 << 20))                 # slack for compiler scratch

    out3 = pl.pallas_call(
        kernel,
        out_shape=jax.ShapeDtypeStruct((B, out_ch, LW), x.dtype),
        grid_spec=pltpu.PrefetchScalarGridSpec(
            num_scalar_prefetch=0,
            grid=(B,),
            in_specs=[
                # Whole padded image of batch b: one DMA per batch element.
                pl.BlockSpec((None, C, FL), lambda b: (b, 0, 0)),
                # Weights / bias: constant block index -> fetched once.
                (pl.BlockSpec((out_ch, K_full), lambda b: (0, 0)) if fuse_all
                 else pl.BlockSpec((G, Og, K_pg), lambda b: (0, 0, 0))),
                pl.BlockSpec((out_ch, 1), lambda b: (0, 0)),
            ],
            out_specs=pl.BlockSpec((None, out_ch, LW), lambda b: (b, 0, 0)),
            scratch_shapes=[pltpu.VMEM((K_col, l_tile), x_flat.dtype)],
        ),
        compiler_params=pltpu.CompilerParams(
            # Batch is the only grid axis: on v7x megacore splits disjoint
            # images across the two TensorCores (one image DMA per core);
            # v5e/v6e are single-TC so this is a plain sequential loop.
            dimension_semantics=("parallel",),
            vmem_limit_bytes=_vmem_limit_bytes(needed)),
        cost_estimate=pl.CostEstimate(flops=flops, transcendentals=0,
                                      bytes_accessed=bytes_accessed),
    )(x_flat, w_mat, b_mat)

    # (B, out_ch, H*Wp) -> (B, out_ch, H, Wp) is a free reshape; then drop the
    # junk padded-width columns (no transpose anywhere in the wrapper).
    return out3.reshape(B, out_ch, H, Wp)[:, :, :, :W]


# ---------------------------------------------------------------------------
# Pure-JAX reference (grouped conv with per-group dilation) for verification.
# ---------------------------------------------------------------------------
def _reference(x, weight, bias, padding, dilation, groups):
    B, C, H, W = x.shape
    G = groups
    Cg = C // G
    out_ch = weight.shape[0]
    Og = out_ch // G
    xg = x.reshape(B, G, Cg, H, W)
    wg = weight.reshape(G, Og, Cg, weight.shape[2], weight.shape[3])
    outs = []
    for g in range(G):
        d, p = dilation[g], padding[g]
        o = jax.lax.conv_general_dilated(
            xg[:, g], wg[g], window_strides=(1, 1),
            padding=[(p, p), (p, p)], rhs_dilation=(d, d),
            dimension_numbers=("NCHW", "OIHW", "NCHW"))
        outs.append(o)
    out = jnp.concatenate(outs, axis=1)
    return out + bias.reshape(1, out_ch, 1, 1)


if __name__ == "__main__":
    B, in_ch, H, W = 2, 8, 16, 16
    out_ch, groups = 8, 4
    kh = kw = 3
    padding = (1, 6, 12, 18)
    dilation = (1, 6, 12, 18)

    # Deterministic init mirroring the module's _initialize():
    # kaiming_uniform(a=sqrt(5)) -> U(-sqrt(6/(6*fan_in)), +...); bias 1/sqrt(fan_in).
    fan_in = (in_ch // groups) * kh * kw
    bound_w = math.sqrt(6.0 / ((1.0 + 5.0) * fan_in))
    bound_b = 1.0 / math.sqrt(fan_in)

    key = jax.random.PRNGKey(0)
    k1, k2, k3 = jax.random.split(key, 3)
    weight = jax.random.uniform(k1, (out_ch, in_ch // groups, kh, kw),
                                jnp.float32, -bound_w, bound_w)
    bias = jax.random.uniform(k2, (out_ch,), jnp.float32, -bound_b, bound_b)
    x = jax.random.normal(k3, (B, in_ch, H, W), jnp.float32)

    ref = _reference(x, weight, bias, padding, dilation, groups)

    # 1) f32, auto tiling + auto fusion (full fusion, single spatial tile).
    out1 = jax.block_until_ready(
        merged_conv2d(x, weight, bias, kernel_size=(kh, kw), padding=padding,
                      dilation=dilation, groups=groups))
    if out1.shape != (B, out_ch, H, W):
        raise AssertionError(f"bad output shape {out1.shape}")
    if not jnp.allclose(out1, ref, atol=1e-4, rtol=1e-4):
        raise AssertionError("Pallas MergedConv2d (auto) mismatches reference")

    # 2) f32, explicit tiling (two in-kernel spatial tiles, full fusion).
    out2 = jax.block_until_ready(
        merged_conv2d(x, weight, bias, kernel_size=(kh, kw), padding=padding,
                      dilation=dilation, groups=groups, tile_h=8))
    if not jnp.allclose(out2, ref, atol=1e-4, rtol=1e-4):
        raise AssertionError("Pallas MergedConv2d (tiled) mismatches reference")

    # 3) f32, per-group fusion path (used when G*kh*kw*Cg exceeds one MXU pass).
    out3 = jax.block_until_ready(
        merged_conv2d(x, weight, bias, kernel_size=(kh, kw), padding=padding,
                      dilation=dilation, groups=groups, tile_h=8, fuse="group"))
    if not jnp.allclose(out3, ref, atol=1e-4, rtol=1e-4):
        raise AssertionError("Pallas MergedConv2d (per-group) mismatches reference")

    # 4) bf16 compute path (MXU-native on v6e/v7x); f32 accumulation -> loose check.
    out4 = jax.block_until_ready(
        merged_conv2d(x, weight, bias, kernel_size=(kh, kw), padding=padding,
                      dilation=dilation, groups=groups,
                      compute_dtype=jnp.bfloat16))
    if out4.shape != (B, out_ch, H, W) or not bool(jnp.isfinite(out4).all()):
        raise AssertionError("Pallas MergedConv2d (bf16) produced bad values")
    if not jnp.allclose(out4, ref, atol=0.15, rtol=0.05):
        raise AssertionError("Pallas MergedConv2d (bf16) mismatches reference")

    print("KERNEL_OK")
</pallas_src>

<mosaic_0001>
module attributes {stable_mosaic.version = 11 : i64} {
  func.func @kernel(%arg0: i32, %arg1: memref<1x8x2756xf32, #tpu.memory_space<vmem>>, %arg2: memref<8x72xf32, #tpu.memory_space<vmem>>, %arg3: memref<8x1xf32, #tpu.memory_space<vmem>>, %arg4: memref<1x8x832xf32, #tpu.memory_space<vmem>>, %arg5: memref<72x832xf32, #tpu.memory_space<vmem>>) attributes {dimension_semantics = [#tpu.dimension_semantics<parallel>], iteration_bounds = array<i64: 2>, scalar_prefetch = 0 : i64, scratch_operands = 1 : i64, tpu.core_type = #tpu.core_type<tc>, window_params = [{transform_indices = @transform_0, window_bounds = array<i64: 1, 8, 2756>}, {pipeline_mode = #tpu.pipeline_mode<synchronous>, transform_indices = @transform_1, window_bounds = array<i64: 8, 72>}, {pipeline_mode = #tpu.pipeline_mode<synchronous>, transform_indices = @transform_2, window_bounds = array<i64: 8, 1>}, {transform_indices = @transform_3, window_bounds = array<i64: 1, 8, 832>}]} {
    %c0 = arith.constant 0 : index
    %c0_0 = arith.constant 0 : index
    %0 = vector.load %arg3[%c0, %c0_0] : memref<8x1xf32, #tpu.memory_space<vmem>>, vector<8x1xf32>
    %c0_1 = arith.constant 0 : index
    %c0_2 = arith.constant 0 : index
    %1 = vector.load %arg2[%c0_1, %c0_2] : memref<8x72xf32, #tpu.memory_space<vmem>>, vector<8x72xf32>
    %c0_3 = arith.constant 0 : index
    %c0_4 = arith.constant 0 : index
    %c901 = arith.constant 901 : index
    %2 = vector.load %arg1[%c0_3, %c0_4, %c901] : memref<1x8x2756xf32, #tpu.memory_space<vmem>>, vector<1x2x832xf32>
    %3 = vector.shape_cast %2 : vector<1x2x832xf32> to vector<2x832xf32>
    %c0_5 = arith.constant 0 : index
    %c0_6 = arith.constant 0 : index
    %4 = vector.load %arg5[%c0_5, %c0_6] : memref<72x832xf32, #tpu.memory_space<vmem>>, vector<2x832xf32>
    tpu.vector_store %arg5[%c0_5, %c0_6], %3 {strides = array<i32>} : memref<72x832xf32, #tpu.memory_space<vmem>>, vector<2x832xf32>,
    %c0_7 = arith.constant 0 : index
    %c0_8 = arith.constant 0 : index
    %c902 = arith.constant 902 : index
    %5 = vector.load %arg1[%c0_7, %c0_8, %c902] : memref<1x8x2756xf32, #tpu.memory_space<vmem>>, vector<1x2x832xf32>
    %6 = vector.shape_cast %5 : vector<1x2x832xf32> to vector<2x832xf32>
    %c2 = arith.constant 2 : index
    %c0_9 = arith.constant 0 : index
    %7 = vector.load %arg5[%c2, %c0_9] : memref<72x832xf32, #tpu.memory_space<vmem>>, vector<2x832xf32>
    tpu.vector_store %arg5[%c2, %c0_9], %6 {strides = array<i32>} : memref<72x832xf32, #tpu.memory_space<vmem>>, vector<2x832xf32>,
    %c0_10 = arith.constant 0 : index
    %c0_11 = arith.constant 0 : index
    %c903 = arith.constant 903 : index
    %8 = vector.load %arg1[%c0_10, %c0_11, %c903] : memref<1x8x2756xf32, #tpu.memory_space<vmem>>, vector<1x2x832xf32>
    %9 = vector.shape_cast %8 : vector<1x2x832xf32> to vector<2x832xf32>
    %c4 = arith.constant 4 : index
    %c0_12 = arith.constant 0 : index
    %10 = vector.load %arg5[%c4, %c0_12] : memref<72x832xf32, #tpu.memory_space<vmem>>, vector<2x832xf32>
    tpu.vector_store %arg5[%c4, %c0_12], %9 {strides = array<i32>} : memref<72x832xf32, #tpu.memory_space<vmem>>, vector<2x832xf32>,
    %c0_13 = arith.constant 0 : index
    %c0_14 = arith.constant 0 : index
    %c953 = arith.constant 953 : index
    %11 = vector.load %arg1[%c0_13, %c0_14, %c953] : memref<1x8x2756xf32, #tpu.memory_space<vmem>>, vector<1x2x832xf32>
    %12 = vector.shape_cast %11 : vector<1x2x832xf32> to vector<2x832xf32>
    %c6 = arith.constant 6 : index
    %c0_15 = arith.constant 0 : index
    %13 = vector.load %arg5[%c6, %c0_15] : memref<72x832xf32, #tpu.memory_space<vmem>>, vector<2x832xf32>
    tpu.vector_store %arg5[%c6, %c0_15], %12 {strides = array<i32>} : memref<72x832xf32, #tpu.memory_space<vmem>>, vector<2x832xf32>,
    %c0_16 = arith.constant 0 : index
    %c0_17 = arith.constant 0 : index
    %c954 = arith.constant 954 : index
    %14 = vector.load %arg1[%c0_16, %c0_17, %c954] : memref<1x8x2756xf32, #tpu.memory_space<vmem>>, vector<1x2x832xf32>
    %15 = vector.shape_cast %14 : vector<1x2x832xf32> to vector<2x832xf32>
    %c8 = arith.constant 8 : index
    %c0_18 = arith.constant 0 : index
    %16 = vector.load %arg5[%c8, %c0_18] : memref<72x832xf32, #tpu.memory_space<vmem>>, vector<2x832xf32>
    tpu.vector_store %arg5[%c8, %c0_18], %15 {strides = array<i32>} : memref<72x832xf32, #tpu.memory_space<vmem>>, vector<2x832xf32>,
    %c0_19 = arith.constant 0 : index
    %c0_20 = arith.constant 0 : index
    %c955 = arith.constant 955 : index
    %17 = vector.load %arg1[%c0_19, %c0_20, %c955] : memref<1x8x2756xf32, #tpu.memory_space<vmem>>, vector<1x2x832xf32>
    %18 = vector.shape_cast %17 : vector<1x2x832xf32> to vector<2x832xf32>
    %c10 = arith.constant 10 : index
    %c0_21 = arith.constant 0 : index
    %19 = vector.load %arg5[%c10, %c0_21] : memref<72x832xf32, #tpu.memory_space<vmem>>, vector<2x832xf32>
    tpu.vector_store %arg5[%c10, %c0_21], %18 {strides = array<i32>} : memref<72x832xf32, #tpu.memory_space<vmem>>, vector<2x832xf32>,
    %c0_22 = arith.constant 0 : index
    %c0_23 = arith.constant 0 : index
    %c1005 = arith.constant 1005 : index
    %20 = vector.load %arg1[%c0_22, %c0_23, %c1005] : memref<1x8x2756xf32, #tpu.memory_space<vmem>>, vector<1x2x832xf32>
    %21 = vector.shape_cast %20 : vector<1x2x832xf32> to vector<2x832xf32>
    %c12 = arith.constant 12 : index
    %c0_24 = arith.constant 0 : index
    %22 = vector.load %arg5[%c12, %c0_24] : memref<72x832xf32, #tpu.memory_space<vmem>>, vector<2x832xf32>
    tpu.vector_store %arg5[%c12, %c0_24], %21 {strides = array<i32>} : memref<72x832xf32, #tpu.memory_space<vmem>>, vector<2x832xf32>,
    %c0_25 = arith.constant 0 : index
    %c0_26 = arith.constant 0 : index
    %c1006 = arith.constant 1006 : index
    %23 = vector.load %arg1[%c0_25, %c0_26, %c1006] : memref<1x8x2756xf32, #tpu.memory_space<vmem>>, vector<1x2x832xf32>
    %24 = vector.shape_cast %23 : vector<1x2x832xf32> to vector<2x832xf32>
    %c14 = arith.constant 14 : index
    %c0_27 = arith.constant 0 : index
    %25 = vector.load %arg5[%c14, %c0_27] : memref<72x832xf32, #tpu.memory_space<vmem>>, vector<2x832xf32>
    tpu.vector_store %arg5[%c14, %c0_27], %24 {strides = array<i32>} : memref<72x832xf32, #tpu.memory_space<vmem>>, vector<2x832xf32>,
    %c0_28 = arith.constant 0 : index
    %c0_29 = arith.constant 0 : index
    %c1007 = arith.constant 1007 : index
    %26 = vector.load %arg1[%c0_28, %c0_29, %c1007] : memref<1x8x2756xf32, #tpu.memory_space<vmem>>, vector<1x2x832xf32>
    %27 = vector.shape_cast %26 : vector<1x2x832xf32> to vector<2x832xf32>
    %c16 = arith.constant 16 : index
    %c0_30 = arith.constant 0 : index
    %28 = vector.load %arg5[%c16, %c0_30] : memref<72x832xf32, #tpu.memory_space<vmem>>, vector<2x832xf32>
    tpu.vector_store %arg5[%c16, %c0_30], %27 {strides = array<i32>} : memref<72x832xf32, #tpu.memory_space<vmem>>, vector<2x832xf32>,
    %c0_31 = arith.constant 0 : index
    %c2_32 = arith.constant 2 : index
    %c636 = arith.constant 636 : index
    %29 = vector.load %arg1[%c0_31, %c2_32, %c636] : memref<1x8x2756xf32, #tpu.memory_space<vmem>>, vector<1x2x832xf32>
    %30 = vector.shape_cast %29 : vector<1x2x832xf32> to vector<2x832xf32>
    %c18 = arith.constant 18 : index
    %c0_33 = arith.constant 0 : index
    %31 = vector.load %arg5[%c18, %c0_33] : memref<72x832xf32, #tpu.memory_space<vmem>>, vector<2x832xf32>
    tpu.vector_store %arg5[%c18, %c0_33], %30 {strides = array<i32>} : memref<72x832xf32, #tpu.memory_space<vmem>>, vector<2x832xf32>,
    %c0_34 = arith.constant 0 : index
    %c2_35 = arith.constant 2 : index
    %c642 = arith.constant 642 : index
    %32 = vector.load %arg1[%c0_34, %c2_35, %c642] : memref<1x8x2756xf32, #tpu.memory_space<vmem>>, vector<1x2x832xf32>
    %33 = vector.shape_cast %32 : vector<1x2x832xf32> to vector<2x832xf32>
    %c20 = arith.constant 20 : index
    %c0_36 = arith.constant 0 : index
    %34 = vector.load %arg5[%c20, %c0_36] : memref<72x832xf32, #tpu.memory_space<vmem>>, vector<2x832xf32>
    tpu.vector_store %arg5[%c20, %c0_36], %33 {strides = array<i32>} : memref<72x832xf32, #tpu.memory_space<vmem>>, vector<2x832xf32>,
    %c0_37 = arith.constant 0 : index
    %c2_38 = arith.constant 2 : index
    %c648 = arith.constant 648 : index
    %35 = vector.load %arg1[%c0_37, %c2_38, %c648] : memref<1x8x2756xf32, #tpu.memory_space<vmem>>, vector<1x2x832xf32>
    %36 = vector.shape_cast %35 : vector<1x2x832xf32> to vector<2x832xf32>
    %c22 = arith.constant 22 : index
    %c0_39 = arith.constant 0 : index
    %37 = vector.load %arg5[%c22, %c0_39] : memref<72x832xf32, #tpu.memory_space<vmem>>, vector<2x832xf32>
    tpu.vector_store %arg5[%c22, %c0_39], %36 {strides = array<i32>} : memref<72x832xf32, #tpu.memory_space<vmem>>, vector<2x832xf32>,
    %c0_40 = arith.constant 0 : index
    %c2_41 = arith.constant 2 : index
    %c948 = arith.constant 948 : index
    %38 = vector.load %arg1[%c0_40, %c2_41, %c948] : memref<1x8x2756xf32, #tpu.memory_space<vmem>>, vector<1x2x832xf32>
    %39 = vector.shape_cast %38 : vector<1x2x832xf32> to vector<2x832xf32>
    %c24 = arith.constant 24 : index
    %c0_42 = arith.constant 0 : index
    %40 = vector.load %arg5[%c24, %c0_42] : memref<72x832xf32, #tpu.memory_space<vmem>>, vector<2x832xf32>
    tpu.vector_store %arg5[%c24, %c0_42], %39 {strides = array<i32>} : memref<72x832xf32, #tpu.memory_space<vmem>>, vector<2x832xf32>,
    %c0_43 = arith.constant 0 : index
    %c2_44 = arith.constant 2 : index
    %c954_45 = arith.constant 954 : index
    %41 = vector.load %arg1[%c0_43, %c2_44, %c954_45] : memref<1x8x2756xf32, #tpu.memory_space<vmem>>, vector<1x2x832xf32>
    %42 = vector.shape_cast %41 : vector<1x2x832xf32> to vector<2x832xf32>
    %c26 = arith.constant 26 : index
    %c0_46 = arith.constant 0 : index
    %43 = vector.load %arg5[%c26, %c0_46] : memref<72x832xf32, #tpu.memory_space<vmem>>, vector<2x832xf32>
    tpu.vector_store %arg5[%c26, %c0_46], %42 {strides = array<i32>} : memref<72x832xf32, #tpu.memory_space<vmem>>, vector<2x832xf32>,
    %c0_47 = arith.constant 0 : index
    %c2_48 = arith.constant 2 : index
    %c960 = arith.constant 960 : index
    %44 = vector.load %arg1[%c0_47, %c2_48, %c960] : memref<1x8x2756xf32, #tpu.memory_space<vmem>>, vector<1x2x832xf32>
    %45 = vector.shape_cast %44 : vector<1x2x832xf32> to vector<2x832xf32>
    %c28 = arith.constant 28 : index
    %c0_49 = arith.constant 0 : index
    %46 = vector.load %arg5[%c28, %c0_49] : memref<72x832xf32, #tpu.memory_space<vmem>>, vector<2x832xf32>
    tpu.vector_store %arg5[%c28, %c0_49], %45 {strides = array<i32>} : memref<72x832xf32, #tpu.memory_space<vmem>>, vector<2x832xf32>,
    %c0_50 = arith.constant 0 : index
    %c2_51 = arith.constant 2 : index
    %c1260 = arith.constant 1260 : index
    %47 = vector.load %arg1[%c0_50, %c2_51, %c1260] : memref<1x8x2756xf32, #tpu.memory_space<vmem>>, vector<1x2x832xf32>
    %48 = vector.shape_cast %47 : vector<1x2x832xf32> to vector<2x832xf32>
    %c30 = arith.constant 30 : index
    %c0_52 = arith.constant 0 : index
    %49 = vector.load %arg5[%c30, %c0_52] : memref<72x832xf32, #tpu.memory_space<vmem>>, vector<2x832xf32>
    tpu.vector_store %arg5[%c30, %c0_52], %48 {strides = array<i32>} : memref<72x832xf32, #tpu.memory_space<vmem>>, vector<2x832xf32>,
    %c0_53 = arith.constant 0 : index
    %c2_54 = arith.constant 2 : index
    %c1266 = arith.constant 1266 : index
    %50 = vector.load %arg1[%c0_53, %c2_54, %c1266] : memref<1x8x2756xf32, #tpu.memory_space<vmem>>, vector<1x2x832xf32>
    %51 = vector.shape_cast %50 : vector<1x2x832xf32> to vector<2x832xf32>
    %c32 = arith.constant 32 : index
    %c0_55 = arith.constant 0 : index
    %52 = vector.load %arg5[%c32, %c0_55] : memref<72x832xf32, #tpu.memory_space<vmem>>, vector<2x832xf32>
    tpu.vector_store %arg5[%c32, %c0_55], %51 {strides = array<i32>} : memref<72x832xf32, #tpu.memory_space<vmem>>, vector<2x832xf32>,
    %c0_56 = arith.constant 0 : index
    %c2_57 = arith.constant 2 : index
    %c1272 = arith.constant 1272 : index
    %53 = vector.load %arg1[%c0_56, %c2_57, %c1272] : memref<1x8x2756xf32, #tpu.memory_space<vmem>>, vector<1x2x832xf32>
    %54 = vector.shape_cast %53 : vector<1x2x832xf32> to vector<2x832xf32>
    %c34 = arith.constant 34 : index
    %c0_58 = arith.constant 0 : index
    %55 = vector.load %arg5[%c34, %c0_58] : memref<72x832xf32, #tpu.memory_space<vmem>>, vector<2x832xf32>
    tpu.vector_store %arg5[%c34, %c0_58], %54 {strides = array<i32>} : memref<72x832xf32, #tpu.memory_space<vmem>>, vector<2x832xf32>,
    %c0_59 = arith.constant 0 : index
    %c4_60 = arith.constant 4 : index
    %c318 = arith.constant 318 : index
    %56 = vector.load %arg1[%c0_59, %c4_60, %c318] : memref<1x8x2756xf32, #tpu.memory_space<vmem>>, vector<1x2x832xf32>
    %57 = vector.shape_cast %56 : vector<1x2x832xf32> to vector<2x832xf32>
    %c36 = arith.constant 36 : index
    %c0_61 = arith.constant 0 : index
    %58 = vector.load %arg5[%c36, %c0_61] : memref<72x832xf32, #tpu.memory_space<vmem>>, vector<2x832xf32>
    tpu.vector_store %arg5[%c36, %c0_61], %57 {strides = array<i32>} : memref<72x832xf32, #tpu.memory_space<vmem>>, vector<2x832xf32>,
    %c0_62 = arith.constant 0 : index
    %c4_63 = arith.constant 4 : index
    %c330 = arith.constant 330 : index
    %59 = vector.load %arg1[%c0_62, %c4_63, %c330] : memref<1x8x2756xf32, #tpu.memory_space<vmem>>, vector<1x2x832xf32>
    %60 = vector.shape_cast %59 : vector<1x2x832xf32> to vector<2x832xf32>
    %c38 = arith.constant 38 : index
    %c0_64 = arith.constant 0 : index
    %61 = vector.load %arg5[%c38, %c0_64] : memref<72x832xf32, #tpu.memory_space<vmem>>, vector<2x832xf32>
    tpu.vector_store %arg5[%c38, %c0_64], %60 {strides = array<i32>} : memref<72x832xf32, #tpu.memory_space<vmem>>, vector<2x832xf32>,
    %c0_65 = arith.constant 0 : index
    %c4_66 = arith.constant 4 : index
    %c342 = arith.constant 342 : index
    %62 = vector.load %arg1[%c0_65, %c4_66, %c342] : memref<1x8x2756xf32, #tpu.memory_space<vmem>>, vector<1x2x832xf32>
    %63 = vector.shape_cast %62 : vector<1x2x832xf32> to vector<2x832xf32>
    %c40 = arith.constant 40 : index
    %c0_67 = arith.constant 0 : index
    %64 = vector.load %arg5[%c40, %c0_67] : memref<72x832xf32, #tpu.memory_space<vmem>>, vector<2x832xf32>
    tpu.vector_store %arg5[%c40, %c0_67], %63 {strides = array<i32>} : memref<72x832xf32, #tpu.memory_space<vmem>>, vector<2x832xf32>,
    %c0_68 = arith.constant 0 : index
    %c4_69 = arith.constant 4 : index
    %c942 = arith.constant 942 : index
    %65 = vector.load %arg1[%c0_68, %c4_69, %c942] : memref<1x8x2756xf32, #tpu.memory_space<vmem>>, vector<1x2x832xf32>
    %66 = vector.shape_cast %65 : vector<1x2x832xf32> to vector<2x832xf32>
    %c42 = arith.constant 42 : index
    %c0_70 = arith.constant 0 : index
    %67 = vector.load %arg5[%c42, %c0_70] : memref<72x832xf32, #tpu.memory_space<vmem>>, vector<2x832xf32>
    tpu.vector_store %arg5[%c42, %c0_70], %66 {strides = array<i32>} : memref<72x832xf32, #tpu.memory_space<vmem>>, vector<2x832xf32>,
    %c0_71 = arith.constant 0 : index
    %c4_72 = arith.constant 4 : index
    %c954_73 = arith.constant 954 : index
    %68 = vector.load %arg1[%c0_71, %c4_72, %c954_73] : memref<1x8x2756xf32, #tpu.memory_space<vmem>>, vector<1x2x832xf32>
    %69 = vector.shape_cast %68 : vector<1x2x832xf32> to vector<2x832xf32>
    %c44 = arith.constant 44 : index
    %c0_74 = arith.constant 0 : index
    %70 = vector.load %arg5[%c44, %c0_74] : memref<72x832xf32, #tpu.memory_space<vmem>>, vector<2x832xf32>
    tpu.vector_store %arg5[%c44, %c0_74], %69 {strides = array<i32>} : memref<72x832xf32, #tpu.memory_space<vmem>>, vector<2x832xf32>,
    %c0_75 = arith.constant 0 : index
    %c4_76 = arith.constant 4 : index
    %c966 = arith.constant 966 : index
    %71 = vector.load %arg1[%c0_75, %c4_76, %c966] : memref<1x8x2756xf32, #tpu.memory_space<vmem>>, vector<1x2x832xf32>
    %72 = vector.shape_cast %71 : vector<1x2x832xf32> to vector<2x832xf32>
    %c46 = arith.constant 46 : index
    %c0_77 = arith.constant 0 : index
    %73 = vector.load %arg5[%c46, %c0_77] : memref<72x832xf32, #tpu.memory_space<vmem>>, vector<2x832xf32>
    tpu.vector_store %arg5[%c46, %c0_77], %72 {strides = array<i32>} : memref<72x832xf32, #tpu.memory_space<vmem>>, vector<2x832xf32>,
    %c0_78 = arith.constant 0 : index
    %c4_79 = arith.constant 4 : index
    %c1566 = arith.constant 1566 : index
    %74 = vector.load %arg1[%c0_78, %c4_79, %c1566] : memref<1x8x2756xf32, #tpu.memory_space<vmem>>, vector<1x2x832xf32>
    %75 = vector.shape_cast %74 : vector<1x2x832xf32> to vector<2x832xf32>
    %c48 = arith.constant 48 : index
    %c0_80 = arith.constant 0 : index
    %76 = vector.load %arg5[%c48, %c0_80] : memref<72x832xf32, #tpu.memory_space<vmem>>, vector<2x832xf32>
    tpu.vector_store %arg5[%c48, %c0_80], %75 {strides = array<i32>} : memref<72x832xf32, #tpu.memory_space<vmem>>, vector<2x832xf32>,
    %c0_81 = arith.constant 0 : index
    %c4_82 = arith.constant 4 : index
    %c1578 = arith.constant 1578 : index
    %77 = vector.load %arg1[%c0_81, %c4_82, %c1578] : memref<1x8x2756xf32, #tpu.memory_space<vmem>>, vector<1x2x832xf32>
    %78 = vector.shape_cast %77 : vector<1x2x832xf32> to vector<2x832xf32>
    %c50 = arith.constant 50 : index
    %c0_83 = arith.constant 0 : index
    %79 = vector.load %arg5[%c50, %c0_83] : memref<72x832xf32, #tpu.memory_space<vmem>>, vector<2x832xf32>
    tpu.vector_store %arg5[%c50, %c0_83], %78 {strides = array<i32>} : memref<72x832xf32, #tpu.memory_space<vmem>>, vector<2x832xf32>,
    %c0_84 = arith.constant 0 : index
    %c4_85 = arith.constant 4 : index
    %c1590 = arith.constant 1590 : index
    %80 = vector.load %arg1[%c0_84, %c4_85, %c1590] : memref<1x8x2756xf32, #tpu.memory_space<vmem>>, vector<1x2x832xf32>
    %81 = vector.shape_cast %80 : vector<1x2x832xf32> to vector<2x832xf32>
    %c52 = arith.constant 52 : index
    %c0_86 = arith.constant 0 : index
    %82 = vector.load %arg5[%c52, %c0_86] : memref<72x832xf32, #tpu.memory_space<vmem>>, vector<2x832xf32>
    tpu.vector_store %arg5[%c52, %c0_86], %81 {strides = array<i32>} : memref<72x832xf32, #tpu.memory_space<vmem>>, vector<2x832xf32>,
    %c0_87 = arith.constant 0 : index
    %c6_88 = arith.constant 6 : index
    %c0_89 = arith.constant 0 : index
    %83 = vector.load %arg1[%c0_87, %c6_88, %c0_89] : memref<1x8x2756xf32, #tpu.memory_space<vmem>>, vector<1x2x832xf32>
    %84 = vector.shape_cast %83 : vector<1x2x832xf32> to vector<2x832xf32>
    %c54 = arith.constant 54 : index
    %c0_90 = arith.constant 0 : index
    %85 = vector.load %arg5[%c54, %c0_90] : memref<72x832xf32, #tpu.memory_space<vmem>>, vector<2x832xf32>
    tpu.vector_store %arg5[%c54, %c0_90], %84 {strides = array<i32>} : memref<72x832xf32, #tpu.memory_space<vmem>>, vector<2x832xf32>,
    %c0_91 = arith.constant 0 : index
    %c6_92 = arith.constant 6 : index
    %c18_93 = arith.constant 18 : index
    %86 = vector.load %arg1[%c0_91, %c6_92, %c18_93] : memref<1x8x2756xf32, #tpu.memory_space<vmem>>, vector<1x2x832xf32>
    %87 = vector.shape_cast %86 : vector<1x2x832xf32> to vector<2x832xf32>
    %c56 = arith.constant 56 : index
    %c0_94 = arith.constant 0 : index
    %88 = vector.load %arg5[%c56, %c0_94] : memref<72x832xf32, #tpu.memory_space<vmem>>, vector<2x832xf32>
    tpu.vector_store %arg5[%c56, %c0_94], %87 {strides = array<i32>} : memref<72x832xf32, #tpu.memory_space<vmem>>, vector<2x832xf32>,
    %c0_95 = arith.constant 0 : index
    %c6_96 = arith.constant 6 : index
    %c36_97 = arith.constant 36 : index
    %89 = vector.load %arg1[%c0_95, %c6_96, %c36_97] : memref<1x8x2756xf32, #tpu.memory_space<vmem>>, vector<1x2x832xf32>
    %90 = vector.shape_cast %89 : vector<1x2x832xf32> to vector<2x832xf32>
    %c58 = arith.constant 58 : index
    %c0_98 = arith.constant 0 : index
    %91 = vector.load %arg5[%c58, %c0_98] : memref<72x832xf32, #tpu.memory_space<vmem>>, vector<2x832xf32>
    tpu.vector_store %arg5[%c58, %c0_98], %90 {strides = array<i32>} : memref<72x832xf32, #tpu.memory_space<vmem>>, vector<2x832xf32>,
    %c0_99 = arith.constant 0 : index
    %c6_100 = arith.constant 6 : index
    %c936 = arith.constant 936 : index
    %92 = vector.load %arg1[%c0_99, %c6_100, %c936] : memref<1x8x2756xf32, #tpu.memory_space<vmem>>, vector<1x2x832xf32>
    %93 = vector.shape_cast %92 : vector<1x2x832xf32> to vector<2x832xf32>
    %c60 = arith.constant 60 : index
    %c0_101 = arith.constant 0 : index
    %94 = vector.load %arg5[%c60, %c0_101] : memref<72x832xf32, #tpu.memory_space<vmem>>, vector<2x832xf32>
    tpu.vector_store %arg5[%c60, %c0_101], %93 {strides = array<i32>} : memref<72x832xf32, #tpu.memory_space<vmem>>, vector<2x832xf32>,
    %c0_102 = arith.constant 0 : index
    %c6_103 = arith.constant 6 : index
    %c954_104 = arith.constant 954 : index
    %95 = vector.load %arg1[%c0_102, %c6_103, %c954_104] : memref<1x8x2756xf32, #tpu.memory_space<vmem>>, vector<1x2x832xf32>
    %96 = vector.shape_cast %95 : vector<1x2x832xf32> to vector<2x832xf32>
    %c62 = arith.constant 62 : index
    %c0_105 = arith.constant 0 : index
    %97 = vector.load %arg5[%c62, %c0_105] : memref<72x832xf32, #tpu.memory_space<vmem>>, vector<2x832xf32>
    tpu.vector_store %arg5[%c62, %c0_105], %96 {strides = array<i32>} : memref<72x832xf32, #tpu.memory_space<vmem>>, vector<2x832xf32>,
    %c0_106 = arith.constant 0 : index
    %c6_107 = arith.constant 6 : index
    %c972 = arith.constant 972 : index
    %98 = vector.load %arg1[%c0_106, %c6_107, %c972] : memref<1x8x2756xf32, #tpu.memory_space<vmem>>, vector<1x2x832xf32>
    %99 = vector.shape_cast %98 : vector<1x2x832xf32> to vector<2x832xf32>
    %c64 = arith.constant 64 : index
    %c0_108 = arith.constant 0 : index
    %100 = vector.load %arg5[%c64, %c0_108] : memref<72x832xf32, #tpu.memory_space<vmem>>, vector<2x832xf32>
    tpu.vector_store %arg5[%c64, %c0_108], %99 {strides = array<i32>} : memref<72x832xf32, #tpu.memory_space<vmem>>, vector<2x832xf32>,
    %c0_109 = arith.constant 0 : index
    %c6_110 = arith.constant 6 : index
    %c1872 = arith.constant 1872 : index
    %101 = vector.load %arg1[%c0_109, %c6_110, %c1872] : memref<1x8x2756xf32, #tpu.memory_space<vmem>>, vector<1x2x832xf32>
    %102 = vector.shape_cast %101 : vector<1x2x832xf32> to vector<2x832xf32>
    %c66 = arith.constant 66 : index
    %c0_111 = arith.constant 0 : index
    %103 = vector.load %arg5[%c66, %c0_111] : memref<72x832xf32, #tpu.memory_space<vmem>>, vector<2x832xf32>
    tpu.vector_store %arg5[%c66, %c0_111], %102 {strides = array<i32>} : memref<72x832xf32, #tpu.memory_space<vmem>>, vector<2x832xf32>,
    %c0_112 = arith.constant 0 : index
    %c6_113 = arith.constant 6 : index
    %c1890 = arith.constant 1890 : index
    %104 = vector.load %arg1[%c0_112, %c6_113, %c1890] : memref<1x8x2756xf32, #tpu.memory_space<vmem>>, vector<1x2x832xf32>
    %105 = vector.shape_cast %104 : vector<1x2x832xf32> to vector<2x832xf32>
    %c68 = arith.constant 68 : index
    %c0_114 = arith.constant 0 : index
    %106 = vector.load %arg5[%c68, %c0_114] : memref<72x832xf32, #tpu.memory_space<vmem>>, vector<2x832xf32>
    tpu.vector_store %arg5[%c68, %c0_114], %105 {strides = array<i32>} : memref<72x832xf32, #tpu.memory_space<vmem>>, vector<2x832xf32>,
    %c0_115 = arith.constant 0 : index
    %c6_116 = arith.constant 6 : index
    %c1908 = arith.constant 1908 : index
    %107 = vector.load %arg1[%c0_115, %c6_116, %c1908] : memref<1x8x2756xf32, #tpu.memory_space<vmem>>, vector<1x2x832xf32>
    %108 = vector.shape_cast %107 : vector<1x2x832xf32> to vector<2x832xf32>
    %c70 = arith.constant 70 : index
    %c0_117 = arith.constant 0 : index
    %109 = vector.load %arg5[%c70, %c0_117] : memref<72x832xf32, #tpu.memory_space<vmem>>, vector<2x832xf32>
    tpu.vector_store %arg5[%c70, %c0_117], %108 {strides = array<i32>} : memref<72x832xf32, #tpu.memory_space<vmem>>, vector<2x832xf32>,
    %c0_118 = arith.constant 0 : index
    %c0_119 = arith.constant 0 : index
    %110 = vector.load %arg5[%c0_118, %c0_119] : memref<72x832xf32, #tpu.memory_space<vmem>>, vector<72x832xf32>
    %cst = arith.constant dense<0.000000e+00> : vector<8x832xf32>
    %111 = tpu.matmul %1, %110, %cst {dimension_numbers = #tpu.dot_dimension_numbers<[1], [0], [0], [1], [0, 0, 1, 1], [], []>} : vector<8x72xf32>, vector<72x832xf32>, vector<8x832xf32> -> vector<8x832xf32>
    %112 = vector.broadcast %0 : vector<8x1xf32> to vector<8x832xf32>
    %113 = arith.addf %111, %112 : vector<8x832xf32>
    %c0_120 = arith.constant 0 : index
    %c0_121 = arith.constant 0 : index
    %c0_122 = arith.constant 0 : index
    %114 = vector.load %arg4[%c0_120, %c0_121, %c0_122] : memref<1x8x832xf32, #tpu.memory_space<vmem>>, vector<1x8x832xf32>
    %115 = vector.shape_cast %114 : vector<1x8x832xf32> to vector<8x832xf32>
    %116 = vector.shape_cast %113 : vector<8x832xf32> to vector<1x8x832xf32>
    tpu.vector_store %arg4[%c0_120, %c0_121, %c0_122], %116 {strides = array<i32>} : memref<1x8x832xf32, #tpu.memory_space<vmem>>, vector<1x8x832xf32>,
    return
  }
  func.func @transform_0(%arg0: i32) -> (i32, i32, i32) {
    %c0_i32 = arith.constant 0 : i32
    %c0_i32_0 = arith.constant 0 : i32
    %c0_i32_1 = arith.constant 0 : i32
    return %arg0, %c0_i32, %c0_i32_0 : i32, i32, i32
  }
  func.func @transform_1(%arg0: i32) -> (i32, i32) {
    %c0_i32 = arith.constant 0 : i32
    %c0_i32_0 = arith.constant 0 : i32
    %c0_i32_1 = arith.constant 0 : i32
    return %c0_i32, %c0_i32_0 : i32, i32
  }
  func.func @transform_2(%arg0: i32) -> (i32, i32) {
    %c0_i32 = arith.constant 0 : i32
    %c0_i32_0 = arith.constant 0 : i32
    %c0_i32_1 = arith.constant 0 : i32
    return %c0_i32, %c0_i32_0 : i32, i32
  }
  func.func @transform_3(%arg0: i32) -> (i32, i32, i32) {
    %c0_i32 = arith.constant 0 : i32
    %c0_i32_0 = arith.constant 0 : i32
    %c0_i32_1 = arith.constant 0 : i32
    return %arg0, %c0_i32, %c0_i32_0 : i32, i32, i32
  }
}

</mosaic_0001>

<bundles_post_ra>
// kernel: tpu_custom_call.1
= control target key start
LH: loop header
LB: loop body
LE: loop exit
PB: predicated region body
PF: predicated region fallthrough
CT: control target
= control target key end

     0   :  { %8 = vsyncpa [#allocation4], 0  ;;  %s4100_s0 = inlined_call_operand.hbm [shape: f32[2,8,2756], index: 0, kind: input, shape index: {}]   ;;  %s4101_s1 = inlined_call_operand.vmem [shape: f32[8,72], index: 1, kind: input, shape index: {}]   ;;  %s4102_s2 = inlined_call_operand.vmem [shape: f32[8,1], index: 2, kind: input, shape index: {}]   ;;  %s4103_s3 = inlined_call_operand.hbm [shape: f32[2,8,832], index: 3, kind: output, shape index: {}]  }
   0x1   :  { %10 = vsyncpa [#allocation4 + $0x1], 0 }
   0x2   :  { %11 = vsyncpa [#allocation5], 0 }
   0x3   :  { %13 = vsyncpa [#allocation5 + $0x1], 0  ;;  %s2962_s12 = smov 0   ;;  %s2964_s13 = smov 0  }
   0x4   :  { %s2966_s14 = smov 0   ;;  %s2968_s15 = smov 0  }
   0x5 LB: > { %s2983_s16 = sadd.s32 4294967295, %s2902_s15   ;;  %s2614_s17 = sadd.s32 4294967294, %s2902_s15   ;;  %s2902_s15 = sphi %s2968_s15, %s4169_s15   ;;  %s2898_s14 = sphi %s2966_s14, %s4168_s14   ;;  %s2894_s13 = sphi %s2964_s13, %s4167_s13   ;;  %s2890_s12 = sphi %s2962_s12, %s4166_s12  }
   0x6   : > { %s2987_s18 = sadd.s32 1, %s2902_s15   ;;  %s26_s19 = sadd.s32 1, %s2898_s14 }
   0x7   : > { %s23_s20 = ssub.s32 %s2902_s15, %s2987_s18  ;;  %p33_p0 = scmp.ne.s32.totalorder %s2898_s14, %s2894_s13 }
   0x8   : > { %p24_p1 = scmp.eq.s32.totalorder %s23_s20, 0  ;;  %p34_p2 = scmp.eq.s32.totalorder %s2902_s15, 0 }
   0x9   : > { %p39_p3 = scmp.ne.s32.totalorder %s2894_s13, %s2890_s12  ;;  %p40_p4 = scmp.eq.s32.totalorder %s2983_s16, 0 }
   0xa   : > { %s2999_s21 = scalar_select %p24_p1, %s2898_s14, %s26_s19  }
   0xb   : > { %p35_p5 = por %p34_p2, %p33_p0  ;;  %p3001_p6 = por %p40_p4, %p39_p3 }
   0xc   : > { %p105_p7 = scmp.eq.s32.totalorder %s2983_s16, 1  ;;  %p111_p8 = scmp.eq.s32.totalorder %s2614_s17, 1 }
   0xd   : > { %p2734_p10 = scmp.lt.s32.totalorder %s2902_s15, 2  ;;  %s137_s25 = sand.u32 1, %s2898_s14  }
   0xe   : > { %p3008_p11 = por %p105_p7, %p33_p0  ;;  %p3012_p12 = por %p111_p8, %p39_p3 }
   0xf   : > { %s2718_s26 = smul.u32 2816, %s2902_s15  ;;  %p3023_p13 = pnand %p2734_p10, %p35_p5 }
  0x10   : > { %s4125_s23 = scalar_select %p3008_p11, 1, 0 }
  0x11   : > { %s4126_s24 = scalar_select %p3012_p12, 1, 0 }
  0x12   : > { %s2717_s27 = smul.u32 176, %s137_s25  ;;  %s3021_s30 = scalar_lea.hbm %s4100_s0, %s2718_s26 }
  0x13   : > { %s138_s7 = scalar_lea.sflag [#allocation4], %s137_s25  ;;  %s2806_s8 = scalar_lea.hbm %s3021_s30, 2816 }
  0x14   : > { %s141_s5 = scalar_lea.vmem [#allocation3], %s2717_s27  ;;  %p2807_p2 = scmp.ne.s32.totalorder %s3021_s30, %s2806_s8 }
  0x15   : > { %s149_s6 = sshll.u32 %s141_s5, 4  ;;  %p2808_p3 = pneg %p3023_p13  ;;  %s3028_s6 = int_to_ptr.vmem [resolvable:$true] %s149_s6 }
  0x16   : > { %s2811_s11 = scalar_lea.hbm %s4100_s0, 5632  ;;  %p2812_p7 = scmp.lt.u32.totalorder %s3021_s30, %s4100_s0 }
  0x17   : > { %p2809_p4 = pnand %p2808_p3, %p2807_p2  ;;  %p2813_p8 = scmp.lt.u32.totalorder %s2811_s11, %s2806_s8 }
  0x18   : > { %p2815_p9 = scmp.lt.u32.totalorder %s2806_s8, %s3021_s30 }
  0x19   : > { %p2810_p5 = pneg %p2809_p4  ;;  %p2814_p10 = por %p2813_p8, %p2812_p7 }
  0x1b   : > { %p2816_p0 = por %p2815_p9, %p2814_p10 }
  0x1d   : > { %p2817_p1 = pnand %p2816_p0, %p2810_p5 }
  0x1f   : > { %2820 = shalt.err (!%p2817_p1)
}
  0x20   : > { %s2821_s20 = scalar_lea.vmem %s3028_s6, 2816  ;;  %s2904_s25 = smov [#allocation3]  }
  0x21   : > { %p2822_p2 = scmp.ne.s32.totalorder %s3028_s6, %s2821_s20  ;;  %s2826_s26 = sshll.u32 %s2904_s25, 4  ;;  %s2827_s26 = int_to_ptr.vmem [resolvable:$false] %s2826_s26 }
  0x22   : > { %s2828_s27 = scalar_lea.vmem %s2827_s26, 5632  ;;  %p2829_p11 = scmp.lt.s32.totalorder %s3028_s6, %s2827_s26 }
  0x23   : > { %p2824_p4 = pnand %p2822_p2, %p2808_p3  ;;  %p2830_p7 = scmp.lt.s32.totalorder %s2828_s27, %s2821_s20 }
  0x25   : > { %p2825_p12 = pneg %p2824_p4  ;;  %p2831_p8 = por %p2830_p7, %p2829_p11 }
  0x27   : > { %p2832_p9 = pnand %p2831_p8, %p2825_p12 }
  0x29   : > { %2835 = shalt.err (!%p2832_p9)
}
  0x2a   : > { %2729 = dma.hbm_to_vmem [thread:$0]  (!%p3023_p13), %s3021_s30, 2816, %s3028_s6, %s138_s7  }
  0x2b   : > { %p4128_p0 = scmp.lt.s32.totalorder %s2902_s15, 3  ;;  %p4129_p1 = scmp.ge.s32.totalorder %s2902_s15, 1 }
  0x2d   : > { %p155_p3 = pnand %p4129_p1, %p4128_p0 }
  0x2e   : > { %s3061_s28 = sand.u32 (!%p155_p3), 1, %s2894_s13  }
  0x2f   : > { %158 = sbr.rel (%p155_p3) target bundleno = 925 (0x39d), region = 32  ;;  %s161_s5 = scalar_lea.sflag (!%p155_p3), [#allocation4], %s3061_s28 }
  0x30   : > { %s2719_s29 = smul.u32 (!%p155_p3), 176, %s3061_s28 }
  0x32   : > { %s3065_s8 = scalar_lea.vmem (!%p155_p3), [#allocation3], %s2719_s29 }
  0x36   : > { %2881 = dma.done.wait (%p3001_p6), %s161_s5, 2816  }
  0x37   : > { %2883 = vsyncadd (%p3001_p6), %s161_s5, 4294964480  ;;  %v191_v0 = vld [vmem:[%s3065_s8 + $0x48] sm:$0x3]  ;;  %v189_v1 = vld [vmem:[%s3065_s8 + $0x38] sm:$0x3]  ;;  %s2905_s30 = smov 123  }
  0x38   : > { %207 = vrot.lane.b32.xlu1 %v191_v0, %s2905_s30  ;;  %203 = vrot.lane.b32.xlu0 %v189_v1, %s2905_s30  ;;  %v192_v2 = vld [vmem:[%s3065_s8 + $0x50] sm:$0x3]  ;;  %v190_v3 = vld [vmem:[%s3065_s8 + $0x40] sm:$0x3]  ;;  %s2906_s22 = smov 122   ;;  %s2907_s4 = smov 121  }
  0x39   : > { %v194_v4 = vld [vmem:[%s3065_s8 + $0x60] sm:$0x3]  ;;  %v193_v5 = vld [vmem:[%s3065_s8 + $0x58] sm:$0x3]  ;;  %v195_v8 = vld [vmem:[%s3065_s8 + $0x68] sm:$0x3] }
  0x3a   : > { %v239_v6 = vld [vmem:[%s3065_s8 + $0x38] sm:$0x3]  ;;  %v241_v9 = vld [vmem:[%s3065_s8 + $0x48] sm:$0x3]  ;;  %v240_v10 = vld [vmem:[%s3065_s8 + $0x40] sm:$0x3] }
  0x3b   : > { %v253_v7 = vrot.slane %v239_v6, 6  ;;  %v255_v11 = vrot.slane %v241_v9, 6  ;;  %v254_v12 = vrot.slane %v240_v10, 6  ;;  %v243_v13 = vld [vmem:[%s3065_s8 + $0x58] sm:$0x3]  ;;  %s2908_s6 = smov 71  }
  0x3c   : > { %209 = vrot.lane.b32.xlu1 %v192_v2, %s2905_s30  ;;  %205 = vrot.lane.b32.xlu0 %v190_v3, %s2905_s30  ;;  %v242_v14 = vld [vmem:[%s3065_s8 + $0x50] sm:$0x3]  ;;  %v257_v15 = vrot.slane %v243_v13, 6  ;;  %v245_v17 = vld [vmem:[%s3065_s8 + $0x68] sm:$0x3]  ;;  %s2909_s7 = smov 70  }
  0x3d   : > { %v256_v16 = vrot.slane %v242_v14, 6  ;;  %v244_v18 = vld [vmem:[%s3065_s8 + $0x60] sm:$0x3]  ;;  %v259_v19 = vrot.slane %v245_v17, 6  ;;  %v296_v22 = vld [vmem:[%s3065_s8 + $0x38] sm:$0x3] }
  0x3e   : > { %v258_v20 = vrot.slane %v244_v18, 6  ;;  %v297_v21 = vld [vmem:[%s3065_s8 + $0x40] sm:$0x3]  ;;  %v310_v24 = vrot.slane %v296_v22, 4  ;;  %v299_v25 = vld [vmem:[%s3065_s8 + $0x50] sm:$0x3] }
  0x3f   : > { %v311_v23 = vrot.slane %v297_v21, 4  ;;  %v298_v26 = vld [vmem:[%s3065_s8 + $0x48] sm:$0x3]  ;;  %v313_v27 = vrot.slane %v299_v25, 4  ;;  %v301_v29 = vld [vmem:[%s3065_s8 + $0x60] sm:$0x3] }
  0x40   : > { %213 = vrot.lane.b32.xlu1 %v194_v4, %s2905_s30  ;;  %211 = vrot.lane.b32.xlu0 %v193_v5, %s2905_s30  ;;  %v312_v28 = vrot.slane %v298_v26, 4  ;;  %v300_v30 = vld [vmem:[%s3065_s8 + $0x58] sm:$0x3]  ;;  %v315_v31 = vrot.slane %v301_v29, 4  ;;  %v302_v34 = vld [vmem:[%s3065_s8 + $0x68] sm:$0x3] }
  0x41   : > { %v314_v32 = vrot.slane %v300_v30, 4  ;;  %v353_v33 = vld [vmem:[%s3065_s8 + $0x38] sm:$0x3]  ;;  %v316_v36 = vrot.slane %v302_v34, 4  ;;  %v355_v37 = vld [vmem:[%s3065_s8 + $0x48] sm:$0x3] }
  0x42   : > { %v367_v35 = vrot.slane %v353_v33, 2  ;;  %v354_v38 = vld [vmem:[%s3065_s8 + $0x40] sm:$0x3]  ;;  %v369_v39 = vrot.slane %v355_v37, 2  ;;  %v357_v41 = vld [vmem:[%s3065_s8 + $0x58] sm:$0x3] }
  0x43   : > { %v368_v40 = vrot.slane %v354_v38, 2  ;;  %v356_v42 = vld [vmem:[%s3065_s8 + $0x50] sm:$0x3]  ;;  %v371_v43 = vrot.slane %v357_v41, 2  ;;  %v359_v45 = vld [vmem:[%s3065_s8 + $0x68] sm:$0x3] }
  0x44   : > { %260 = vrot.lane.b32.xlu1 %v253_v7, %s2906_s22  ;;  %215 = vrot.lane.b32.xlu0 %v195_v8, %s2905_s30  ;;  %v370_v44 = vrot.slane %v356_v42, 2  ;;  %v358_v46 = vld [vmem:[%s3065_s8 + $0x60] sm:$0x3]  ;;  %v373_v47 = vrot.slane %v359_v45, 2  ;;  %v410_v50 = vld [vmem:[%s3065_s8 + $0x38] sm:$0x3] }
  0x45   : > { %v372_v48 = vrot.slane %v358_v46, 2  ;;  %v411_v49 = vld [vmem:[%s3065_s8 + $0x40] sm:$0x3]  ;;  %v413_v51 = vld [vmem:[%s3065_s8 + $0x50] sm:$0x3]  ;;  %s2910_s9 = smov 69  }
  0x46   : > { %v412_v52 = vld [vmem:[%s3065_s8 + $0x48] sm:$0x3]  ;;  %v415_v53 = vld [vmem:[%s3065_s8 + $0x60] sm:$0x3]  ;;  %v414_v54 = vld [vmem:[%s3065_s8 + $0x58] sm:$0x3] }
  0x47   : > { %v459_v55 = vld [vmem:[%s3065_s8 + $0x38] sm:$0x3]  ;;  %v416_v57 = vld [vmem:[%s3065_s8 + $0x68] sm:$0x3]  ;;  %v460_v59 = vld [vmem:[%s3065_s8 + $0x40] sm:$0x3] }
  0x48   : > { %264 = vrot.lane.b32.xlu1 %v255_v11, %s2906_s22  ;;  %262 = vrot.lane.b32.xlu0 %v254_v12, %s2906_s22  ;;  %v473_v56 = vrot.slane %v459_v55, 6  ;;  %v461_v58 = vld [vmem:[%s3065_s8 + $0x48] sm:$0x3]  ;;  %v474_v61 = vrot.slane %v460_v59, 6  ;;  %v463_v62 = vld [vmem:[%s3065_s8 + $0x58] sm:$0x3] }
  0x49   : > { %v475_v60 = vrot.slane %v461_v58, 6  ;;  %v462_v63 = vld [vmem:[%s3065_s8 + $0x50] sm:$0x3]  ;;  %v477_v0 = vrot.slane %v463_v62, 6  ;;  %v465_v2 = vld [vmem:[%s3065_s8 + $0x68] sm:$0x3] }
  0x4a   : > { %v476_v1 = vrot.slane %v462_v63, 6  ;;  %v464_v3 = vld [vmem:[%s3065_s8 + $0x60] sm:$0x3]  ;;  %v479_v4 = vrot.slane %v465_v2, 6  ;;  %v515_v7 = vld [vmem:[%s3065_s8 + $0x38] sm:$0x3] }
  0x4b   : > { %v478_v5 = vrot.slane %v464_v3, 6  ;;  %v516_v6 = vld [vmem:[%s3065_s8 + $0x40] sm:$0x3]  ;;  %v531_v9 = vrot.slane %v515_v7, 4  ;;  %v518_v10 = vld [vmem:[%s3065_s8 + $0x50] sm:$0x3] }
  0x4c   : > { %268 = vrot.lane.b32.xlu1 %v257_v15, %s2906_s22  ;;  %266 = vrot.lane.b32.xlu0 %v256_v16, %s2906_s22  ;;  %v532_v8 = vrot.slane %v516_v6, 4  ;;  %v517_v11 = vld [vmem:[%s3065_s8 + $0x48] sm:$0x3]  ;;  %s2911_s10 = smov 19   ;;  %v534_v12 = vrot.slane %v518_v10, 4  ;;  %s2912_s11 = smov 18  }
  0x4d   : > { %v533_v13 = vrot.slane %v517_v11, 4  ;;  %v520_v14 = vld [vmem:[%s3065_s8 + $0x60] sm:$0x3]  ;;  %v519_v15 = vld [vmem:[%s3065_s8 + $0x58] sm:$0x3]  ;;  %s2913_s17 = smov 17  }
  0x4e   : > { %v536_v16 = vrot.slane %v520_v14, 4  ;;  %v535_v17 = vrot.slane %v519_v15, 4  ;;  %v522_v18 = vld [vmem:[%s3065_s8 + $0x70] sm:$0x3]  ;;  %v578_v22 = vld [vmem:[%s3065_s8 + $0x40] sm:$0x3] }
  0x4f   : > { %v580_v26 = vld [vmem:[%s3065_s8 + $0x50] sm:$0x3]  ;;  %v582_v30 = vld [vmem:[%s3065_s8 + $0x60] sm:$0x3]  ;;  %vm217_vm0 = vcmask 1006592   ;;  %vm4113_vm1 = vcmask 517120  }
  0x50   : > { %272 = vrot.lane.b32.xlu1 %v259_v19, %s2906_s22  ;;  %270 = vrot.lane.b32.xlu0 %v258_v20, %s2906_s22  ;;  %v521_v19 = vld [vmem:[%s3065_s8 + $0x68] sm:$0x3]  ;;  %v538_v20 = vrot.slane %v522_v18, 4  ;;  %v584_v34 = vld [vmem:[%s3065_s8 + $0x70] sm:$0x3]  ;;  %vm274_vm2 = vcmask 998400  }
  0x51   : > { %v537_v21 = vrot.slane %v521_v19, 4  ;;  %v640_v38 = vld [vmem:[%s3065_s8 + $0x40] sm:$0x3]  ;;  %v642_v42 = vld [vmem:[%s3065_s8 + $0x50] sm:$0x3]  ;;  %s2914_s19 = smov 4  }
  0x52   : > { %v646_v55 = vld [vmem:[%s3065_s8 + $0x70] sm:$0x3]  ;;  %v696_v2 = vld [vmem:[%s3065_s8 + $0x38] sm:$0xc]  ;;  %v695_v3 = vld [vmem:[%s3065_s8 + $0x30] sm:$0xc] }
  0x53   : > { %vm4116_vm3 = vcmask 519170   ;;  %vm331_vm4 = vcmask 990208   ;;  %v700_v14 = vld [vmem:[%s3065_s8 + $0x58] sm:$0xc]  ;;  %v699_v15 = vld [vmem:[%s3065_s8 + $0x50] sm:$0xc] }
  0x54   : > { %319 = vrot.lane.b32.xlu1 %v311_v23, %s2907_s4  ;;  %317 = vrot.lane.b32.xlu0 %v310_v24, %s2907_s4  ;;  %v577_v23 = vld [vmem:[%s3065_s8 + $0x38] sm:$0x3]  ;;  %v594_v24 = vrot.slane %v578_v22, 2  ;;  %s2915_s20 = smov 126   ;;  %vm351_vm5 = vcmask 521220   ;;  %vm388_vm6 = vcmask 580608  }
  0x55   : > { %v593_v25 = vrot.slane %v577_v23, 2  ;;  %v750_v23 = vld [vmem:[%s3065_s8 + $0x40] sm:$0xc]  ;;  %s2916_s25 = smov 120   ;;  %vm408_vm7 = vcmask 523270   ;;  %vm438_vm8 = vcmask 572416  }
  0x56   : > { %s2917_s26 = smov 76   ;;  %vm494_vm9 = vcmask 564224   ;;  %vm555_vm10 = vcmask 154624   ;;  %s2918_s27 = smov 64   ;;  %vm617_vm11 = vcmask 146432   ;;  %vm671_vm12 = vcmask 138240  }
  0x57   : > { %s2919_s29 = smov 20   ;;  %s2920_s5 = smov 14   ;;  %vm725_vm13 = vcmask 31744   ;;  %vm782_vm14 = vcmask 1031168   ;;  %vm838_vm15 = vcmask 982016  }
  0x58   : > { %323 = vrot.lane.b32.xlu1 %v313_v27, %s2907_s4  ;;  %321 = vrot.lane.b32.xlu0 %v312_v28, %s2907_s4  ;;  %v579_v27 = vld [vmem:[%s3065_s8 + $0x48] sm:$0x3]  ;;  %v596_v28 = vrot.slane %v580_v26, 2  ;;  %s2921_s30 = smov 8   ;;  %s2922_s22 = smov 66  }
  0x59   : > { %v595_v29 = vrot.slane %v579_v27, 2  ;;  %p4163_p11 = scmp.ne.s32.totalorder %s4125_s23, 0 }
  0x5c   : > { %327 = vrot.lane.b32.xlu1 %v315_v31, %s2907_s4  ;;  %325 = vrot.lane.b32.xlu0 %v314_v32, %s2907_s4  ;;  %v581_v31 = vld [vmem:[%s3065_s8 + $0x58] sm:$0x3]  ;;  %v598_v32 = vrot.slane %v582_v30, 2 }
  0x5d   : > { %v597_v33 = vrot.slane %v581_v31, 2  ;;  %v752_v31 = vld [vmem:[%s3065_s8 + $0x50] sm:$0xc] }
  0x60   : > { %374 = vrot.lane.b32.xlu1 %v367_v35, %s2908_s6  ;;  %329 = vrot.lane.b32.xlu0 %v316_v36, %s2907_s4  ;;  %v583_v35 = vld [vmem:[%s3065_s8 + $0x68] sm:$0x3]  ;;  %v600_v36 = vrot.slane %v584_v34, 2  ;;  %s2923_s4 = smov 54  }
  0x61   : > { %v599_v37 = vrot.slane %v583_v35, 2 }
  0x64   : > { %378 = vrot.lane.b32.xlu1 %v369_v39, %s2908_s6  ;;  %376 = vrot.lane.b32.xlu0 %v368_v40, %s2908_s6  ;;  %v639_v39 = vld [vmem:[%s3065_s8 + $0x38] sm:$0x3] }
  0x68   : > { %382 = vrot.lane.b32.xlu1 %v371_v43, %s2908_s6  ;;  %380 = vrot.lane.b32.xlu0 %v370_v44, %s2908_s6  ;;  %v641_v43 = vld [vmem:[%s3065_s8 + $0x48] sm:$0x3] }
  0x6c   : > { %386 = vrot.lane.b32.xlu1 %v373_v47, %s2908_s6  ;;  %384 = vrot.lane.b32.xlu0 %v372_v48, %s2908_s6  ;;  %s2924_s6 = smov 42  }
  0x70   : > { %426 = vrot.lane.b32.xlu1 %v411_v49, %s2909_s7  ;;  %424 = vrot.lane.b32.xlu0 %v410_v50, %s2909_s7  ;;  %v644_v49 = vld [vmem:[%s3065_s8 + $0x60] sm:$0x3]  ;;  %v643_v50 = vld [vmem:[%s3065_s8 + $0x58] sm:$0x3] }
  0x74   : > { %430 = vrot.lane.b32.xlu1 %v413_v51, %s2909_s7  ;;  %428 = vrot.lane.b32.xlu0 %v412_v52, %s2909_s7 }
  0x78   : > { %434 = vrot.lane.b32.xlu1 %v415_v53, %s2909_s7  ;;  %432 = vrot.lane.b32.xlu0 %v414_v54, %s2909_s7 }
  0x7c   : > { %480 = vrot.lane.b32.xlu1 %v473_v56, %s2910_s9  ;;  %436 = vrot.lane.b32.xlu0 %v416_v57, %s2909_s7  ;;  %v645_v56 = vld [vmem:[%s3065_s8 + $0x68] sm:$0x3] }
  0x80   : > { %484 = vrot.lane.b32.xlu1 %v475_v60, %s2910_s9  ;;  %482 = vrot.lane.b32.xlu0 %v474_v61, %s2910_s9  ;;  %v694_v60 = vld [vmem:[%s3065_s8 + $0x28] sm:$0xc]  ;;  %v693_v61 = vld [vmem:[%s3065_s8 + $0x20] sm:$0xc] }
  0x84   : > { %488 = vrot.lane.b32.xlu1 %v477_v0, %s2910_s9  ;;  %486 = vrot.lane.b32.xlu0 %v476_v1, %s2910_s9 }
  0x88   : > { %492 = vrot.lane.b32.xlu1 %v479_v4, %s2910_s9  ;;  %490 = vrot.lane.b32.xlu0 %v478_v5, %s2910_s9  ;;  %s2925_s9 = smov 82  }
  0x8c   : > { %541 = vrot.lane.b32.xlu1 %v532_v8, %s2911_s10  ;;  %539 = vrot.lane.b32.xlu0 %v531_v9, %s2911_s10  ;;  %v698_v8 = vld [vmem:[%s3065_s8 + $0x48] sm:$0xc]  ;;  %v697_v9 = vld [vmem:[%s3065_s8 + $0x40] sm:$0xc] }
  0x90   : > { %545 = vrot.lane.b32.xlu1 %v534_v12, %s2911_s10  ;;  %543 = vrot.lane.b32.xlu0 %v533_v13, %s2911_s10 }
  0x94   : > { %549 = vrot.lane.b32.xlu1 %v536_v16, %s2911_s10  ;;  %547 = vrot.lane.b32.xlu0 %v535_v17, %s2911_s10  ;;  %v748_v16 = vld [vmem:[%s3065_s8 + $0x30] sm:$0xc]  ;;  %v747_v17 = vld [vmem:[%s3065_s8 + $0x28] sm:$0xc] }
  0x95   : > { %v761_v22 = vrot.slane %v747_v17, 6 }
  0x98   : > { %553 = vrot.lane.b32.xlu1 %v538_v20, %s2911_s10  ;;  %551 = vrot.lane.b32.xlu0 %v537_v21, %s2911_s10  ;;  %v762_v21 = vrot.slane %v748_v16, 6  ;;  %s2926_s10 = smov 58  }
  0x9c   : > { %603 = vrot.lane.b32.xlu1 %v594_v24, %s2912_s11  ;;  %601 = vrot.lane.b32.xlu0 %v593_v25, %s2912_s11  ;;  %v749_v24 = vld [vmem:[%s3065_s8 + $0x38] sm:$0xc] }
  0x9d   : > { %v763_v30 = vrot.slane %v749_v24, 6 }
  0xa0   : > { %607 = vrot.lane.b32.xlu1 %v596_v28, %s2912_s11  ;;  %605 = vrot.lane.b32.xlu0 %v595_v29, %s2912_s11  ;;  %v764_v29 = vrot.slane %v750_v23, 6 }
  0xa4   : > { %611 = vrot.lane.b32.xlu1 %v598_v32, %s2912_s11  ;;  %609 = vrot.lane.b32.xlu0 %v597_v33, %s2912_s11  ;;  %v751_v32 = vld [vmem:[%s3065_s8 + $0x48] sm:$0xc] }
  0xa8   : > { %615 = vrot.lane.b32.xlu1 %v600_v36, %s2912_s11  ;;  %613 = vrot.lane.b32.xlu0 %v599_v37, %s2912_s11  ;;  %v766_v37 = vrot.slane %v752_v31, 6  ;;  %s2927_s11 = smov 98  }
  0xaa   : > { %v208_v40 = vpop.permute.xlu1 %207  ;;  %v204_v41 = vpop.permute.xlu0 %203 }
  0xac   : > { %657 = vrot.lane.b32.xlu1 %v640_v38, %s2913_s17  ;;  %655 = vrot.lane.b32.xlu0 %v639_v39, %s2913_s17  ;;  %v765_v38 = vrot.slane %v751_v32, 6  ;;  %v803_v39 = vld [vmem:[%s3065_s8 + $0x28] sm:$0xc] }
  0xae   : > { %v210_v44 = vpop.permute.xlu1 %209  ;;  %v206_v45 = vpop.permute.xlu0 %205 }
  0xaf   : > { %v220_v46 = vsel %vm217_vm0, %v208_v40, %v210_v44  ;;  %v218_v47 = vsel %vm217_vm0, %v204_v41, %v206_v45  ;;  %v219_v48 = vsel %vm217_vm0, %v206_v45, %v208_v40  ;;  %v753_v40 = vld [vmem:[%s3065_s8 + $0x58] sm:$0xc] }
  0xb0   : > { %233 = vst [vmem:[#allocation2 + $0x10] sm:$0x3] %v220_v46  ;;  %231 = vst [vmem:[#allocation2] sm:$0x3] %v218_v47  ;;  %661 = vrot.lane.b32.xlu1 %v642_v42, %s2913_s17  ;;  %659 = vrot.lane.b32.xlu0 %v641_v43, %s2913_s17  ;;  %v767_v45 = vrot.slane %v753_v40, 6 }
  0xb1   : > { %232 = vst [vmem:[#allocation2 + $0x8] sm:$0x3] %v219_v48  ;;  %v805_v46 = vld [vmem:[%s3065_s8 + $0x38] sm:$0xc]  ;;  %v804_v47 = vld [vmem:[%s3065_s8 + $0x30] sm:$0xc] }
  0xb2   : > { %v214_v51 = vpop.permute.xlu1 %213  ;;  %v212_v52 = vpop.permute.xlu0 %211  ;;  %v916_v40 = vld [vmem:[%s3065_s8 + $0x40] sm:$0xc] }
  0xb3   : > { %v221_v53 = vsel %vm217_vm0, %v210_v44, %v212_v52  ;;  %v222_v54 = vsel %vm217_vm0, %v212_v52, %v214_v51  ;;  %v817_v44 = vrot.slane %v803_v39, 4  ;;  %v819_v52 = vrot.slane %v805_v46, 4  ;;  %v917_v39 = vld [vmem:[%s3065_s8 + $0x48] sm:$0xc]  ;;  %v918_v46 = vld [vmem:[%s3065_s8 + $0x50] sm:$0xc] }
  0xb4   : > { %234 = vst [vmem:[#allocation2 + $0x18] sm:$0x3] %v221_v53  ;;  %235 = vst [vmem:[#allocation2 + $0x20] sm:$0x3] %v222_v54  ;;  %665 = vrot.lane.b32.xlu1 %v644_v49, %s2913_s17  ;;  %663 = vrot.lane.b32.xlu0 %v643_v50, %s2913_s17  ;;  %v818_v53 = vrot.slane %v804_v47, 4 }
  0xb5   : > { %v807_v54 = vld [vmem:[%s3065_s8 + $0x48] sm:$0xc] }
  0xb6   : > { %v261_v57 = vpop.permute.xlu1 %260  ;;  %v216_v58 = vpop.permute.xlu0 %215 }
  0xb7   : > { %v223_v59 = vsel %vm217_vm0, %v214_v51, %v216_v58  ;;  %238 = vst.msk [vmem:[#allocation2 + $0x30] sm:$0x3] %vm4113_vm1, %v216_v58  ;;  %vm894_vm0 = vcmask 621568  }
  0xb8   : > { %236 = vst [vmem:[#allocation2 + $0x28] sm:$0x3] %v223_v59  ;;  %669 = vrot.lane.b32.xlu1 %v646_v55, %s2913_s17  ;;  %667 = vrot.lane.b32.xlu0 %v645_v56, %s2913_s17  ;;  %v806_v55 = vld [vmem:[%s3065_s8 + $0x40] sm:$0xc]  ;;  %s2928_s17 = smov 86  }
  0xba   : > { %v265_v62 = vpop.permute.xlu1 %264  ;;  %v263_v63 = vpop.permute.xlu0 %262 }
  0xbb   : > { %v275_v0 = vsel %vm274_vm2, %v261_v57, %v263_v63  ;;  %v276_v1 = vsel %vm274_vm2, %v263_v63, %v265_v62  ;;  %v808_v63 = vld [vmem:[%s3065_s8 + $0x50] sm:$0xc] }
  0xbc   : > { %288 = vst [vmem:[#allocation2] sm:$0xc] %v275_v0  ;;  %289 = vst [vmem:[#allocation2 + $0x8] sm:$0xc] %v276_v1  ;;  %711 = vrot.lane.b32.xlu1 %v694_v60, %s2914_s19  ;;  %709 = vrot.lane.b32.xlu0 %v693_v61, %s2914_s19  ;;  %v821_v60 = vrot.slane %v807_v54, 4  ;;  %v820_v61 = vrot.slane %v806_v55, 4 }
  0xbd   : > { %v963_v54 = vld [vmem:[%s3065_s8 + $0x38] sm:$0xc] }
  0xbe   : > { %v269_v4 = vpop.permute.xlu1 %268  ;;  %v267_v5 = vpop.permute.xlu0 %266 }
  0xbf   : > { %v277_v6 = vsel %vm274_vm2, %v265_v62, %v267_v5  ;;  %v278_v7 = vsel %vm274_vm2, %v267_v5, %v269_v4  ;;  %v809_v62 = vld [vmem:[%s3065_s8 + $0x58] sm:$0xc]  ;;  %v822_v5 = vrot.slane %v808_v63, 4 }
  0xc0   : > { %290 = vst [vmem:[#allocation2 + $0x10] sm:$0xc] %v277_v6  ;;  %291 = vst [vmem:[#allocation2 + $0x18] sm:$0xc] %v278_v7  ;;  %715 = vrot.lane.b32.xlu1 %v696_v2, %s2914_s19  ;;  %713 = vrot.lane.b32.xlu0 %v695_v3, %s2914_s19  ;;  %v860_v6 = vld [vmem:[%s3065_s8 + $0x40] sm:$0xc] }
  0xc1   : > { %v859_v7 = vld [vmem:[%s3065_s8 + $0x38] sm:$0xc] }
  0xc2   : > { %v273_v10 = vpop.permute.xlu1 %272  ;;  %v271_v11 = vpop.permute.xlu0 %270 }
  0xc3   : > { %295 = vst.msk [vmem:[#allocation2 + $0x30] sm:$0xc] %vm4116_vm3, %v273_v10  ;;  %v279_v12 = vsel %vm274_vm2, %v269_v4, %v271_v11  ;;  %v280_v13 = vsel %vm274_vm2, %v271_v11, %v273_v10  ;;  %v823_v4 = vrot.slane %v809_v62, 4  ;;  %v874_v11 = vrot.slane %v860_v6, 2 }
  0xc4   : > { %292 = vst [vmem:[#allocation2 + $0x20] sm:$0xc] %v279_v12  ;;  %293 = vst [vmem:[#allocation2 + $0x28] sm:$0xc] %v280_v13  ;;  %719 = vrot.lane.b32.xlu1 %v698_v8, %s2914_s19  ;;  %717 = vrot.lane.b32.xlu0 %v697_v9, %s2914_s19  ;;  %v873_v12 = vrot.slane %v859_v7, 2  ;;  %vm4122_vm2 = vcmask 523264  }
  0xc5   : > { %v862_v13 = vld [vmem:[%s3065_s8 + $0x50] sm:$0xc] }
  0xc6   : > { %v320_v18 = vpop.permute.xlu1 %319  ;;  %v318_v19 = vpop.permute.xlu0 %317 }
  0xc7   : > { %v332_v20 = vsel %vm331_vm4, %v318_v19, %v320_v18  ;;  %v876_v19 = vrot.slane %v862_v13, 2  ;;  %v967_v13 = vld [vmem:[%s3065_s8 + $0x58] sm:$0xc] }
  0xc8   : > { %345 = vst [vmem:[#allocation2] sm:$0x30] %v332_v20  ;;  %723 = vrot.lane.b32.xlu1 %v700_v14, %s2914_s19  ;;  %721 = vrot.lane.b32.xlu0 %v699_v15, %s2914_s19  ;;  %v861_v14 = vld [vmem:[%s3065_s8 + $0x48] sm:$0xc]  ;;  %s4111_s19 = smov 74  }
  0xc9   : > { %v875_v20 = vrot.slane %v861_v14, 2 }
  0xca   : > { %v324_v25 = vpop.permute.xlu1 %323  ;;  %v322_v26 = vpop.permute.xlu0 %321 }
  0xcb   : > { %v333_v27 = vsel %vm331_vm4, %v320_v18, %v322_v26  ;;  %v334_v28 = vsel %vm331_vm4, %v322_v26, %v324_v25 }
  0xcc   : > { %346 = vst [vmem:[#allocation2 + $0x8] sm:$0x30] %v333_v27  ;;  %347 = vst [vmem:[#allocation2 + $0x10] sm:$0x30] %v334_v28  ;;  %770 = vrot.lane.b32.xlu1 %v762_v21, %s2915_s20  ;;  %768 = vrot.lane.b32.xlu0 %v761_v22, %s2915_s20  ;;  %v864_v21 = vld [vmem:[%s3065_s8 + $0x60] sm:$0xc] }
  0xcd   : > { %v863_v22 = vld [vmem:[%s3065_s8 + $0x58] sm:$0xc]  ;;  %v878_v27 = vrot.slane %v864_v21, 2  ;;  %v1022_v21 = vld [vmem:[%s3065_s8 + $0x60] sm:$0xc] }
  0xce   : > { %v328_v33 = vpop.permute.xlu1 %327  ;;  %v326_v34 = vpop.permute.xlu0 %325  ;;  %v877_v28 = vrot.slane %v863_v22, 2 }
  0xcf   : > { %v335_v35 = vsel %vm331_vm4, %v324_v25, %v326_v34  ;;  %v336_v36 = vsel %vm331_vm4, %v326_v34, %v328_v33  ;;  %v915_v34 = vld [vmem:[%s3065_s8 + $0x38] sm:$0xc] }
  0xd0   : > { %348 = vst [vmem:[#allocation2 + $0x18] sm:$0x30] %v335_v35  ;;  %349 = vst [vmem:[#allocation2 + $0x20] sm:$0x30] %v336_v36  ;;  %774 = vrot.lane.b32.xlu1 %v764_v29, %s2915_s20  ;;  %772 = vrot.lane.b32.xlu0 %v763_v30, %s2915_s20  ;;  %v865_v29 = vld [vmem:[%s3065_s8 + $0x68] sm:$0xc] }
  0xd2   : > { %v375_v41 = vpop.permute.xlu1 %374  ;;  %v330_v42 = vpop.permute.xlu0 %329 }
  0xd3   : > { %v337_v43 = vsel %vm331_vm4, %v328_v33, %v330_v42  ;;  %352 = vst.msk [vmem:[#allocation2 + $0x30] sm:$0x30] %vm351_vm5, %v330_v42  ;;  %v879_v33 = vrot.slane %v865_v29, 2  ;;  %vm1059_vm4 = vcmask 162816  }
  0xd4   : > { %350 = vst [vmem:[#allocation2 + $0x28] sm:$0x30] %v337_v43  ;;  %778 = vrot.lane.b32.xlu1 %v766_v37, %s2915_s20  ;;  %776 = vrot.lane.b32.xlu0 %v765_v38, %s2915_s20 }
  0xd6   : > { %v379_v48 = vpop.permute.xlu1 %378  ;;  %v377_v49 = vpop.permute.xlu0 %376 }
  0xd7   : > { %v389_v50 = vsel %vm388_vm6, %v375_v41, %v377_v49  ;;  %v390_v51 = vsel %vm388_vm6, %v377_v49, %v379_v48 }
  0xd8   : > { %402 = vst [vmem:[#allocation2] sm:$0xc0] %v389_v50  ;;  %403 = vst [vmem:[#allocation2 + $0x8] sm:$0xc0] %v390_v51  ;;  %824 = vrot.lane.b32.xlu1 %v817_v44, %s2916_s25  ;;  %780 = vrot.lane.b32.xlu0 %v767_v45, %s2915_s20  ;;  %v919_v45 = vld [vmem:[%s3065_s8 + $0x58] sm:$0xc] }
  0xd9   : > { %v921_v51 = vld [vmem:[%s3065_s8 + $0x68] sm:$0xc]  ;;  %s4109_s20 = smov 110  }
  0xda   : > { %v383_v56 = vpop.permute.xlu1 %382  ;;  %v381_v57 = vpop.permute.xlu0 %380 }
  0xdb   : > { %v391_v58 = vsel %vm388_vm6, %v379_v48, %v381_v57  ;;  %v392_v59 = vsel %vm388_vm6, %v381_v57, %v383_v56 }
  0xdc   : > { %404 = vst [vmem:[#allocation2 + $0x10] sm:$0xc0] %v391_v58  ;;  %405 = vst [vmem:[#allocation2 + $0x18] sm:$0xc0] %v392_v59  ;;  %828 = vrot.lane.b32.xlu1 %v819_v52, %s2916_s25  ;;  %826 = vrot.lane.b32.xlu0 %v818_v53, %s2916_s25  ;;  %v920_v52 = vld [vmem:[%s3065_s8 + $0x60] sm:$0xc] }
  0xdd   : > { %v964_v53 = vld [vmem:[%s3065_s8 + $0x40] sm:$0xc]  ;;  %v977_v59 = vrot.slane %v963_v54, 6  ;;  %v1247_v54 = vld [vmem:[%s3065_s8 + $0x18] sm:$0x30] }
  0xde   : > { %v387_v0 = vpop.permute.xlu1 %386  ;;  %v385_v1 = vpop.permute.xlu0 %384  ;;  %v978_v58 = vrot.slane %v964_v53, 6  ;;  %v1248_v53 = vld [vmem:[%s3065_s8 + $0x20] sm:$0x30] }
  0xdf   : > { %409 = vst.msk [vmem:[#allocation2 + $0x30] sm:$0xc0] %vm408_vm7, %v387_v0  ;;  %v393_v2 = vsel %vm388_vm6, %v383_v56, %v385_v1  ;;  %v394_v3 = vsel %vm388_vm6, %v385_v1, %v387_v0  ;;  %vm1121_vm6 = vcmask 113664  }
  0xe0   : > { %406 = vst [vmem:[#allocation2 + $0x20] sm:$0xc0] %v393_v2  ;;  %407 = vst [vmem:[#allocation2 + $0x28] sm:$0xc0] %v394_v3  ;;  %832 = vrot.lane.b32.xlu1 %v821_v60, %s2916_s25  ;;  %830 = vrot.lane.b32.xlu0 %v820_v61, %s2916_s25  ;;  %v1020_v60 = vld [vmem:[%s3065_s8 + $0x50] sm:$0xc] }
  0xe1   : > { %v965_v61 = vld [vmem:[%s3065_s8 + $0x48] sm:$0xc]  ;;  %v1036_v2 = vrot.slane %v1020_v60, 4 }
  0xe2   : > { %v427_v8 = vpop.permute.xlu1 %426  ;;  %v425_v9 = vpop.permute.xlu0 %424  ;;  %v979_v3 = vrot.slane %v965_v61, 6 }
  0xe3   : > { %v439_v10 = vsel %vm438_vm8, %v425_v9, %v427_v8 }
  0xe4   : > { %452 = vst [vmem:[#allocation2 + $0x38] sm:$0x3] %v439_v10  ;;  %836 = vrot.lane.b32.xlu1 %v823_v4, %s2916_s25  ;;  %834 = vrot.lane.b32.xlu0 %v822_v5, %s2916_s25  ;;  %v966_v4 = vld [vmem:[%s3065_s8 + $0x50] sm:$0xc]  ;;  %v1021_v5 = vld [vmem:[%s3065_s8 + $0x58] sm:$0xc] }
  0xe5   : > { %v980_v10 = vrot.slane %v966_v4, 6  ;;  %s4107_s25 = smov 92  }
  0xe6   : > { %v431_v15 = vpop.permute.xlu1 %430  ;;  %v429_v16 = vpop.permute.xlu0 %428 }
  0xe7   : > { %v440_v17 = vsel %vm438_vm8, %v427_v8, %v429_v16  ;;  %v441_v18 = vsel %vm438_vm8, %v429_v16, %v431_v15 }
  0xe8   : > { %453 = vst [vmem:[#allocation2 + $0x40] sm:$0x3] %v440_v17  ;;  %454 = vst [vmem:[#allocation2 + $0x48] sm:$0x3] %v441_v18  ;;  %882 = vrot.lane.b32.xlu1 %v874_v11, %s2917_s26  ;;  %880 = vrot.lane.b32.xlu0 %v873_v12, %s2917_s26  ;;  %v1037_v11 = vrot.slane %v1021_v5, 4 }
  0xe9   : > { %v1019_v12 = vld [vmem:[%s3065_s8 + $0x48] sm:$0xc] }
  0xea   : > { %v435_v23 = vpop.permute.xlu1 %434  ;;  %v433_v24 = vpop.permute.xlu0 %432  ;;  %v1035_v18 = vrot.slane %v1019_v12, 4 }
  0xeb   : > { %v442_v25 = vsel %vm438_vm8, %v431_v15, %v433_v24  ;;  %v443_v26 = vsel %vm438_vm8, %v433_v24, %v435_v23 }
  0xec   : > { %455 = vst [vmem:[#allocation2 + $0x50] sm:$0x3] %v442_v25  ;;  %456 = vst [vmem:[#allocation2 + $0x58] sm:$0x3] %v443_v26  ;;  %886 = vrot.lane.b32.xlu1 %v876_v19, %s2917_s26  ;;  %884 = vrot.lane.b32.xlu0 %v875_v20, %s2917_s26  ;;  %v981_v19 = vrot.slane %v967_v13, 6  ;;  %v1038_v26 = vrot.slane %v1022_v21, 4 }
  0xed   : > { %v1023_v20 = vld [vmem:[%s3065_s8 + $0x68] sm:$0xc] }
  0xee   : > { %v481_v30 = vpop.permute.xlu1 %480  ;;  %v437_v31 = vpop.permute.xlu0 %436  ;;  %v1039_v25 = vrot.slane %v1023_v20, 4 }
  0xef   : > { %v444_v32 = vsel %vm438_vm8, %v435_v23, %v437_v31  ;;  %458 = vst.msk [vmem:[#allocation2 + $0x68] sm:$0x3] %vm4113_vm1, %v437_v31 }
  0xf0   : > { %457 = vst [vmem:[#allocation2 + $0x60] sm:$0x3] %v444_v32  ;;  %890 = vrot.lane.b32.xlu1 %v878_v27, %s2917_s26  ;;  %888 = vrot.lane.b32.xlu0 %v877_v28, %s2917_s26  ;;  %v1083_v27 = vld [vmem:[%s3065_s8 + $0x58] sm:$0xc]  ;;  %v1082_v28 = vld [vmem:[%s3065_s8 + $0x50] sm:$0xc] }
  0xf2   : > { %v485_v35 = vpop.permute.xlu1 %484  ;;  %v483_v36 = vpop.permute.xlu0 %482 }
  0xf3   : > { %v495_v37 = vsel %vm494_vm9, %v481_v30, %v483_v36  ;;  %v496_v38 = vsel %vm494_vm9, %v483_v36, %v485_v35 }
  0xf4   : > { %508 = vst [vmem:[#allocation2 + $0x38] sm:$0xc] %v495_v37  ;;  %509 = vst [vmem:[#allocation2 + $0x40] sm:$0xc] %v496_v38  ;;  %929 = vrot.lane.b32.xlu1 %v915_v34, %s2909_s7  ;;  %892 = vrot.lane.b32.xlu0 %v879_v33, %s2917_s26  ;;  %v1099_v33 = vrot.slane %v1083_v27, 2  ;;  %v1098_v34 = vrot.slane %v1082_v28, 2 }
  0xf5   : > { %s4105_s26 = smov 88  }
  0xf6   : > { %v489_v41 = vpop.permute.xlu1 %488  ;;  %v487_v42 = vpop.permute.xlu0 %486 }
  0xf7   : > { %v497_v43 = vsel %vm494_vm9, %v485_v35, %v487_v42  ;;  %v498_v44 = vsel %vm494_vm9, %v487_v42, %v489_v41 }
  0xf8   : > { %510 = vst [vmem:[#allocation2 + $0x48] sm:$0xc] %v497_v43  ;;  %511 = vst [vmem:[#allocation2 + $0x50] sm:$0xc] %v498_v44  ;;  %933 = vrot.lane.b32.xlu1 %v917_v39, %s2909_s7  ;;  %931 = vrot.lane.b32.xlu0 %v916_v40, %s2909_s7  ;;  %v1145_v39 = vld [vmem:[%s3065_s8 + $0x58] sm:$0xc] }
  0xf9   : > { %v1144_v40 = vld [vmem:[%s3065_s8 + $0x50] sm:$0xc] }
  0xfa   : > { %v493_v47 = vpop.permute.xlu1 %492  ;;  %v491_v48 = vpop.permute.xlu0 %490 }
  0xfb   : > { %514 = vst.msk [vmem:[#allocation2 + $0x68] sm:$0xc] %vm4116_vm3, %v493_v47  ;;  %v499_v49 = vsel %vm494_vm9, %v489_v41, %v491_v48  ;;  %v500_v50 = vsel %vm494_vm9, %v491_v48, %v493_v47  ;;  %vm1175_vm9 = vcmask 64512  }
  0xfc   : > { %512 = vst [vmem:[#allocation2 + $0x58] sm:$0xc] %v499_v49  ;;  %513 = vst [vmem:[#allocation2 + $0x60] sm:$0xc] %v500_v50  ;;  %937 = vrot.lane.b32.xlu1 %v919_v45, %s2909_s7  ;;  %935 = vrot.lane.b32.xlu0 %v918_v46, %s2909_s7  ;;  %v2168_v46 = vld [vmem:[#allocation2 + $0x8] sm:$0xff]  ;;  %v2167_v49 = vld [vmem:[#allocation2] sm:$0xff] }
  0xfd   : > { %v1199_v50 = vld [vmem:[%s3065_s8 + $0x20] sm:$0x30] }
  0xfe   : > { %v542_v55 = vpop.permute.xlu1 %541  ;;  %v540_v56 = vpop.permute.xlu0 %539 }
  0xff   : > { %v556_v57 = vsel %vm555_vm10, %v540_v56, %v542_v55 }
 0x100   : > { %570 = vst [vmem:[#allocation2 + $0x38] sm:$0x30] %v556_v57  ;;  %941 = vrot.lane.b32.xlu1 %v921_v51, %s2909_s7  ;;  %939 = vrot.lane.b32.xlu0 %v920_v52, %s2909_s7  ;;  %v1198_v52 = vld [vmem:[%s3065_s8 + $0x18] sm:$0x30] }
 0x102   : > { %v546_v62 = vpop.permute.xlu1 %545  ;;  %v544_v63 = vpop.permute.xlu0 %543 }
 0x103   : > { %v557_v0 = vsel %vm555_vm10, %v542_v55, %v544_v63  ;;  %v558_v1 = vsel %vm555_vm10, %v544_v63, %v546_v62  ;;  %v1264_v63 = vrot.slane %v1248_v53, 6 }
 0x104   : > { %571 = vst [vmem:[#allocation2 + $0x40] sm:$0x30] %v557_v0  ;;  %572 = vst [vmem:[#allocation2 + $0x48] sm:$0x30] %v558_v1  ;;  %986 = vrot.lane.b32.xlu1 %v978_v58, %s2918_s27  ;;  %984 = vrot.lane.b32.xlu0 %v977_v59, %s2918_s27  ;;  %v2170_v59 = vld [vmem:[#allocation2 + $0x18] sm:$0xff]  ;;  %v1263_v0 = vrot.slane %v1247_v54, 6 }
 0x106   : > { %v550_v6 = vpop.permute.xlu1 %549  ;;  %v548_v7 = vpop.permute.xlu0 %547 }
 0x107   : > { %v559_v8 = vsel %vm555_vm10, %v546_v62, %v548_v7  ;;  %v560_v9 = vsel %vm555_vm10, %v548_v7, %v550_v6  ;;  %v2169_v62 = vld [vmem:[#allocation2 + $0x10] sm:$0xff] }
 0x108   : > { %573 = vst [vmem:[#allocation2 + $0x50] sm:$0x30] %v559_v8  ;;  %574 = vst [vmem:[#allocation2 + $0x58] sm:$0x30] %v560_v9  ;;  %1045 = vrot.lane.b32.xlu1 %v1036_v2, %s2919_s29  ;;  %988 = vrot.lane.b32.xlu0 %v979_v3, %s2918_s27  ;;  %v1310_v2 = vld [vmem:[%s3065_s8 + $0x20] sm:$0x30] }
 0x109   : > { %v1309_v3 = vld [vmem:[%s3065_s8 + $0x18] sm:$0x30]  ;;  %v1326_v8 = vrot.slane %v1310_v2, 4 }
 0x10a   : > { %v554_v14 = vpop.permute.xlu1 %553  ;;  %v552_v15 = vpop.permute.xlu0 %551  ;;  %v1325_v9 = vrot.slane %v1309_v3, 4 }
 0x10b   : > { %v561_v16 = vsel %vm555_vm10, %v550_v6, %v552_v15  ;;  %v562_v17 = vsel %vm555_vm10, %v552_v15, %v554_v14  ;;  %vm1225_vm10 = vcmask 539648  }
 0x10c   : > { %575 = vst [vmem:[#allocation2 + $0x60] sm:$0x30] %v561_v16  ;;  %576 = vst.msk [vmem:[#allocation2 + $0x68] sm:$0x30] %vm351_vm5, %v562_v17  ;;  %990 = vrot.lane.b32.xlu1 %v980_v10, %s2918_s27  ;;  %1047 = vrot.lane.b32.xlu0 %v1037_v11, %s2919_s29  ;;  %v1372_v10 = vld [vmem:[%s3065_s8 + $0x48] sm:$0x30] }
 0x10d   : > { %v1371_v11 = vld [vmem:[%s3065_s8 + $0x40] sm:$0x30]  ;;  %v1386_v16 = vrot.slane %v1372_v10, 2 }
 0x10e   : > { %v604_v22 = vpop.permute.xlu1 %603  ;;  %v602_v23 = vpop.permute.xlu0 %601  ;;  %v1385_v17 = vrot.slane %v1371_v11, 2 }
 0x10f   : > { %v618_v24 = vsel %vm617_vm11, %v602_v23, %v604_v22  ;;  %v1427_v23 = vld [vmem:[%s3065_s8 + $0x40] sm:$0x30] }
 0x110   : > { %632 = vst [vmem:[#allocation2 + $0x38] sm:$0xc0] %v618_v24  ;;  %1043 = vrot.lane.b32.xlu1 %v1035_v18, %s2919_s29  ;;  %992 = vrot.lane.b32.xlu0 %v981_v19, %s2918_s27  ;;  %v1476_v24 = vld [vmem:[%s3065_s8 + $0x48] sm:$0x30] }
 0x112   : > { %v608_v29 = vpop.permute.xlu1 %607  ;;  %v606_v30 = vpop.permute.xlu0 %605 }
 0x113   : > { %v619_v31 = vsel %vm617_vm11, %v604_v22, %v606_v30  ;;  %v620_v32 = vsel %vm617_vm11, %v606_v30, %v608_v29  ;;  %v1428_v22 = vld [vmem:[%s3065_s8 + $0x48] sm:$0x30] }
 0x114   : > { %633 = vst [vmem:[#allocation2 + $0x40] sm:$0xc0] %v619_v31  ;;  %634 = vst [vmem:[#allocation2 + $0x48] sm:$0xc0] %v620_v32  ;;  %1051 = vrot.lane.b32.xlu1 %v1039_v25, %s2919_s29  ;;  %1049 = vrot.lane.b32.xlu0 %v1038_v26, %s2919_s29  ;;  %v1475_v25 = vld [vmem:[%s3065_s8 + $0x40] sm:$0x30] }
 0x115   : > { %v1491_v30 = vrot.slane %v1475_v25, 6  ;;  %v1084_v31 = vld [vmem:[%s3065_s8 + $0x60] sm:$0xc]  ;;  %v1081_v32 = vld [vmem:[%s3065_s8 + $0x48] sm:$0xc] }
 0x116   : > { %v612_v35 = vpop.permute.xlu1 %611  ;;  %v610_v36 = vpop.permute.xlu0 %609 }
 0x117   : > { %v621_v37 = vsel %vm617_vm11, %v608_v29, %v610_v36  ;;  %v622_v38 = vsel %vm617_vm11, %v610_v36, %v612_v35  ;;  %v2174_v43 = vld [vmem:[#allocation2 + $0x38] sm:$0xff]  ;;  %v1492_v29 = vrot.slane %v1476_v24, 6 }
 0x118   : > { %635 = vst [vmem:[#allocation2 + $0x50] sm:$0xc0] %v621_v37  ;;  %636 = vst [vmem:[#allocation2 + $0x58] sm:$0xc0] %v622_v38  ;;  %1109 = vrot.lane.b32.xlu1 %v1099_v33, %s2920_s5  ;;  %1107 = vrot.lane.b32.xlu0 %v1098_v34, %s2920_s5  ;;  %v2659_v51 = vpack.c.bf16 %v2174_v43, %v2167_v49  ;;  %v1100_v37 = vrot.slane %v1084_v31, 2  ;;  %v1097_v38 = vrot.slane %v1081_v32, 2 }
 0x119   : > { %v1373_v24 = vld [vmem:[%s3065_s8 + $0x50] sm:$0x30] }
 0x11a   : > { %v616_v41 = vpop.permute.xlu1 %615  ;;  %v614_v42 = vpop.permute.xlu0 %613 }
 0x11b   : > { %v623_v44 = vsel %vm617_vm11, %v612_v35, %v614_v42  ;;  %v624_v45 = vsel %vm617_vm11, %v614_v42, %v616_v41  ;;  %v2175_v47 = vld [vmem:[#allocation2 + $0x40] sm:$0xff]  ;;  %v2176_v57 = vld [vmem:[#allocation2 + $0x48] sm:$0xff]  ;;  %vm1286_vm11 = vcmask 441344  }
 0x11c   : > { %637 = vst [vmem:[#allocation2 + $0x60] sm:$0xc0] %v623_v44  ;;  %638 = vst.msk [vmem:[#allocation2 + $0x68] sm:$0xc0] %vm408_vm7, %v624_v45  ;;  %1163 = vrot.lane.b32.xlu1 %v1145_v39, %s2921_s30  ;;  %1161 = vrot.lane.b32.xlu0 %v1144_v40, %s2921_s30  ;;  %v2657_v48 = vpack.c.bf16 %v2175_v47, %v2168_v46  ;;  %v2675_v1 = vpack.c.bf16 %v2176_v57, %v2169_v62  ;;  %v1085_v39 = vld [vmem:[%s3065_s8 + $0x68] sm:$0xc] }
 0x11d   : > { %v1101_v44 = vrot.slane %v1085_v39, 2  ;;  %v1143_v45 = vld [vmem:[%s3065_s8 + $0x48] sm:$0xc]  ;;  %v1246_v57 = vld [vmem:[%s3065_s8 + $0x10] sm:$0x30] }
 0x11e   : > { %v658_v55 = vpop.permute.xlu1 %657  ;;  %2658 = vmatprep.subr.bf16.mxu0 %v2657_v48  ;;  %v656_v56 = vpop.permute.xlu0 %655  ;;  %v1262_v62 = vrot.slane %v1246_v57, 6  ;;  %v1698_v57 = vld [vmem:[%s3065_s8 + $0x8] sm:$0xc0] }
 0x11f   : > { %v672_v58 = vsel %vm671_vm12, %v656_v56, %v658_v55  ;;  %2660 = vmatpush1.bf16.msra.mxu0 %v2659_v51  ;;  %v2177_v60 = vld [vmem:[#allocation2 + $0x50] sm:$0xff]  ;;  %v1146_v51 = vld [vmem:[%s3065_s8 + $0x60] sm:$0xc]  ;;  %v1197_v56 = vld [vmem:[%s3065_s8 + $0x10] sm:$0x30] }
 0x120   : > { %686 = vst [vmem:[#allocation2 + $0x70] sm:$0x3] %v672_v58  ;;  %1215 = vrot.lane.b32.xlu1 %v1199_v50, %s2922_s22  ;;  %1213 = vrot.lane.b32.xlu0 %v1198_v52, %s2922_s22  ;;  %v2673_v61 = vpack.c.bf16 %v2177_v60, %v2170_v59  ;;  %v1147_v50 = vld [vmem:[%s3065_s8 + $0x68] sm:$0xc]  ;;  %1705 = vst [vmem:[#allocation2 + $0x158] sm:$0xc0] %v1698_v57 }
 0x122   : > { %v662_v4 = vpop.permute.xlu1 %661  ;;  %2674 = vmatprep.subr.bf16.mxu1 %v2673_v61  ;;  %v660_v5 = vpop.permute.xlu0 %659 }
 0x123   : > { %v673_v6 = vsel %vm671_vm12, %v658_v55, %v660_v5  ;;  %v674_v7 = vsel %vm671_vm12, %v660_v5, %v662_v4  ;;  %2676 = vmatpush1.bf16.msra.mxu1 %v2675_v1  ;;  %v1200_v55 = vld [vmem:[%s3065_s8 + $0x28] sm:$0x30] }
 0x124   : > { %687 = vst [vmem:[#allocation2 + $0x78] sm:$0x3] %v673_v6  ;;  %688 = vst [vmem:[#allocation2 + $0x80] sm:$0x3] %v674_v7  ;;  %1274 = vrot.lane.b32.xlu1 %v1264_v63, %s2923_s4  ;;  %1272 = vrot.lane.b32.xlu0 %v1263_v0, %s2923_s4  ;;  %v1201_v63 = vld [vmem:[%s3065_s8 + $0x30] sm:$0x30] }
 0x125   : > { %v1250_v0 = vld [vmem:[%s3065_s8 + $0x30] sm:$0x30]  ;;  %v1249_v1 = vld [vmem:[%s3065_s8 + $0x28] sm:$0x30] }
 0x126   : > { %v666_v12 = vpop.permute.xlu1 %665  ;;  %v664_v13 = vpop.permute.xlu0 %663  ;;  %v1266_v6 = vrot.slane %v1250_v0, 6  ;;  %v1265_v7 = vrot.slane %v1249_v1, 6 }
 0x127   : > { %v675_v14 = vsel %vm671_vm12, %v662_v4, %v664_v13  ;;  %v676_v15 = vsel %vm671_vm12, %v664_v13, %v666_v12 }
 0x128   : > { %689 = vst [vmem:[#allocation2 + $0x88] sm:$0x3] %v675_v14  ;;  %690 = vst [vmem:[#allocation2 + $0x90] sm:$0x3] %v676_v15  ;;  %1336 = vrot.lane.b32.xlu1 %v1326_v8, %s2924_s6  ;;  %1334 = vrot.lane.b32.xlu0 %v1325_v9, %s2924_s6  ;;  %v1311_v8 = vld [vmem:[%s3065_s8 + $0x28] sm:$0x30] }
 0x129   : > { %v1308_v9 = vld [vmem:[%s3065_s8 + $0x10] sm:$0x30]  ;;  %v1327_v13 = vrot.slane %v1311_v8, 4  ;;  %v1370_v15 = vld [vmem:[%s3065_s8 + $0x38] sm:$0x30] }
 0x12a   : > { %v670_v18 = vpop.permute.xlu1 %669  ;;  %v668_v19 = vpop.permute.xlu0 %667  ;;  %v1324_v14 = vrot.slane %v1308_v9, 4  ;;  %v1649_v8 = vld [vmem:[%s3065_s8 + $0x68] sm:$0x30]  ;;  %v1713_v9 = vld [vmem:[%s3065_s8 + $0x10] sm:$0xc0] }
 0x12b   : > { %v677_v20 = vsel %vm671_vm12, %v666_v12, %v668_v19  ;;  %v678_v21 = vsel %vm671_vm12, %v668_v19, %v670_v18  ;;  %vm1348_vm12 = vcmask 343040  }
 0x12c   : > { %691 = vst [vmem:[#allocation2 + $0x98] sm:$0x3] %v677_v20  ;;  %692 = vst.msk [vmem:[#allocation2 + $0xa0] sm:$0x3] %vm4113_vm1, %v678_v21  ;;  %1395 = vrot.lane.b32.xlu1 %v1386_v16, %s2925_s9  ;;  %1393 = vrot.lane.b32.xlu0 %v1385_v17, %s2925_s9  ;;  %v1312_v16 = vld [vmem:[%s3065_s8 + $0x30] sm:$0x30] }
 0x12d   : > { %v1384_v21 = vrot.slane %v1370_v15, 2  ;;  %v1727_v15 = vrot.slane %v1713_v9, 6  ;;  %v1651_v9 = vld [vmem:[%s3065_s8 + $0x78] sm:$0x30] }
 0x12e   : > { %v712_v26 = vpop.permute.xlu1 %711  ;;  %v710_v27 = vpop.permute.xlu0 %709 }
 0x12f   : > { %v726_v28 = vsel %vm725_vm13, %v710_v27, %v712_v26 }
 0x130   : > { %740 = vst [vmem:[#allocation2 + $0x70] sm:$0xc] %v726_v28  ;;  %1444 = vrot.lane.b32.xlu1 %v1428_v22, %s2909_s7  ;;  %1442 = vrot.lane.b32.xlu0 %v1427_v23, %s2909_s7  ;;  %v1328_v22 = vrot.slane %v1312_v16, 4  ;;  %v1374_v23 = vld [vmem:[%s3065_s8 + $0x58] sm:$0x30] }
 0x132   : > { %v716_v33 = vpop.permute.xlu1 %715  ;;  %v714_v34 = vpop.permute.xlu0 %713 }
 0x133   : > { %v727_v35 = vsel %vm725_vm13, %v712_v26, %v714_v34  ;;  %v728_v36 = vsel %vm725_vm13, %v714_v34, %v716_v33 }
 0x134   : > { %741 = vst [vmem:[#allocation2 + $0x78] sm:$0xc] %v727_v35  ;;  %742 = vst [vmem:[#allocation2 + $0x80] sm:$0xc] %v728_v36  ;;  %1502 = vrot.lane.b32.xlu1 %v1492_v29, %s2926_s10  ;;  %1500 = vrot.lane.b32.xlu0 %v1491_v30, %s2926_s10  ;;  %v1388_v29 = vrot.slane %v1374_v23, 2  ;;  %v1387_v30 = vrot.slane %v1373_v24, 2 }
 0x135   : > { %v1429_v35 = vld [vmem:[%s3065_s8 + $0x50] sm:$0x30]  ;;  %v1426_v36 = vld [vmem:[%s3065_s8 + $0x38] sm:$0x30] }
 0x136   : > { %v720_v40 = vpop.permute.xlu1 %719  ;;  %v718_v41 = vpop.permute.xlu0 %717 }
 0x137   : > { %v729_v42 = vsel %vm725_vm13, %v716_v33, %v718_v41  ;;  %v730_v43 = vsel %vm725_vm13, %v718_v41, %v720_v40 }
 0x138   : > { %743 = vst [vmem:[#allocation2 + $0x88] sm:$0xc] %v729_v42  ;;  %744 = vst [vmem:[#allocation2 + $0x90] sm:$0xc] %v730_v43  ;;  %1111 = vrot.lane.b32.xlu1 %v1100_v37, %s2920_s5  ;;  %1105 = vrot.lane.b32.xlu0 %v1097_v38, %s2920_s5  ;;  %v1474_v37 = vld [vmem:[%s3065_s8 + $0x38] sm:$0x30] }
 0x139   : > { %v1490_v41 = vrot.slane %v1474_v37, 6  ;;  %v1430_v42 = vld [vmem:[%s3065_s8 + $0x58] sm:$0x30] }
 0x13a   : > { %v724_v46 = vpop.permute.xlu1 %723  ;;  %v722_v47 = vpop.permute.xlu0 %721  ;;  %v1478_v43 = vld [vmem:[%s3065_s8 + $0x58] sm:$0x30] }
 0x13b   : > { %v731_v48 = vsel %vm725_vm13, %v720_v40, %v722_v47  ;;  %v732_v49 = vsel %vm725_vm13, %v722_v47, %v724_v46  ;;  %v1539_v37 = vld [vmem:[%s3065_s8 + $0x78] sm:$0x30]  ;;  %vm4115_vm13 = vcmask 670720  }
 0x13c   : > { %745 = vst [vmem:[#allocation2 + $0x98] sm:$0xc] %v731_v48  ;;  %746 = vst.msk [vmem:[#allocation2 + $0xa0] sm:$0xc] %vm4116_vm3, %v732_v49  ;;  %1159 = vrot.lane.b32.xlu1 %v1143_v45, %s2921_s30  ;;  %1113 = vrot.lane.b32.xlu0 %v1101_v44, %s2920_s5  ;;  %v1477_v44 = vld [vmem:[%s3065_s8 + $0x50] sm:$0x30] }
 0x13d   : > { %v1494_v49 = vrot.slane %v1478_v43, 6  ;;  %v1553_v43 = vrot.slane %v1539_v37, 4  ;;  %v1823_v37 = vld [vmem:[%s3065_s8 + $0x38] sm:$0xc0] }
 0x13e   : > { %v771_v52 = vpop.permute.xlu1 %770  ;;  %v769_v53 = vpop.permute.xlu0 %768 }
 0x13f   : > { %v783_v54 = vsel %vm782_vm14, %v769_v53, %v771_v52 }
 0x140   : > { %796 = vst [vmem:[#allocation2 + $0x70] sm:$0x30] %v783_v54  ;;  %1167 = vrot.lane.b32.xlu1 %v1147_v50, %s2921_s30  ;;  %1165 = vrot.lane.b32.xlu0 %v1146_v51, %s2921_s30  ;;  %v1493_v50 = vrot.slane %v1477_v44, 6  ;;  %v1538_v51 = vld [vmem:[%s3065_s8 + $0x70] sm:$0x30] }
 0x142   : > { %v775_v58 = vpop.permute.xlu1 %774  ;;  %v773_v59 = vpop.permute.xlu0 %772 }
 0x143   : > { %v784_v60 = vsel %vm782_vm14, %v771_v52, %v773_v59  ;;  %v785_v61 = vsel %vm782_vm14, %v773_v59, %v775_v58  ;;  %v1537_v52 = vld [vmem:[%s3065_s8 + $0x68] sm:$0x30] }
 0x144   : > { %797 = vst [vmem:[#allocation2 + $0x78] sm:$0x30] %v784_v60  ;;  %798 = vst [vmem:[#allocation2 + $0x80] sm:$0x30] %v785_v61  ;;  %1217 = vrot.lane.b32.xlu1 %v1200_v55, %s2922_s22  ;;  %1211 = vrot.lane.b32.xlu0 %v1197_v56, %s2922_s22  ;;  %v1551_v59 = vrot.slane %v1537_v52, 4 }
 0x145   : > { %v1594_v60 = vld [vmem:[%s3065_s8 + $0x70] sm:$0x30]  ;;  %v1593_v61 = vld [vmem:[%s3065_s8 + $0x68] sm:$0x30]  ;;  %v1699_v52 = vld [vmem:[%s3065_s8 + $0x10] sm:$0xc0] }
 0x146   : > { %v779_v2 = vpop.permute.xlu1 %778  ;;  %v777_v3 = vpop.permute.xlu0 %776  ;;  %v1608_v1 = vrot.slane %v1594_v60, 2  ;;  %1706 = vst [vmem:[#allocation2 + $0x160] sm:$0xc0] %v1699_v52 }
 0x147   : > { %v786_v4 = vsel %vm782_vm14, %v775_v58, %v777_v3  ;;  %v787_v5 = vsel %vm782_vm14, %v777_v3, %v779_v2  ;;  %v1552_v58 = vrot.slane %v1538_v51, 4  ;;  %v1697_v51 = vld [vmem:[%s3065_s8] sm:$0xc0] }
 0x148   : > { %799 = vst [vmem:[#allocation2 + $0x88] sm:$0x30] %v786_v4  ;;  %800 = vst [vmem:[#allocation2 + $0x90] sm:$0x30] %v787_v5  ;;  %1270 = vrot.lane.b32.xlu1 %v1262_v62, %s2923_s4  ;;  %1219 = vrot.lane.b32.xlu0 %v1201_v63, %s2922_s22 }
 0x149   : > { %1704 = vst [vmem:[#allocation2 + $0x150] sm:$0xc0] %v1697_v51 }
 0x14a   : > { %v825_v10 = vpop.permute.xlu1 %824  ;;  %v781_v11 = vpop.permute.xlu0 %780 }
 0x14b   : > { %v788_v12 = vsel %vm782_vm14, %v779_v2, %v781_v11  ;;  %802 = vst.msk [vmem:[#allocation2 + $0xa0] sm:$0x30] %vm351_vm5, %v781_v11  ;;  %v1607_v2 = vrot.slane %v1593_v61, 2  ;;  %vm4114_vm14 = vcmask 474112  }
 0x14c   : > { %801 = vst [vmem:[#allocation2 + $0x98] sm:$0x30] %v788_v12  ;;  %1278 = vrot.lane.b32.xlu1 %v1266_v6, %s2923_s4  ;;  %1276 = vrot.lane.b32.xlu0 %v1265_v7, %s2923_s4  ;;  %v1650_v7 = vld [vmem:[%s3065_s8 + $0x70] sm:$0x30] }
 0x14e   : > { %v829_v17 = vpop.permute.xlu1 %828  ;;  %v827_v18 = vpop.permute.xlu0 %826 }
 0x14f   : > { %v839_v19 = vsel %vm838_vm15, %v825_v10, %v827_v18  ;;  %v840_v20 = vsel %vm838_vm15, %v827_v18, %v829_v17  ;;  %v1712_v10 = vld [vmem:[%s3065_s8 + $0x8] sm:$0xc0] }
 0x150   : > { %852 = vst [vmem:[#allocation2 + $0x70] sm:$0xc0] %v839_v19  ;;  %853 = vst [vmem:[#allocation2 + $0x78] sm:$0xc0] %v840_v20  ;;  %1338 = vrot.lane.b32.xlu1 %v1327_v13, %s2924_s6  ;;  %1332 = vrot.lane.b32.xlu0 %v1324_v14, %s2924_s6  ;;  %v1726_v16 = vrot.slane %v1712_v10, 6 }
 0x151   : > { %v1768_v18 = vld [vmem:[%s3065_s8 + $0x8] sm:$0xc0]  ;;  %v1648_v10 = vld [vmem:[%s3065_s8 + $0x60] sm:$0x30] }
 0x152   : > { %v833_v25 = vpop.permute.xlu1 %832  ;;  %v831_v26 = vpop.permute.xlu0 %830  ;;  %v1782_v24 = vrot.slane %v1768_v18, 4 }
 0x153   : > { %v841_v27 = vsel %vm838_vm15, %v829_v17, %v831_v26  ;;  %v842_v28 = vsel %vm838_vm15, %v831_v26, %v833_v25  ;;  %v1769_v17 = vld [vmem:[%s3065_s8 + $0x10] sm:$0xc0]  ;;  %v1824_v26 = vld [vmem:[%s3065_s8 + $0x40] sm:$0xc0] }
 0x154   : > { %854 = vst [vmem:[#allocation2 + $0x80] sm:$0xc0] %v841_v27  ;;  %855 = vst [vmem:[#allocation2 + $0x88] sm:$0xc0] %v842_v28  ;;  %1391 = vrot.lane.b32.xlu1 %v1384_v21, %s2925_s9  ;;  %1340 = vrot.lane.b32.xlu0 %v1328_v22, %s2924_s6  ;;  %v1783_v23 = vrot.slane %v1769_v17, 4 }
 0x156   : > { %v837_v31 = vpop.permute.xlu1 %836  ;;  %v835_v32 = vpop.permute.xlu0 %834 }
 0x157   : > { %858 = vst.msk [vmem:[#allocation2 + $0xa0] sm:$0xc0] %vm408_vm7, %v837_v31  ;;  %v843_v33 = vsel %vm838_vm15, %v833_v25, %v835_v32  ;;  %v844_v34 = vsel %vm838_vm15, %v835_v32, %v837_v31  ;;  %v1825_v25 = vld [vmem:[%s3065_s8 + $0x48] sm:$0xc0]  ;;  %v1838_v31 = vrot.slane %v1824_v26, 2  ;;  %v2182_v61 = vld [vmem:[#allocation2 + $0x78] sm:$0xff] }
 0x158   : > { %856 = vst [vmem:[#allocation2 + $0x90] sm:$0xc0] %v843_v33  ;;  %857 = vst [vmem:[#allocation2 + $0x98] sm:$0xc0] %v844_v34  ;;  %1399 = vrot.lane.b32.xlu1 %v1388_v29, %s2925_s9  ;;  %1397 = vrot.lane.b32.xlu0 %v1387_v30, %s2925_s9  ;;  %v1839_v30 = vrot.slane %v1825_v25, 2  ;;  %vm1571_vm15 = vcmask 801792  }
 0x15a   : > { %v883_v38 = vpop.permute.xlu1 %882  ;;  %v881_v39 = vpop.permute.xlu0 %880 }
 0x15b   : > { %v895_v40 = vsel %vm894_vm0, %v881_v39, %v883_v38  ;;  %v2183_v17 = vld [vmem:[#allocation2 + $0x80] sm:$0xff] }
 0x15c   : > { %908 = vst [vmem:[#allocation2 + $0xa8] sm:$0x3] %v895_v40  ;;  %1446 = vrot.lane.b32.xlu1 %v1429_v35, %s2909_s7  ;;  %1440 = vrot.lane.b32.xlu0 %v1426_v36, %s2909_s7  ;;  %v1881_v35 = vld [vmem:[%s3065_s8 + $0x48] sm:$0xc0]  ;;  %v1880_v36 = vld [vmem:[%s3065_s8 + $0x40] sm:$0xc0] }
 0x15e   : > { %v887_v45 = vpop.permute.xlu1 %886  ;;  %v885_v46 = vpop.permute.xlu0 %884 }
 0x15f   : > { %v896_v47 = vsel %vm894_vm0, %v883_v38, %v885_v46  ;;  %v897_v48 = vsel %vm894_vm0, %v885_v46, %v887_v45  ;;  %v1536_v38 = vld [vmem:[%s3065_s8 + $0x60] sm:$0x30] }
 0x160   : > { %909 = vst [vmem:[#allocation2 + $0xb0] sm:$0x3] %v896_v47  ;;  %910 = vst [vmem:[#allocation2 + $0xb8] sm:$0x3] %v897_v48  ;;  %1498 = vrot.lane.b32.xlu1 %v1490_v41, %s2926_s10  ;;  %1448 = vrot.lane.b32.xlu0 %v1430_v42, %s2909_s7  ;;  %v1550_v44 = vrot.slane %v1536_v38, 4 }
 0x161   : > { %v1540_v46 = vld [vmem:[%s3065_s8 + $0x80] sm:$0x30]  ;;  %v1771_v38 = vld [vmem:[%s3065_s8 + $0x20] sm:$0xc0] }
 0x162   : > { %v891_v53 = vpop.permute.xlu1 %890  ;;  %v889_v54 = vpop.permute.xlu0 %888 }
 0x163   : > { %v898_v55 = vsel %vm894_vm0, %v887_v45, %v889_v54  ;;  %v899_v56 = vsel %vm894_vm0, %v889_v54, %v891_v53  ;;  %v1592_v45 = vld [vmem:[%s3065_s8 + $0x60] sm:$0x30]  ;;  %v1554_v54 = vrot.slane %v1540_v46, 4 }
 0x164   : > { %911 = vst [vmem:[#allocation2 + $0xc0] sm:$0x3] %v898_v55  ;;  %912 = vst [vmem:[#allocation2 + $0xc8] sm:$0x3] %v899_v56  ;;  %1506 = vrot.lane.b32.xlu1 %v1494_v49, %s2926_s10  ;;  %1504 = vrot.lane.b32.xlu0 %v1493_v50, %s2926_s10  ;;  %v1596_v55 = vld [vmem:[%s3065_s8 + $0x80] sm:$0x30] }
 0x165   : > { %v1595_v56 = vld [vmem:[%s3065_s8 + $0x78] sm:$0x30] }
 0x166   : > { %v930_v62 = vpop.permute.xlu1 %929  ;;  %v893_v63 = vpop.permute.xlu0 %892 }
 0x167   : > { %v900_v0 = vsel %vm894_vm0, %v891_v53, %v893_v63  ;;  %914 = vst.msk [vmem:[#allocation2 + $0xd8] sm:$0x3] %vm4113_vm1, %v893_v63  ;;  %v1606_v53 = vrot.slane %v1592_v45, 2  ;;  %v1700_v63 = vld [vmem:[%s3065_s8 + $0x18] sm:$0xc0]  ;;  %vm1627_vm0 = vcmask 703488  }
 0x168   : > { %913 = vst [vmem:[#allocation2 + $0xd0] sm:$0x3] %v900_v0  ;;  %1561 = vrot.lane.b32.xlu1 %v1552_v58, %s2927_s11  ;;  %1559 = vrot.lane.b32.xlu0 %v1551_v59, %s2927_s11  ;;  %1707 = vst [vmem:[#allocation2 + $0x168] sm:$0xc0] %v1700_v63  ;;  %v1826_v45 = vld [vmem:[%s3065_s8 + $0x50] sm:$0xc0] }
 0x169   : > { %v1840_v51 = vrot.slane %v1826_v45, 2  ;;  %v1883_v63 = vld [vmem:[%s3065_s8 + $0x58] sm:$0xc0]  ;;  %v1992_v45 = vld [vmem:[%s3065_s8 + $0x88] sm:$0xc0]  ;;  %vm4120_vm1 = vcmask 605184  }
 0x16a   : > { %v934_v3 = vpop.permute.xlu1 %933  ;;  %v932_v4 = vpop.permute.xlu0 %931 }
 0x16b   : > { %v943_v5 = vsel %vm438_vm8, %v930_v62, %v932_v4  ;;  %v944_v6 = vsel %vm438_vm8, %v932_v4, %v934_v3 }
 0x16c   : > { %956 = vst [vmem:[#allocation2 + $0xa8] sm:$0xc] %v943_v5  ;;  %957 = vst [vmem:[#allocation2 + $0xb0] sm:$0xc] %v944_v6  ;;  %1617 = vrot.lane.b32.xlu1 %v1608_v1, %s2928_s17  ;;  %1615 = vrot.lane.b32.xlu0 %v1607_v2, %s2928_s17  ;;  %v1610_v1 = vrot.slane %v1596_v55, 2  ;;  %v1609_v2 = vrot.slane %v1595_v56, 2 }
 0x16d   : > { %v2181_v6 = vld [vmem:[#allocation2 + $0x70] sm:$0xff]  ;;  %v1882_v55 = vld [vmem:[%s3065_s8 + $0x50] sm:$0xc0] }
 0x16e   : > { %v938_v11 = vpop.permute.xlu1 %937  ;;  %v936_v12 = vpop.permute.xlu0 %935  ;;  %v1879_v56 = vld [vmem:[%s3065_s8 + $0x38] sm:$0xc0] }
 0x16f   : > { %v945_v13 = vsel %vm438_vm8, %v934_v3, %v936_v12  ;;  %v946_v14 = vsel %vm438_vm8, %v936_v12, %v938_v11 }
 0x170   : > { %958 = vst [vmem:[#allocation2 + $0xb8] sm:$0xc] %v945_v13  ;;  %959 = vst [vmem:[#allocation2 + $0xc0] sm:$0xc] %v946_v14  ;;  %1666 = vrot.lane.b32.xlu1 %v1650_v7, %s4111_s19  ;;  %1664 = vrot.lane.b32.xlu0 %v1649_v8, %s4111_s19  ;;  %v2184_v14 = vld [vmem:[#allocation2 + $0x88] sm:$0xff] }
 0x172   : > { %v942_v19 = vpop.permute.xlu1 %941  ;;  %v940_v20 = vpop.permute.xlu0 %939 }
 0x173   : > { %962 = vst.msk [vmem:[#allocation2 + $0xd8] sm:$0xc] %vm4116_vm3, %v942_v19  ;;  %v947_v21 = vsel %vm438_vm8, %v938_v11, %v940_v20  ;;  %v948_v22 = vsel %vm438_vm8, %v940_v20, %v942_v19  ;;  %v1711_v11 = vld [vmem:[%s3065_s8] sm:$0xc0]  ;;  %vm4117_vm3 = vcmask 719872  }
 0x174   : > { %960 = vst [vmem:[#allocation2 + $0xc8] sm:$0xc] %v947_v21  ;;  %961 = vst [vmem:[#allocation2 + $0xd0] sm:$0xc] %v948_v22  ;;  %1736 = vrot.lane.b32.xlu1 %v1727_v15, %s4109_s20  ;;  %1734 = vrot.lane.b32.xlu0 %v1726_v16, %s4109_s20  ;;  %v1725_v21 = vrot.slane %v1711_v11, 6 }
 0x175   : > { %v1652_v22 = vld [vmem:[%s3065_s8 + $0x80] sm:$0x30]  ;;  %v1991_v11 = vld [vmem:[%s3065_s8 + $0x80] sm:$0xc0] }
 0x176   : > { %v987_v27 = vpop.permute.xlu1 %986  ;;  %v985_v28 = vpop.permute.xlu0 %984 }
 0x177   : > { %v999_v29 = vsel %vm4122_vm2, %v985_v28, %v987_v27 }
 0x178   : > { %1012 = vst [vmem:[#allocation2 + $0xa8] sm:$0x30] %v999_v29  ;;  %1792 = vrot.lane.b32.xlu1 %v1783_v23, %s4107_s25  ;;  %1790 = vrot.lane.b32.xlu0 %v1782_v24, %s4107_s25  ;;  %v1715_v23 = vld [vmem:[%s3065_s8 + $0x20] sm:$0xc0]  ;;  %v1714_v24 = vld [vmem:[%s3065_s8 + $0x18] sm:$0xc0] }
 0x179   : > { %v1729_v28 = vrot.slane %v1715_v23, 6  ;;  %v1728_v29 = vrot.slane %v1714_v24, 6 }
 0x17a   : > { %v1046_v32 = vpop.permute.xlu1 %1045  ;;  %v989_v33 = vpop.permute.xlu0 %988 }
 0x17b   : > { %v1000_v34 = vsel %vm4122_vm2, %v987_v27, %v989_v33 }
 0x17c   : > { %1013 = vst [vmem:[#allocation2 + $0xb0] sm:$0x30] %v1000_v34  ;;  %1848 = vrot.lane.b32.xlu1 %v1839_v30, %s4105_s26  ;;  %1846 = vrot.lane.b32.xlu0 %v1838_v31, %s4105_s26  ;;  %v1770_v30 = vld [vmem:[%s3065_s8 + $0x18] sm:$0xc0]  ;;  %v1767_v31 = vld [vmem:[%s3065_s8] sm:$0xc0] }
 0x17e   : > { %v991_v39 = vpop.permute.xlu1 %990  ;;  %v1048_v40 = vpop.permute.xlu0 %1047 }
 0x17f   : > { %v1001_v41 = vsel %vm4122_vm2, %v989_v33, %v991_v39  ;;  %v1061_v42 = vsel %vm1059_vm4, %v1046_v32, %v1048_v40 }
 0x180   : > { %1014 = vst [vmem:[#allocation2 + $0xb8] sm:$0x30] %v1001_v41  ;;  %1075 = vst [vmem:[#allocation2 + $0xb0] sm:$0xc0] %v1061_v42  ;;  %1897 = vrot.lane.b32.xlu1 %v1881_v35, %s2909_s7  ;;  %1895 = vrot.lane.b32.xlu0 %v1880_v36, %s2909_s7  ;;  %v1784_v35 = vrot.slane %v1770_v30, 4  ;;  %v1781_v36 = vrot.slane %v1767_v31, 4 }
 0x181   : > { %v1837_v42 = vrot.slane %v1823_v37, 2  ;;  %v1931_v37 = vld [vmem:[%s3065_s8 + $0x58] sm:$0xc0] }
 0x182   : > { %v1044_v47 = vpop.permute.xlu1 %1043  ;;  %v3463_v48 = vpop.permute.xlu0 %992 }
 0x183   : > { %v1060_v49 = vsel %vm1059_vm4, %v1044_v47, %v1046_v32  ;;  %v1002_v50 = vsel %vm4122_vm2, %v991_v39, %v3463_v48 }
 0x184   : > { %1074 = vst [vmem:[#allocation2 + $0xa8] sm:$0xc0] %v1060_v49  ;;  %1015 = vst [vmem:[#allocation2 + $0xc0] sm:$0x30] %v1002_v50  ;;  %1563 = vrot.lane.b32.xlu1 %v1553_v43, %s2927_s11  ;;  %1557 = vrot.lane.b32.xlu0 %v1550_v44, %s2927_s11  ;;  %v1785_v43 = vrot.slane %v1771_v38, 4 }
 0x185   : > { %v1827_v44 = vld [vmem:[%s3065_s8 + $0x58] sm:$0xc0]  ;;  %v1930_v38 = vld [vmem:[%s3065_s8 + $0x50] sm:$0xc0] }
 0x186   : > { %v3474_v57 = vpop.permute.xlu1 %1051  ;;  %v1050_v58 = vpop.permute.xlu0 %1049  ;;  %v1841_v50 = vrot.slane %v1827_v44, 2  ;;  %v1946_v44 = vrot.slane %v1930_v38, 6 }
 0x187   : > { %v1062_v59 = vsel %vm1059_vm4, %v1048_v40, %v1050_v58  ;;  %v1063_v60 = vsel %vm1059_vm4, %v1050_v58, %v3474_v57  ;;  %v2189_v62 = vld [vmem:[#allocation2 + $0xb0] sm:$0xff]  ;;  %v1928_v58 = vld [vmem:[%s3065_s8 + $0x40] sm:$0xc0] }
 0x188   : > { %1076 = vst [vmem:[#allocation2 + $0xb8] sm:$0xc0] %v1062_v59  ;;  %1077 = vst [vmem:[#allocation2 + $0xc0] sm:$0xc0] %v1063_v60  ;;  %1613 = vrot.lane.b32.xlu1 %v1606_v53, %s2928_s17  ;;  %1565 = vrot.lane.b32.xlu0 %v1554_v54, %s2927_s11  ;;  %v2661_v0 = vpack.c.bf16 %v2189_v62, %v2182_v61  ;;  %v1944_v62 = vrot.slane %v1928_v58, 6 }
 0x189   : > { %v2051_v58 = vld [vmem:[%s3065_s8 + $0x70] sm:$0xc0] }
 0x18a   : > { %v3482_v3 = vpop.permute.xlu1 %1109  ;;  %2662 = vmatprep.subr.bf16.mxu0 %v2661_v0  ;;  %v3484_v4 = vpop.permute.xlu0 %1107  ;;  %v1990_v0 = vld [vmem:[%s3065_s8 + $0x78] sm:$0xc0] }
 0x18b   : > { %v1123_v5 = vsel %vm1121_vm6, %v3484_v4, %v3482_v3  ;;  %v2188_v7 = vld [vmem:[#allocation2 + $0xa8] sm:$0xff] }
 0x18c   : > { %1137 = vst [vmem:[#allocation2 + $0xe8] sm:$0x3] %v1123_v5  ;;  %1621 = vrot.lane.b32.xlu1 %v1610_v1, %s2928_s17  ;;  %1619 = vrot.lane.b32.xlu0 %v1609_v2, %s2928_s17  ;;  %v2663_v8 = vpack.c.bf16 %v2188_v7, %v2181_v6  ;;  %v1929_v1 = vld [vmem:[%s3065_s8 + $0x48] sm:$0xc0] }
 0x18e   : > { %v3494_v12 = vpop.permute.xlu1 %1163  ;;  %2664 = vmatpush1.bf16.msra.mxu0 %v2663_v8  ;;  %v3496_v13 = vpop.permute.xlu0 %1161  ;;  %v2006_v8 = vrot.slane %v1990_v0, 4 }
 0x18f   : > { %v1177_v15 = vsel %vm1175_vm9, %v3496_v13, %v3494_v12  ;;  %v2191_v16 = vld [vmem:[#allocation2 + $0xc0] sm:$0xff]  ;;  %v2190_v18 = vld [vmem:[#allocation2 + $0xb8] sm:$0xff] }
 0x190   : > { %1191 = vst [vmem:[#allocation2 + $0xe8] sm:$0xc] %v1177_v15  ;;  %1668 = vrot.lane.b32.xlu1 %v1651_v9, %s4111_s19  ;;  %1662 = vrot.lane.b32.xlu0 %v1648_v10, %s4111_s19  ;;  %v2677_v19 = vpack.c.bf16 %v2191_v16, %v2184_v14  ;;  %v2679_v20 = vpack.c.bf16 %v2190_v18, %v2183_v17  ;;  %v1945_v9 = vrot.slane %v1929_v1, 6  ;;  %v2052_v10 = vld [vmem:[%s3065_s8 + $0x78] sm:$0xc0]  ;;  %v2067_v1 = vrot.slane %v2051_v58, 2 }
 0x192   : > { %v3506_v25 = vpop.permute.xlu1 %1215  ;;  %2678 = vmatprep.subr.bf16.mxu1 %v2677_v19  ;;  %v3508_v26 = vpop.permute.xlu0 %1213  ;;  %v2068_v19 = vrot.slane %v2052_v10, 2 }
 0x193   : > { %v1227_v27 = vsel %vm1225_vm10, %v3508_v26, %v3506_v25  ;;  %2680 = vmatpush1.bf16.msra.mxu1 %v2679_v20  ;;  %v2007_v20 = vrot.slane %v1991_v11, 4 }
 0x194   : > { %1240 = vst [vmem:[#allocation2 + $0xe8] sm:$0x30] %v1227_v27  ;;  %1732 = vrot.lane.b32.xlu1 %v1725_v21, %s4109_s20  ;;  %1670 = vrot.lane.b32.xlu0 %v1652_v22, %s4111_s19  ;;  %v2053_v21 = vld [vmem:[%s3065_s8 + $0x80] sm:$0xc0]  ;;  %s2936_s19 = smov 12  }
 0x195   : > { %v2069_v27 = vrot.slane %v2053_v21, 2 }
 0x196   : > { %v3517_v32 = vpop.permute.xlu1 %1274  ;;  %v3519_v33 = vpop.permute.xlu0 %1272 }
 0x197   : > { %v1288_v34 = vsel %vm1286_vm11, %v3519_v33, %v3517_v32 }
 0x198   : > { %1302 = vst [vmem:[#allocation2 + $0xe8] sm:$0xc0] %v1288_v34  ;;  %1740 = vrot.lane.b32.xlu1 %v1729_v28, %s4109_s20  ;;  %1738 = vrot.lane.b32.xlu0 %v1728_v29, %s4109_s20  ;;  %s2935_s20 = smov 30   ;;  %v2114_v28 = vld [vmem:[%s3065_s8 + $0x78] sm:$0xc0] }
 0x199   : > { %v1927_v29 = vld [vmem:[%s3065_s8 + $0x38] sm:$0xc0] }
 0x19a   : > { %v3528_v39 = vpop.permute.xlu1 %1336  ;;  %v3530_v40 = vpop.permute.xlu0 %1334 }
 0x19b   : > { %v1350_v41 = vsel %vm1348_vm12, %v3530_v40, %v3528_v39 }
 0x19c   : > { %1364 = vst [vmem:[#allocation2 + $0x120] sm:$0x3] %v1350_v41  ;;  %1794 = vrot.lane.b32.xlu1 %v1784_v35, %s4107_s25  ;;  %1788 = vrot.lane.b32.xlu0 %v1781_v36, %s4107_s25  ;;  %v1943_v35 = vrot.slane %v1927_v29, 6  ;;  %v2115_v36 = vld [vmem:[%s3065_s8 + $0x80] sm:$0xc0] }
 0x19e   : > { %v3539_v46 = vpop.permute.xlu1 %1395  ;;  %v3541_v47 = vpop.permute.xlu0 %1393 }
 0x19f   : > { %v1407_v49 = vsel %vm4115_vm13, %v3541_v47, %v3539_v46  ;;  %v2196_v16 = vld [vmem:[#allocation2 + $0xe8] sm:$0xff] }
 0x1a0   : > { %1420 = vst [vmem:[#allocation2 + $0x120] sm:$0xc] %v1407_v49  ;;  %1844 = vrot.lane.b32.xlu1 %v1837_v42, %s4105_s26  ;;  %1796 = vrot.lane.b32.xlu0 %v1785_v43, %s4107_s25  ;;  %s2934_s25 = smov 48   ;;  %v1947_v43 = vrot.slane %v1931_v37, 6  ;;  %v1989_v49 = vld [vmem:[%s3065_s8 + $0x70] sm:$0xc0] }
 0x1a2   : > { %v3548_v52 = vpop.permute.xlu1 %1444  ;;  %v3550_v53 = vpop.permute.xlu0 %1442 }
 0x1a3   : > { %v1455_v54 = vsel %vm438_vm8, %v3550_v53, %v3548_v52 }
 0x1a4   : > { %1468 = vst [vmem:[#allocation2 + $0x120] sm:$0x30] %v1455_v54  ;;  %1852 = vrot.lane.b32.xlu1 %v1841_v50, %s4105_s26  ;;  %1850 = vrot.lane.b32.xlu0 %v1840_v51, %s4105_s26  ;;  %s2933_s26 = smov 52  }
 0x1a6   : > { %v3560_v59 = vpop.permute.xlu1 %1502  ;;  %v3562_v60 = vpop.permute.xlu0 %1500 }
 0x1a7   : > { %v1516_v61 = vsel %vm4114_vm14, %v3562_v60, %v3560_v59 }
 0x1a8   : > { %1530 = vst [vmem:[#allocation2 + $0x120] sm:$0xc0] %v1516_v61  ;;  %1899 = vrot.lane.b32.xlu1 %v1882_v55, %s2909_s7  ;;  %1893 = vrot.lane.b32.xlu0 %v1879_v56, %s2909_s7  ;;  %v2008_v55 = vrot.slane %v1992_v45, 4  ;;  %v2005_v56 = vrot.slane %v1989_v49, 4  ;;  %v1993_v61 = vld [vmem:[%s3065_s8 + $0x90] sm:$0xc0] }
 0x1aa   : > { %v1112_v2 = vpop.permute.xlu1 %1111  ;;  %v1106_v5 = vpop.permute.xlu0 %1105 }
 0x1ab   : > { %v1124_v6 = vsel %vm1121_vm6, %v3482_v3, %v1112_v2  ;;  %v1122_v7 = vsel %vm1121_vm6, %v1106_v5, %v3484_v4  ;;  %v2055_v5 = vld [vmem:[%s3065_s8 + $0x90] sm:$0xc0] }
 0x1ac   : > { %1138 = vst [vmem:[#allocation2 + $0xf0] sm:$0x3] %v1124_v6  ;;  %1136 = vst [vmem:[#allocation2 + $0xe0] sm:$0x3] %v1122_v7  ;;  %1953 = vrot.lane.b32.xlu1 %v1944_v62, %s2933_s26  ;;  %1901 = vrot.lane.b32.xlu0 %v1883_v63, %s2909_s7  ;;  %v2054_v6 = vld [vmem:[%s3065_s8 + $0x88] sm:$0xc0] }
 0x1ad   : > { %v2070_v10 = vrot.slane %v2054_v6, 2 }
 0x1ae   : > { %v1160_v14 = vpop.permute.xlu1 %1159  ;;  %v3580_v15 = vpop.permute.xlu0 %1113 }
 0x1af   : > { %v1176_v3 = vsel %vm1175_vm9, %v1160_v14, %v3496_v13  ;;  %v1125_v4 = vsel %vm1121_vm6, %v1112_v2, %v3580_v15  ;;  %v2203_v17 = vld [vmem:[#allocation2 + $0x120] sm:$0xff]  ;;  %v2009_v2 = vrot.slane %v1993_v61, 4 }
 0x1b0   : > { %1190 = vst [vmem:[#allocation2 + $0xe0] sm:$0xc] %v1176_v3  ;;  %1139 = vst [vmem:[#allocation2 + $0xf8] sm:$0x3] %v1125_v4  ;;  %2015 = vrot.lane.b32.xlu1 %v2006_v8, %s2934_s25  ;;  %1955 = vrot.lane.b32.xlu0 %v1945_v9, %s2933_s26  ;;  %v2665_v18 = vpack.c.bf16 %v2203_v17, %v2196_v16  ;;  %v2116_v4 = vld [vmem:[%s3065_s8 + $0x88] sm:$0xc0] }
 0x1b1   : > { %v2113_v16 = vld [vmem:[%s3065_s8 + $0x70] sm:$0xc0]  ;;  %v968_v17 = vld [vmem:[%s3065_s8 + $0x60] sm:$0xc] }
 0x1b2   : > { %v3589_v22 = vpop.permute.xlu1 %1167  ;;  %2666 = vmatprep.subr.bf16.mxu0 %v2665_v18  ;;  %v1166_v13 = vpop.permute.xlu0 %1165  ;;  %v2937_v18 = vmov 0.0  }
 0x1b3   : > { %v1178_v23 = vsel %vm1175_vm9, %v3494_v12, %v1166_v13  ;;  %v1179_v24 = vsel %vm1175_vm9, %v1166_v13, %v3589_v22  ;;  %2303 = vmatprep.mubr.f32.mxu0 %v2937_v18  ;;  %2374 = vmatprep.mubr.f32.mxu1 %v2937_v18  ;;  %v982_v13 = vrot.slane %v968_v17, 6 }
 0x1b4   : > { %1192 = vst [vmem:[#allocation2 + $0xf0] sm:$0xc] %v1178_v23  ;;  %1193 = vst [vmem:[#allocation2 + $0xf8] sm:$0xc] %v1179_v24  ;;  %2077 = vrot.lane.b32.xlu1 %v2068_v19, %s2935_s20  ;;  %2017 = vrot.lane.b32.xlu0 %v2007_v20, %s2934_s25  ;;  %v2117_v23 = vld [vmem:[%s3065_s8 + $0x90] sm:$0xc0] }
 0x1b5   : > { %v1024_v24 = vld [vmem:[%s3065_s8 + $0x70] sm:$0xc] }
 0x1b6   : > { %v1218_v30 = vpop.permute.xlu1 %1217  ;;  %v1212_v31 = vpop.permute.xlu0 %1211 }
 0x1b7   : > { %v1228_v12 = vsel %vm1225_vm10, %v3506_v25, %v1218_v30  ;;  %v1226_v34 = vsel %vm1225_vm10, %v1212_v31, %v3508_v26 }
 0x1b8   : > { %1241 = vst [vmem:[#allocation2 + $0xf0] sm:$0x30] %v1228_v12  ;;  %1239 = vst [vmem:[#allocation2 + $0xe0] sm:$0x30] %v1226_v34  ;;  %2131 = vrot.lane.b32.xlu1 %v2114_v28, %s2936_s19  ;;  %2079 = vrot.lane.b32.xlu0 %v2069_v27, %s2935_s20  ;;  %v969_v27 = vld [vmem:[%s3065_s8 + $0x68] sm:$0xc] }
 0x1b9   : > { %v983_v31 = vrot.slane %v969_v27, 6  ;;  %v1026_v12 = vld [vmem:[%s3065_s8 + $0x80] sm:$0xc]  ;;  %v1025_v34 = vld [vmem:[%s3065_s8 + $0x78] sm:$0xc] }
 0x1ba   : > { %v1271_v41 = vpop.permute.xlu1 %1270  ;;  %v3608_v42 = vpop.permute.xlu0 %1219  ;;  %v1042_v38 = vrot.slane %v1026_v12, 4  ;;  %v1376_v27 = vld [vmem:[%s3065_s8 + $0x68] sm:$0x30] }
 0x1bb   : > { %v1287_v25 = vsel %vm1286_vm11, %v1271_v41, %v3519_v33  ;;  %v1229_v26 = vsel %vm1225_vm10, %v1218_v30, %v3608_v42  ;;  %v1040_v30 = vrot.slane %v1024_v24, 4  ;;  %v1041_v41 = vrot.slane %v1025_v34, 4 }
 0x1bc   : > { %1301 = vst [vmem:[#allocation2 + $0xe0] sm:$0xc0] %v1287_v25  ;;  %1242 = vst [vmem:[#allocation2 + $0xf8] sm:$0x30] %v1229_v26  ;;  %1951 = vrot.lane.b32.xlu1 %v1943_v35, %s2933_s26  ;;  %2133 = vrot.lane.b32.xlu0 %v2115_v36, %s2936_s19  ;;  %v1087_v25 = vld [vmem:[%s3065_s8 + $0x78] sm:$0xc] }
 0x1bd   : > { %v1086_v26 = vld [vmem:[%s3065_s8 + $0x70] sm:$0xc] }
 0x1be   : > { %v3618_v50 = vpop.permute.xlu1 %1278  ;;  %v1277_v51 = vpop.permute.xlu0 %1276 }
 0x1bf   : > { %v1289_v33 = vsel %vm1286_vm11, %v3517_v32, %v1277_v51  ;;  %v1290_v54 = vsel %vm1286_vm11, %v1277_v51, %v3618_v50 }
 0x1c0   : > { %1303 = vst [vmem:[#allocation2 + $0xf0] sm:$0xc0] %v1289_v33  ;;  %1304 = vst [vmem:[#allocation2 + $0xf8] sm:$0xc0] %v1290_v54  ;;  %1959 = vrot.lane.b32.xlu1 %v1947_v43, %s2933_s26  ;;  %1957 = vrot.lane.b32.xlu0 %v1946_v44, %s2933_s26  ;;  %v1103_v33 = vrot.slane %v1087_v25, 2  ;;  %v1102_v54 = vrot.slane %v1086_v26, 2 }
 0x1c1   : > { %v1479_v25 = vld [vmem:[%s3065_s8 + $0x60] sm:$0x30] }
 0x1c2   : > { %v1339_v62 = vpop.permute.xlu1 %1338  ;;  %v1333_v63 = vpop.permute.xlu0 %1332 }
 0x1c3   : > { %v1351_v32 = vsel %vm1348_vm12, %v3528_v39, %v1339_v62  ;;  %v1349_v0 = vsel %vm1348_vm12, %v1333_v63, %v3530_v40  ;;  %v2071_v40 = vrot.slane %v2055_v5, 2  ;;  %v2195_v45 = vld [vmem:[#allocation2 + $0xe0] sm:$0xff]  ;;  %v1148_v5 = vld [vmem:[%s3065_s8 + $0x70] sm:$0xc] }
 0x1c4   : > { %1365 = vst [vmem:[#allocation2 + $0x128] sm:$0x3] %v1351_v32  ;;  %1363 = vst [vmem:[#allocation2 + $0x118] sm:$0x3] %v1349_v0  ;;  %2019 = vrot.lane.b32.xlu1 %v2008_v55, %s2934_s25  ;;  %2013 = vrot.lane.b32.xlu0 %v2005_v56, %s2934_s25 }
 0x1c6   : > { %v1392_v7 = vpop.permute.xlu1 %1391  ;;  %v3636_v8 = vpop.permute.xlu0 %1340 }
 0x1c7   : > { %v1406_v9 = vsel %vm4115_vm13, %v1392_v7, %v3541_v47  ;;  %v1352_v39 = vsel %vm1348_vm12, %v1339_v62, %v3636_v8  ;;  %v2198_v58 = vld [vmem:[#allocation2 + $0xf8] sm:$0xff]  ;;  %v2197_v63 = vld [vmem:[#allocation2 + $0xf0] sm:$0xff] }
 0x1c8   : > { %1419 = vst [vmem:[#allocation2 + $0x118] sm:$0xc] %v1406_v9  ;;  %1366 = vst [vmem:[#allocation2 + $0x130] sm:$0x3] %v1352_v39  ;;  %2075 = vrot.lane.b32.xlu1 %v2067_v1, %s2935_s20  ;;  %2021 = vrot.lane.b32.xlu0 %v2009_v2, %s2934_s25  ;;  %v1149_v2 = vld [vmem:[%s3065_s8 + $0x78] sm:$0xc] }
 0x1c9   : > { %v1203_v39 = vld [vmem:[%s3065_s8 + $0x40] sm:$0x30] }
 0x1ca   : > { %v3644_v11 = vpop.permute.xlu1 %1399  ;;  %v1398_v14 = vpop.permute.xlu0 %1397 }
 0x1cb   : > { %v1408_v47 = vsel %vm4115_vm13, %v3539_v46, %v1398_v14  ;;  %v1409_v3 = vsel %vm4115_vm13, %v1398_v14, %v3644_v11  ;;  %v1251_v14 = vld [vmem:[%s3065_s8 + $0x38] sm:$0x30]  ;;  %vm4118_vm13 = vcmask 752640  }
 0x1cc   : > { %1421 = vst [vmem:[#allocation2 + $0x128] sm:$0xc] %v1408_v47  ;;  %1422 = vst [vmem:[#allocation2 + $0x130] sm:$0xc] %v1409_v3  ;;  %2083 = vrot.lane.b32.xlu1 %v2071_v40, %s2935_s20  ;;  %2081 = vrot.lane.b32.xlu0 %v2070_v10, %s2935_s20  ;;  %v1202_v40 = vld [vmem:[%s3065_s8 + $0x38] sm:$0x30] }
 0x1cd   : > { %v1252_v10 = vld [vmem:[%s3065_s8 + $0x40] sm:$0x30]  ;;  %v1267_v17 = vrot.slane %v1251_v14, 6 }
 0x1ce   : > { %v1447_v46 = vpop.permute.xlu1 %1446  ;;  %v1441_v19 = vpop.permute.xlu0 %1440 }
 0x1cf   : > { %v1456_v20 = vsel %vm438_vm8, %v3548_v52, %v1447_v46  ;;  %v1454_v21 = vsel %vm438_vm8, %v1441_v19, %v3550_v53  ;;  %v1313_v19 = vld [vmem:[%s3065_s8 + $0x38] sm:$0x30] }
 0x1d0   : > { %1469 = vst [vmem:[#allocation2 + $0x128] sm:$0x30] %v1456_v20  ;;  %1467 = vst [vmem:[#allocation2 + $0x118] sm:$0x30] %v1454_v21  ;;  %2135 = vrot.lane.b32.xlu1 %v2116_v4, %s2936_s19  ;;  %2129 = vrot.lane.b32.xlu0 %v2113_v16, %s2936_s19  ;;  %v1268_v16 = vrot.slane %v1252_v10, 6  ;;  %v1329_v24 = vrot.slane %v1313_v19, 4 }
 0x1d2   : > { %v1499_v28 = vpop.permute.xlu1 %1498  ;;  %v3666_v29 = vpop.permute.xlu0 %1448 }
 0x1d3   : > { %v1515_v52 = vsel %vm4114_vm14, %v1499_v28, %v3562_v60  ;;  %v1457_v53 = vsel %vm438_vm8, %v1447_v46, %v3666_v29  ;;  %v1314_v46 = vld [vmem:[%s3065_s8 + $0x40] sm:$0x30] }
 0x1d4   : > { %1529 = vst [vmem:[#allocation2 + $0x118] sm:$0xc0] %v1515_v52  ;;  %1470 = vst [vmem:[#allocation2 + $0x130] sm:$0x30] %v1457_v53  ;;  %994 = vrot.lane.b32.xlu1 %v982_v13, %s2918_s27  ;;  %2137 = vrot.lane.b32.xlu0 %v2117_v23, %s2936_s19  ;;  %v1330_v23 = vrot.slane %v1314_v46, 4 }
 0x1d5   : > { %v1375_v28 = vld [vmem:[%s3065_s8 + $0x60] sm:$0x30] }
 0x1d6   : > { %v3676_v35 = vpop.permute.xlu1 %1506  ;;  %v1505_v36 = vpop.permute.xlu0 %1504  ;;  %v1389_v12 = vrot.slane %v1375_v28, 2  ;;  %v1542_v28 = vld [vmem:[%s3065_s8 + $0x90] sm:$0x30] }
 0x1d7   : > { %v1517_v60 = vsel %vm4114_vm14, %v3560_v59, %v1505_v36  ;;  %v1518_v37 = vsel %vm4114_vm14, %v1505_v36, %v3676_v35  ;;  %vm4119_vm14 = vcmask 900096  }
 0x1d8   : > { %1531 = vst [vmem:[#allocation2 + $0x128] sm:$0xc0] %v1517_v60  ;;  %1532 = vst [vmem:[#allocation2 + $0x130] sm:$0xc0] %v1518_v37  ;;  %1053 = vrot.lane.b32.xlu1 %v1040_v30, %s2919_s29  ;;  %996 = vrot.lane.b32.xlu0 %v983_v31, %s2918_s27  ;;  %v1390_v31 = vrot.slane %v1376_v27, 2  ;;  %s4130_s27 = smov 74  }
 0x1d9   : > { %v1432_v37 = vld [vmem:[%s3065_s8 + $0x68] sm:$0x30] }
 0x1da   : > { %v3686_v43 = vpop.permute.xlu1 %1561  ;;  %v3688_v44 = vpop.permute.xlu0 %1559  ;;  %v1597_v27 = vld [vmem:[%s3065_s8 + $0x88] sm:$0x30] }
 0x1db   : > { %v1573_v59 = vsel %vm1571_vm15, %v3688_v44, %v3686_v43  ;;  %v2202_v49 = vld [vmem:[#allocation2 + $0x118] sm:$0xff] }
 0x1dc   : > { %1586 = vst [vmem:[#allocation2 + $0x158] sm:$0x3] %v1573_v59  ;;  %1057 = vrot.lane.b32.xlu1 %v1042_v38, %s2919_s29  ;;  %1055 = vrot.lane.b32.xlu0 %v1041_v41, %s2919_s29  ;;  %v2667_v51 = vpack.c.bf16 %v2202_v49, %v2195_v45  ;;  %v1431_v38 = vld [vmem:[%s3065_s8 + $0x60] sm:$0x30]  ;;  %v1480_v41 = vld [vmem:[%s3065_s8 + $0x68] sm:$0x30] }
 0x1dd   : > { %s4131_s29 = smov 110  }
 0x1de   : > { %v3695_v55 = vpop.permute.xlu1 %1617  ;;  %2668 = vmatpush1.bf16.msra.mxu0 %v2667_v51  ;;  %v3697_v56 = vpop.permute.xlu0 %1615  ;;  %v1496_v51 = vrot.slane %v1480_v41, 6  ;;  %v1598_v41 = vld [vmem:[%s3065_s8 + $0x90] sm:$0x30] }
 0x1df   : > { %v1629_v61 = vsel %vm1627_vm0, %v3697_v56, %v3695_v55  ;;  %v2205_v62 = vld [vmem:[#allocation2 + $0x130] sm:$0xff]  ;;  %v2204_v32 = vld [vmem:[#allocation2 + $0x128] sm:$0xff] }
 0x1e0   : > { %1642 = vst [vmem:[#allocation2 + $0x158] sm:$0xc] %v1629_v61  ;;  %1117 = vrot.lane.b32.xlu1 %v1103_v33, %s2920_s5  ;;  %1115 = vrot.lane.b32.xlu0 %v1102_v54, %s2920_s5  ;;  %v2681_v0 = vpack.c.bf16 %v2205_v62, %v2198_v58  ;;  %v2683_v1 = vpack.c.bf16 %v2204_v32, %v2197_v63  ;;  %v1495_v33 = vrot.slane %v1479_v25, 6  ;;  %v1088_v54 = vld [vmem:[%s3065_s8 + $0x80] sm:$0xc] }
 0x1e2   : > { %v3706_v6 = vpop.permute.xlu1 %1666  ;;  %2682 = vmatprep.subr.bf16.mxu1 %v2681_v0  ;;  %v3708_v7 = vpop.permute.xlu0 %1664  ;;  %v1104_v0 = vrot.slane %v1088_v54, 2 }
 0x1e3   : > { %v1678_v9 = vsel %vm4120_vm1, %v3708_v7, %v3706_v6  ;;  %2684 = vmatpush1.bf16.msra.mxu1 %v2683_v1  ;;  %v1150_v1 = vld [vmem:[%s3065_s8 + $0x80] sm:$0xc] }
 0x1e4   : > { %1691 = vst [vmem:[#allocation2 + $0x158] sm:$0x30] %v1678_v9  ;;  %1171 = vrot.lane.b32.xlu1 %v1149_v2, %s2921_s30  ;;  %1169 = vrot.lane.b32.xlu0 %v1148_v5, %s2921_s30  ;;  %v1315_v2 = vld [vmem:[%s3065_s8 + $0x48] sm:$0x30] }
 0x1e5   : > { %v1253_v5 = vld [vmem:[%s3065_s8 + $0x48] sm:$0x30]  ;;  %v1331_v10 = vrot.slane %v1315_v2, 4 }
 0x1e6   : > { %v3719_v47 = vpop.permute.xlu1 %1736  ;;  %v3721_v3 = vpop.permute.xlu0 %1734  ;;  %v1269_v14 = vrot.slane %v1253_v5, 6  ;;  %v1828_v5 = vld [vmem:[%s3065_s8 + $0x60] sm:$0xc0] }
 0x1e7   : > { %v1748_v4 = vsel %vm4119_vm14, %v3721_v3, %v3719_v47 }
 0x1e8   : > { %1761 = vst [vmem:[#allocation2 + $0x190] sm:$0x3] %v1748_v4  ;;  %1223 = vrot.lane.b32.xlu1 %v1203_v39, %s2922_s22  ;;  %1221 = vrot.lane.b32.xlu0 %v1202_v40, %s2922_s22  ;;  %v1541_v4 = vld [vmem:[%s3065_s8 + $0x88] sm:$0x30] }
 0x1ea   : > { %v3730_v20 = vpop.permute.xlu1 %1792  ;;  %v3732_v21 = vpop.permute.xlu0 %1790 }
 0x1eb   : > { %v1804_v13 = vsel %vm4118_vm13, %v3732_v21, %v3730_v20  ;;  %v2210_v62 = vld [vmem:[#allocation2 + $0x158] sm:$0xff] }
 0x1ec   : > { %1817 = vst [vmem:[#allocation2 + $0x190] sm:$0xc] %v1804_v13  ;;  %1282 = vrot.lane.b32.xlu1 %v1268_v16, %s2923_s4  ;;  %1280 = vrot.lane.b32.xlu0 %v1267_v17, %s2923_s4  ;;  %v1481_v16 = vld [vmem:[%s3065_s8 + $0x70] sm:$0x30]  ;;  %v1555_v13 = vrot.slane %v1541_v4, 4 }
 0x1ee   : > { %v3741_v52 = vpop.permute.xlu1 %1848  ;;  %v3743_v53 = vpop.permute.xlu0 %1846 }
 0x1ef   : > { %v1860_v30 = vsel %vm4117_vm3, %v3743_v53, %v3741_v52 }
 0x1f0   : > { %1873 = vst [vmem:[#allocation2 + $0x190] sm:$0x30] %v1860_v30  ;;  %1344 = vrot.lane.b32.xlu1 %v1330_v23, %s2924_s6  ;;  %1342 = vrot.lane.b32.xlu0 %v1329_v24, %s2924_s6  ;;  %v1497_v23 = vrot.slane %v1481_v16, 6  ;;  %v1701_v24 = vld [vmem:[%s3065_s8 + $0x20] sm:$0xc0] }
 0x1f1   : > { %1708 = vst [vmem:[#allocation2 + $0x170] sm:$0xc0] %v1701_v24  ;;  %v1829_v16 = vld [vmem:[%s3065_s8 + $0x68] sm:$0xc0] }
 0x1f2   : > { %v3750_v34 = vpop.permute.xlu1 %1897  ;;  %v3752_v36 = vpop.permute.xlu0 %1895 }
 0x1f3   : > { %v1908_v60 = vsel %vm438_vm8, %v3752_v36, %v3750_v34 }
 0x1f4   : > { %1921 = vst [vmem:[#allocation2 + $0x190] sm:$0xc0] %v1908_v60  ;;  %1403 = vrot.lane.b32.xlu1 %v1390_v31, %s2925_s9  ;;  %1401 = vrot.lane.b32.xlu0 %v1389_v12, %s2925_s9  ;;  %v1703_v12 = vld [vmem:[%s3065_s8 + $0x30] sm:$0xc0]  ;;  %v1611_v60 = vrot.slane %v1597_v27, 2 }
 0x1f5   : > { %1710 = vst.msk [vmem:[#allocation2 + $0x180] sm:$0xc0] %vm408_vm7, %v1703_v12 }
 0x1f6   : > { %v1564_v26 = vpop.permute.xlu1 %1563  ;;  %v1558_v59 = vpop.permute.xlu0 %1557 }
 0x1f7   : > { %v1574_v45 = vsel %vm1571_vm15, %v3686_v43, %v1564_v26  ;;  %v1572_v49 = vsel %vm1571_vm15, %v1558_v59, %v3688_v44 }
 0x1f8   : > { %1587 = vst [vmem:[#allocation2 + $0x160] sm:$0x3] %v1574_v45  ;;  %1585 = vst [vmem:[#allocation2 + $0x150] sm:$0x3] %v1572_v49  ;;  %1452 = vrot.lane.b32.xlu1 %v1432_v37, %s2909_s7  ;;  %1450 = vrot.lane.b32.xlu0 %v1431_v38, %s2909_s7  ;;  %v1556_v37 = vrot.slane %v1542_v28, 4  ;;  %v1612_v45 = vrot.slane %v1598_v41, 2 }
 0x1f9   : > { %v1702_v38 = vld [vmem:[%s3065_s8 + $0x28] sm:$0xc0]  ;;  %v1653_v49 = vld [vmem:[%s3065_s8 + $0x88] sm:$0x30] }
 0x1fa   : > { %v1614_v58 = vpop.permute.xlu1 %1613  ;;  %v3770_v61 = vpop.permute.xlu0 %1565  ;;  %1709 = vst [vmem:[#allocation2 + $0x178] sm:$0xc0] %v1702_v38  ;;  %v1885_v28 = vld [vmem:[%s3065_s8 + $0x68] sm:$0xc0] }
 0x1fb   : > { %v1628_v43 = vsel %vm1627_vm0, %v1614_v58, %v3697_v56  ;;  %v1575_v44 = vsel %vm1571_vm15, %v1564_v26, %v3770_v61  ;;  %v2217_v63 = vld [vmem:[#allocation2 + $0x190] sm:$0xff] }
 0x1fc   : > { %1641 = vst [vmem:[#allocation2 + $0x150] sm:$0xc] %v1628_v43  ;;  %1588 = vst [vmem:[#allocation2 + $0x168] sm:$0x3] %v1575_v44  ;;  %1510 = vrot.lane.b32.xlu1 %v1496_v51, %s2926_s10  ;;  %1508 = vrot.lane.b32.xlu0 %v1495_v33, %s2926_s10  ;;  %v2669_v32 = vpack.c.bf16 %v2217_v63, %v2210_v62  ;;  %v1716_v51 = vld [vmem:[%s3065_s8 + $0x28] sm:$0xc0] }
 0x1fd   : > { %v1730_v43 = vrot.slane %v1716_v51, 6  ;;  %v1654_v44 = vld [vmem:[%s3065_s8 + $0x90] sm:$0x30]  ;;  %v1772_v62 = vld [vmem:[%s3065_s8 + $0x28] sm:$0xc0] }
 0x1fe   : > { %v3781_v9 = vpop.permute.xlu1 %1621  ;;  %2670 = vmatprep.subr.bf16.mxu0 %v2669_v32  ;;  %v1620_v56 = vpop.permute.xlu0 %1619  ;;  %v1717_v63 = vld [vmem:[%s3065_s8 + $0x30] sm:$0xc0] }
 0x1ff   : > { %v1630_v39 = vsel %vm1627_vm0, %v3695_v55, %v1620_v56  ;;  %v1631_v40 = vsel %vm1627_vm0, %v1620_v56, %v3781_v9  ;;  %v1731_v2 = vrot.slane %v1717_v63, 6  ;;  %v1773_v56 = vld [vmem:[%s3065_s8 + $0x30] sm:$0xc0] }
 0x200   : > { %1643 = vst [vmem:[#allocation2 + $0x160] sm:$0xc] %v1630_v39  ;;  %1644 = vst [vmem:[#allocation2 + $0x168] sm:$0xc] %v1631_v40  ;;  %1173 = vrot.lane.b32.xlu1 %v1150_v1, %s2921_s30  ;;  %1119 = vrot.lane.b32.xlu0 %v1104_v0, %s2920_s5  ;;  %v1786_v1 = vrot.slane %v1772_v62, 4  ;;  %s4132_s5 = smov 92  }
 0x201   : > { %v1787_v4 = vrot.slane %v1773_v56, 4  ;;  %s4133_s30 = smov 88   ;;  %v2118_v56 = vld [vmem:[%s3065_s8 + $0x98] sm:$0xc0] }
 0x202   : > { %v1669_v17 = vpop.permute.xlu1 %1668  ;;  %v1663_v46 = vpop.permute.xlu0 %1662 }
 0x203   : > { %v1679_v55 = vsel %vm4120_vm1, %v3706_v6, %v1669_v17  ;;  %v1677_v19 = vsel %vm4120_vm1, %v1663_v46, %v3708_v7 }
 0x204   : > { %1692 = vst [vmem:[#allocation2 + $0x160] sm:$0x30] %v1679_v55  ;;  %1690 = vst [vmem:[#allocation2 + $0x150] sm:$0x30] %v1677_v19  ;;  %1346 = vrot.lane.b32.xlu1 %v1331_v10, %s2924_s6  ;;  %1284 = vrot.lane.b32.xlu0 %v1269_v14, %s2923_s4  ;;  %v1842_v14 = vrot.slane %v1828_v5, 2  ;;  %v1843_v19 = vrot.slane %v1829_v16, 2 }
 0x205   : > { %s2720_s6 = smul.u32 56, %s3061_s28 }
 0x206   : > { %v1733_v30 = vpop.permute.xlu1 %1732  ;;  %v3800_v6 = vpop.permute.xlu0 %1670 }
 0x207   : > { %v1747_v7 = vsel %vm4119_vm14, %v1733_v30, %v3721_v3  ;;  %v1680_v31 = vsel %vm4120_vm1, %v1669_v17, %v3800_v6  ;;  %v1994_v30 = vld [vmem:[%s3065_s8 + $0x98] sm:$0xc0]  ;;  %vm2145_vm1 = vcmask 97280   ;;  %s186_s9 = scalar_lea.vmem [#allocation6], %s2720_s6 }
 0x208   : > { %1760 = vst [vmem:[#allocation2 + $0x188] sm:$0x3] %v1747_v7  ;;  %1693 = vst [vmem:[#allocation2 + $0x168] sm:$0x30] %v1680_v31  ;;  %1567 = vrot.lane.b32.xlu1 %v1555_v13, %s2927_s11  ;;  %1512 = vrot.lane.b32.xlu0 %v1497_v23, %s2926_s10  ;;  %v1884_v13 = vld [vmem:[%s3065_s8 + $0x60] sm:$0xc0] }
 0x209   : > { %v1932_v23 = vld [vmem:[%s3065_s8 + $0x60] sm:$0xc0]  ;;  %v1933_v7 = vld [vmem:[%s3065_s8 + $0x68] sm:$0xc0]  ;;  %s2721_s10 = smul.u32 896, %s2983_s16  ;;  %s2941_s16 = smov [#allocation6]  }
 0x20a   : > { %v3812_v3 = vpop.permute.xlu1 %1740  ;;  %v1739_v25 = vpop.permute.xlu0 %1738 }
 0x20b   : > { %v1749_v26 = vsel %vm4119_vm14, %v3719_v47, %v1739_v25  ;;  %v1750_v59 = vsel %vm4119_vm14, %v1739_v25, %v3812_v3  ;;  %v2010_v25 = vrot.slane %v1994_v30, 4  ;;  %vm4121_vm14 = vcmask 244736  }
 0x20c   : > { %1762 = vst [vmem:[#allocation2 + $0x198] sm:$0x3] %v1749_v26  ;;  %1763 = vst [vmem:[#allocation2 + $0x1a0] sm:$0x3] %v1750_v59  ;;  %1623 = vrot.lane.b32.xlu1 %v1611_v60, %s2928_s17  ;;  %1569 = vrot.lane.b32.xlu0 %v1556_v37, %s2927_s11  ;;  %v2209_v37 = vld [vmem:[#allocation2 + $0x150] sm:$0xff]  ;;  %v1949_v26 = vrot.slane %v1933_v7, 6 }
 0x20d   : > { %v2056_v59 = vld [vmem:[%s3065_s8 + $0x98] sm:$0xc0]  ;;  %s2544_s11 = sshll.u32 %s186_s9, 4  ;;  %s4057_s11 = int_to_ptr.vmem [resolvable:$true] %s2544_s11 }
 0x20e   : > { %v1795_v33 = vpop.permute.xlu1 %1794  ;;  %v1789_v54 = vpop.permute.xlu0 %1788  ;;  %v2072_v62 = vrot.slane %v2056_v59, 2 }
 0x20f   : > { %v1805_v47 = vsel %vm4118_vm13, %v3730_v20, %v1795_v33  ;;  %v1803_v58 = vsel %vm4118_vm13, %v1789_v54, %v3732_v21 }
 0x210   : > { %1818 = vst [vmem:[#allocation2 + $0x198] sm:$0xc] %v1805_v47  ;;  %1816 = vst [vmem:[#allocation2 + $0x188] sm:$0xc] %v1803_v58  ;;  %1672 = vrot.lane.b32.xlu1 %v1653_v49, %s4130_s27  ;;  %1625 = vrot.lane.b32.xlu0 %v1612_v45, %s2928_s17  ;;  %v1995_v45 = vld [vmem:[%s3065_s8 + $0xa0] sm:$0xc0] }
 0x211   : > { %v2212_v47 = vld [vmem:[#allocation2 + $0x168] sm:$0xff]  ;;  %v2011_v63 = vrot.slane %v1995_v45, 4 }
 0x212   : > { %v1845_v32 = vpop.permute.xlu1 %1844  ;;  %v3831_v0 = vpop.permute.xlu0 %1796 }
 0x213   : > { %v1859_v20 = vsel %vm4117_vm3, %v1845_v32, %v3743_v53  ;;  %v1806_v21 = vsel %vm4118_vm13, %v1795_v33, %v3831_v0  ;;  %vm2029_vm13 = vcmask 392192  }
 0x214   : > { %1872 = vst [vmem:[#allocation2 + $0x188] sm:$0x30] %v1859_v20  ;;  %1819 = vst [vmem:[#allocation2 + $0x1a0] sm:$0xc] %v1806_v21  ;;  %1742 = vrot.lane.b32.xlu1 %v1730_v43, %s4131_s29  ;;  %1674 = vrot.lane.b32.xlu0 %v1654_v44, %s4130_s27  ;;  %v2211_v44 = vld [vmem:[#allocation2 + $0x160] sm:$0xff]  ;;  %s2840_s27 = sshll.u32 %s2941_s16, 4  ;;  %s2841_s27 = int_to_ptr.vmem [resolvable:$false] %s2840_s27 }
 0x215   : > { %v2057_v20 = vld [vmem:[%s3065_s8 + $0xa0] sm:$0xc0]  ;;  %p2843_p5 = scmp.lt.s32.totalorder %s4057_s11, %s2841_s27 }
 0x216   : > { %v3841_v39 = vpop.permute.xlu1 %1852  ;;  %v1851_v40 = vpop.permute.xlu0 %1850  ;;  %v2073_v5 = vrot.slane %v2057_v20, 2  ;;  %v2178_v20 = vld [vmem:[#allocation2 + $0x58] sm:$0xff] }
 0x217   : > { %v1861_v53 = vsel %vm4117_vm3, %v3741_v52, %v1851_v40  ;;  %v1862_v10 = vsel %vm4117_vm3, %v1851_v40, %v3841_v39  ;;  %vm1967_vm3 = vcmask 424960   ;;  %v1934_v40 = vld [vmem:[%s3065_s8 + $0x70] sm:$0xc0] }
 0x218   : > { %1874 = vst [vmem:[#allocation2 + $0x198] sm:$0x30] %v1861_v53  ;;  %1875 = vst [vmem:[#allocation2 + $0x1a0] sm:$0x30] %v1862_v10  ;;  %1798 = vrot.lane.b32.xlu1 %v1786_v1, %s4132_s5  ;;  %1744 = vrot.lane.b32.xlu0 %v1731_v2, %s4131_s29  ;;  %v1950_v16 = vrot.slane %v1934_v40, 6  ;;  %s2842_s29 = scalar_lea.vmem %s2841_s27, 1792 }
 0x21a   : > { %v1900_v17 = vpop.permute.xlu1 %1899  ;;  %v1894_v46 = vpop.permute.xlu0 %1893 }
 0x21b   : > { %v1909_v55 = vsel %vm438_vm8, %v3750_v34, %v1900_v17  ;;  %v1907_v52 = vsel %vm438_vm8, %v1894_v46, %v3752_v36  ;;  %v1948_v36 = vrot.slane %v1932_v23, 6  ;;  %v2058_v46 = vld [vmem:[%s3065_s8 + $0xa8] sm:$0xc0] }
 0x21c   : > { %1922 = vst [vmem:[#allocation2 + $0x198] sm:$0xc0] %v1909_v55  ;;  %1920 = vst [vmem:[#allocation2 + $0x188] sm:$0xc0] %v1907_v52  ;;  %1854 = vrot.lane.b32.xlu1 %v1842_v14, %s4133_s30  ;;  %1800 = vrot.lane.b32.xlu0 %v1787_v4, %s4132_s5  ;;  %v1996_v55 = vld [vmem:[%s3065_s8 + $0xa8] sm:$0xc0] }
 0x21e   : > { %v1954_v24 = vpop.permute.xlu1 %1953  ;;  %v3858_v27 = vpop.permute.xlu0 %1901 }
 0x21f   : > { %v1910_v34 = vsel %vm438_vm8, %v1900_v17, %v3858_v27  ;;  %v2119_v17 = vld [vmem:[%s3065_s8 + $0xa0] sm:$0xc0] }
 0x220   : > { %1923 = vst [vmem:[#allocation2 + $0x1a0] sm:$0xc0] %v1910_v34  ;;  %1903 = vrot.lane.b32.xlu1 %v1884_v13, %s2909_s7  ;;  %1856 = vrot.lane.b32.xlu0 %v1843_v19, %s4133_s30  ;;  %v2012_v34 = vrot.slane %v1996_v55, 4 }
 0x222   : > { %v3867_v31 = vpop.permute.xlu1 %2015  ;;  %v1956_v12 = vpop.permute.xlu0 %1955 }
 0x223   : > { %v1969_v60 = vsel %vm1967_vm3, %v1954_v24, %v1956_v12  ;;  %v2216_v38 = vld [vmem:[#allocation2 + $0x188] sm:$0xff]  ;;  %v2218_v33 = vld [vmem:[#allocation2 + $0x198] sm:$0xff] }
 0x224   : > { %1983 = vst [vmem:[#allocation2 + $0x1c8] sm:$0x3] %v1969_v60  ;;  %1961 = vrot.lane.b32.xlu1 %v1948_v36, %s2933_s26  ;;  %1905 = vrot.lane.b32.xlu0 %v1885_v28, %s2909_s7  ;;  %v2671_v41 = vpack.c.bf16 %v2216_v38, %v2209_v37  ;;  %v2687_v32 = vpack.c.bf16 %v2218_v33, %v2211_v44  ;;  %v2120_v60 = vld [vmem:[%s3065_s8 + $0xa8] sm:$0xc0] }
 0x225   : > { %v187_v37 = vld [vmem:[%s4102_s2] sm:$0xff] }
 0x226   : > { %v3874_v49 = vpop.permute.xlu1 %2077  ;;  %2672 = vmatpush1.bf16.msra.mxu0 %v2671_v41  ;;  %v2018_v51 = vpop.permute.xlu0 %2017 }
 0x227   : > { %v2031_v54 = vsel %vm2029_vm13, %v3867_v31, %v2018_v51  ;;  %v2219_v58 = vld [vmem:[#allocation2 + $0x1a0] sm:$0xff] }
 0x228   : > { %2045 = vst [vmem:[#allocation2 + $0x1c8] sm:$0xc] %v2031_v54  ;;  %2023 = vrot.lane.b32.xlu1 %v2010_v25, %s2934_s25  ;;  %1963 = vrot.lane.b32.xlu0 %v1949_v26, %s2933_s26  ;;  %v2685_v43 = vpack.c.bf16 %v2219_v58, %v2212_v47  ;;  %v2938_v25 = vmov 0  }
 0x229   : > { %2804 = vset.pattern.permute.xlu1 %v2938_v25  ;;  %2805 = vset.pattern.permute.xlu0 %v2938_v25  ;;  %v2186_v25 = vld [vmem:[#allocation2 + $0x98] sm:$0xff] }
 0x22a   : > { %v3881_v21 = vpop.permute.xlu1 %2131  ;;  %2686 = vmatprep.subr.bf16.mxu1 %v2685_v43  ;;  %v2080_v1 = vpop.permute.xlu0 %2079 }
 0x22b   : > { %v2093_v2 = vsel %vm4121_vm14, %v3874_v49, %v2080_v1  ;;  %2688 = vmatpush1.bf16.msra.mxu1 %v2687_v32  ;;  %v2179_v32 = vld [vmem:[#allocation2 + $0x60] sm:$0xff] }
 0x22c   : > { %2107 = vst [vmem:[#allocation2 + $0x1c8] sm:$0x30] %v2093_v2  ;;  %2085 = vrot.lane.b32.xlu1 %v2072_v62, %s2935_s20  ;;  %2025 = vrot.lane.b32.xlu0 %v2011_v63, %s2934_s25 }
 0x22e   : > { %v1952_v53 = vpop.permute.xlu1 %1951  ;;  %v2134_v10 = vpop.permute.xlu0 %2133 }
 0x22f   : > { %v1968_v14 = vsel %vm1967_vm3, %v1952_v53, %v1954_v24  ;;  %v2147_v4 = vsel %vm2145_vm1, %v3881_v21, %v2134_v10  ;;  %v2074_v24 = vrot.slane %v2058_v46, 2 }
 0x230   : > { %1982 = vst [vmem:[#allocation2 + $0x1c0] sm:$0x3] %v1968_v14  ;;  %2161 = vst [vmem:[#allocation2 + $0x1c8] sm:$0xc0] %v2147_v4  ;;  %2139 = vrot.lane.b32.xlu1 %v2118_v56, %s2936_s19  ;;  %2087 = vrot.lane.b32.xlu0 %v2073_v5, %s2935_s20  ;;  %v2172_v5 = vld [vmem:[#allocation2 + $0x28] sm:$0xff] }
 0x231   : > { %v2689_v53 = vpack.c.bf16 %v2179_v32, %v2172_v5 }
 0x232   : > { %v3897_v52 = vpop.permute.xlu1 %1959  ;;  %v1958_v19 = vpop.permute.xlu0 %1957 }
 0x233   : > { %v1970_v13 = vsel %vm1967_vm3, %v1956_v12, %v1958_v19  ;;  %v1971_v23 = vsel %vm1967_vm3, %v1958_v19, %v3897_v52 }
 0x234   : > { %1984 = vst [vmem:[#allocation2 + $0x1d0] sm:$0x3] %v1970_v13  ;;  %1985 = vst [vmem:[#allocation2 + $0x1d8] sm:$0x3] %v1971_v23  ;;  %1965 = vrot.lane.b32.xlu1 %v1950_v16, %s2933_s26  ;;  %2141 = vrot.lane.b32.xlu0 %v2119_v17, %s2936_s19  ;;  %v2180_v17 = vld [vmem:[#allocation2 + $0x68] sm:$0xff]  ;;  %v2173_v13 = vld [vmem:[#allocation2 + $0x30] sm:$0xff] }
 0x235   : > { %v2706_v23 = vpack.c.bf16 %v2180_v17, %v2173_v13  ;;  %s2836_s26 = scalar_lea.vmem %s4057_s11, 896 }
 0x236   : > { %v2020_v36 = vpop.permute.xlu1 %2019  ;;  %v2014_v28 = vpop.permute.xlu0 %2013  ;;  %p2837_p6 = scmp.ne.s32.totalorder %s4057_s11, %s2836_s26  ;;  %p2844_p10 = scmp.lt.s32.totalorder %s2842_s29, %s2836_s26 }
 0x237   : > { %v2032_v30 = vsel %vm2029_vm13, %v2018_v51, %v2020_v36  ;;  %v2030_v7 = vsel %vm2029_vm13, %v2014_v28, %v3867_v31  ;;  %v2224_v12 = vld [vmem:[#allocation2 + $0x1c8] sm:$0xff] }
 0x238   : > { %2046 = vst [vmem:[#allocation2 + $0x1d0] sm:$0xc] %v2032_v30  ;;  %2044 = vst [vmem:[#allocation2 + $0x1c0] sm:$0xc] %v2030_v7  ;;  %2089 = vrot.lane.b32.xlu1 %v2074_v24, %s2935_s20  ;;  %2027 = vrot.lane.b32.xlu0 %v2012_v34, %s2934_s25  ;;  %v2939_v34 = vmov 0.0|0.0   ;;  %s4055_s20 = scalar_lea.hbm %s4103_s3, %s2721_s10  ;;  %s2530_s25 = scalar_lea.sflag [#allocation5], %s3061_s28 }
 0x239   : > { %2255 = vmatprep.subr.mxu0 %v2224_v12  ;;  %p2838_p12 = pnand %p2837_p6, %p4163_p11  ;;  %p2845_p2 = por %p2844_p10, %p2843_p5 }
 0x23a   : > { %v2076_v38 = vpop.permute.xlu1 %2075  ;;  %v3913_v41 = vpop.permute.xlu0 %2021 }
 0x23b   : > { %v2092_v31 = vsel %vm4121_vm14, %v2076_v38, %v3874_v49  ;;  %v2033_v26 = vsel %vm2029_vm13, %v2020_v36, %v3913_v41  ;;  %p2839_p13 = pneg %p2838_p12 }
 0x23c   : > { %2106 = vst [vmem:[#allocation2 + $0x1c0] sm:$0x30] %v2092_v31  ;;  %2047 = vst [vmem:[#allocation2 + $0x1d8] sm:$0xc] %v2033_v26  ;;  %2143 = vrot.lane.b32.xlu0 %v2120_v60, %s2936_s19  ;;  %2232 = vperm.xlu1 %2804, %v187_v37   ;;  %v2187_v60 = vld [vmem:[#allocation2 + $0xa0] sm:$0xff] }
 0x23d   : > { %p2846_p4 = pnand %p2845_p2, %p2839_p13 }
 0x23e   : > { %v3920_v59 = vpop.permute.xlu1 %2083  ;;  %v2082_v45 = vpop.permute.xlu0 %2081 }
 0x23f   : > { %v2094_v51 = vsel %vm4121_vm14, %v2080_v1, %v2082_v45  ;;  %v2095_v33 = vsel %vm4121_vm14, %v2082_v45, %v3920_v59  ;;  %vm4123_vm14 = vcmask 588800  }
 0x240   : > { %2108 = vst [vmem:[#allocation2 + $0x1d0] sm:$0x30] %v2094_v51  ;;  %2109 = vst [vmem:[#allocation2 + $0x1d8] sm:$0x30] %v2095_v33  ;;  %v2185_v33 = vld [vmem:[#allocation2 + $0x90] sm:$0xff] }
 0x242   : > { %v2136_v54 = vpop.permute.xlu1 %2135  ;;  %v2130_v49 = vpop.permute.xlu0 %2129 }
 0x243   : > { %v2148_v47 = vsel %vm2145_vm1, %v2134_v10, %v2136_v54  ;;  %v2146_v58 = vsel %vm2145_vm1, %v2130_v49, %v3881_v21  ;;  %v3937_v21 = vld [vmem:[%s4101_s1] sm:$0xff] }
 0x244   : > { %2162 = vst [vmem:[#allocation2 + $0x1d0] sm:$0xc0] %v2148_v47  ;;  %2160 = vst [vmem:[#allocation2 + $0x1c0] sm:$0xc0] %v2146_v58  ;;  %v2171_v10 = vld [vmem:[#allocation2 + $0x20] sm:$0xff] }
 0x245   : > { %v2691_v14 = vpack.c.bf16 %v2178_v20, %v2171_v10 }
 0x246   : > { %v995_v43 = vpop.permute.xlu1 %994  ;;  %v3928_v44 = vpop.permute.xlu0 %2137 }
 0x247   : > { %v1003_v62 = vsel %vm4122_vm2, %v3463_v48, %v995_v43  ;;  %v2149_v63 = vsel %vm2145_vm1, %v2136_v54, %v3928_v44 }
 0x248   : > { %1016 = vst [vmem:[#allocation2 + $0xc8] sm:$0x30] %v1003_v62  ;;  %2163 = vst [vmem:[#allocation2 + $0x1d8] sm:$0xc0] %v2149_v63 }
 0x24a   : > { %v1054_v1 = vpop.permute.xlu1 %1053  ;;  %v997_v2 = vpop.permute.xlu0 %996 }
 0x24b   : > { %v1064_v56 = vsel %vm1059_vm4, %v3474_v57, %v1054_v1  ;;  %v1004_v48 = vsel %vm4122_vm2, %v995_v43, %v997_v2  ;;  %1018 = vst.msk [vmem:[#allocation2 + $0xd8] sm:$0x30] %vm351_vm5, %v997_v2  ;;  %v2223_v40 = vld [vmem:[#allocation2 + $0x1c0] sm:$0xff]  ;;  %v2225_v19 = vld [vmem:[#allocation2 + $0x1d0] sm:$0xff] }
 0x24c   : > { %1078 = vst [vmem:[#allocation2 + $0xc8] sm:$0xc0] %v1064_v56  ;;  %1017 = vst [vmem:[#allocation2 + $0xd0] sm:$0x30] %v1004_v48  ;;  %2256 = vmatpush1.msra.mxu0 %v2223_v40 }
 0x24d   : > { %2690 = vmatprep.subr.bf16.mxu0 %v2689_v53  ;;  %2619 = vmatmul.mubr.msk.f32.vlgmr.msra.gmra.mrb[0].mxu0 %vm4123_vm14, %v3937_v21 }
 0x24e   : > { %v1058_v4 = vpop.permute.xlu1 %1057  ;;  %v1056_v16 = vpop.permute.xlu0 %1055  ;;  %2692 = vmatpush1.bf16.msra.mxu0 %v2691_v14  ;;  %2445 = vmatprep.mubr.f32.mxu0 %v2937_v18 }
 0x24f   : > { %v1065_v57 = vsel %vm1059_vm4, %v1054_v1, %v1056_v16  ;;  %v1066_v46 = vsel %vm1059_vm4, %v1056_v16, %v1058_v4  ;;  %v2226_v55 = vld [vmem:[#allocation2 + $0x1d8] sm:$0xff]  ;;  %vm2940_vm4 = vmmov 0  }
 0x250   : > { %1079 = vst [vmem:[#allocation2 + $0xd0] sm:$0xc0] %v1065_v57  ;;  %1080 = vst.msk [vmem:[#allocation2 + $0xd8] sm:$0xc0] %vm408_vm7, %v1066_v46  ;;  %2326 = vmatprep.subr.mxu1 %v2226_v55 }
 0x251   : > { %2327 = vmatpush1.msra.mxu1 %v2225_v19 }
 0x252   : > { %v3949_v24 = vpop.permute.xlu1 %1117  ;;  %2705 = vmatprep.subr.bf16.mxu1 %v2939_v34  ;;  %v1116_v36 = vpop.permute.xlu0 %1115  ;;  %2620 = vmatmul.mubr.msk.f32.vlgmr.msra.gmra.mrb[0].mxu1 %vm4123_vm14, %v3937_v21  ;;  %vm4140_vm14 = vcmask 517120  }
 0x253   : > { %v1126_v28 = vsel %vm1121_vm6, %v3580_v15, %v1116_v36  ;;  %v1127_v30 = vsel %vm1121_vm6, %v1116_v36, %v3949_v24  ;;  %2707 = vmatpush3.bf16.msra.mxu1 %v2706_v23  ;;  %2654 = vmatprep.mubr.msk.f32.mxu1 %vm2940_vm4, %v2937_v18  ;;  %v2192_v37 = vld [vmem:[#allocation2 + $0xc8] sm:$0xff]  ;;  %vm4135_vm4 = vcmask 670720  }
 0x254   : > { %1140 = vst [vmem:[#allocation2 + $0x100] sm:$0x3] %v1126_v28  ;;  %1141 = vst [vmem:[#allocation2 + $0x108] sm:$0x3] %v1127_v30  ;;  %2708 = vmatprep.subr.bf16.mxu1 %v2939_v34  ;;  %v2695_v54 = vpack.c.bf16 %v2192_v37, %v2185_v33 }
 0x255   : > { %vm4136_vm2 = vmmov %vm4135_vm4 }
 0x256   : > { %v1172_v7 = vpop.permute.xlu1 %1171  ;;  %v1170_v12 = vpop.permute.xlu0 %1169 }
 0x257   : > { %v1180_v38 = vsel %vm1175_vm9, %v3589_v22, %v1170_v12  ;;  %v1181_v15 = vsel %vm1175_vm9, %v1170_v12, %v1172_v7  ;;  %v2193_v31 = vld [vmem:[#allocation2 + $0xd0] sm:$0xff]  ;;  %v2194_v26 = vld [vmem:[#allocation2 + $0xd8] sm:$0xff] }
 0x258   : > { %1194 = vst [vmem:[#allocation2 + $0x100] sm:$0xc] %v1180_v38  ;;  %1195 = vst [vmem:[#allocation2 + $0x108] sm:$0xc] %v1181_v15  ;;  %v2693_v45 = vpack.c.bf16 %v2193_v31, %v2186_v25  ;;  %v2709_v51 = vpack.c.bf16 %v2194_v26, %v2187_v60 }
 0x25a   : > { %v1224_v49 = vpop.permute.xlu1 %1223  ;;  %v1222_v47 = vpop.permute.xlu0 %1221  ;;  %2694 = vmatprep.subr.bf16.mxu0 %v2693_v45  ;;  %2710 = vmatpush3.bf16.msra.mxu1 %v2709_v51 }
 0x25b   : > { %1245 = vst.msk [vmem:[#allocation2 + $0x110] sm:$0x30] %vm351_vm5, %v1224_v49  ;;  %v1230_v22 = vsel %vm1225_vm10, %v3608_v42, %v1222_v47  ;;  %v1231_v58 = vsel %vm1225_vm10, %v1222_v47, %v1224_v49  ;;  %2696 = vmatpush1.bf16.msra.mxu0 %v2695_v54  ;;  %2711 = vmatprep.subr.bf16.mxu1 %v2939_v34  ;;  %vm4134_vm10 = vcmask 519170  }
 0x25c   : > { %1243 = vst [vmem:[#allocation2 + $0x100] sm:$0x30] %v1230_v22  ;;  %1244 = vst [vmem:[#allocation2 + $0x108] sm:$0x30] %v1231_v58 }
 0x25e   : > { %v1283_v43 = vpop.permute.xlu1 %1282  ;;  %v1281_v62 = vpop.permute.xlu0 %1280 }
 0x25f   : > { %v1291_v63 = vsel %vm1286_vm11, %v3618_v50, %v1281_v62  ;;  %v1292_v32 = vsel %vm1286_vm11, %v1281_v62, %v1283_v43 }
 0x260   : > { %1305 = vst [vmem:[#allocation2 + $0x100] sm:$0xc0] %v1291_v63  ;;  %1306 = vst [vmem:[#allocation2 + $0x108] sm:$0xc0] %v1292_v32 }
 0x262   : > { %v1345_v20 = vpop.permute.xlu1 %1344  ;;  %v1343_v1 = vpop.permute.xlu0 %1342 }
 0x263   : > { %v1353_v42 = vsel %vm1348_vm12, %v3636_v8, %v1343_v1  ;;  %v1354_v2 = vsel %vm1348_vm12, %v1343_v1, %v1345_v20 }
 0x264   : > { %1367 = vst [vmem:[#allocation2 + $0x138] sm:$0x3] %v1353_v42  ;;  %1368 = vst [vmem:[#allocation2 + $0x140] sm:$0x3] %v1354_v2 }
 0x266   : > { %v1404_v5 = vpop.permute.xlu1 %1403  ;;  %v1402_v56 = vpop.permute.xlu0 %1401 }
 0x267   : > { %1425 = vst.msk [vmem:[#allocation2 + $0x148] sm:$0xc] %vm4134_vm10, %v1404_v5  ;;  %v1410_v50 = vsel %vm4135_vm4, %v3644_v11, %v1402_v56  ;;  %v1411_v48 = vsel %vm4136_vm2, %v1402_v56, %v1404_v5  ;;  %vm4137_vm10 = vcmask 474112   ;;  %vm4139_vm2 = vcmask 519170   ;;  %v2200_v13 = vld [vmem:[#allocation2 + $0x108] sm:$0xff]  ;;  %v2199_v28 = vld [vmem:[#allocation2 + $0x100] sm:$0xff] }
 0x268   : > { %1423 = vst [vmem:[#allocation2 + $0x138] sm:$0xc] %v1410_v50  ;;  %1424 = vst [vmem:[#allocation2 + $0x140] sm:$0xc] %v1411_v48 }
 0x269   : > { %vm4138_vm4 = vmmov %vm4137_vm10 }
 0x26a   : > { %v1453_v40 = vpop.permute.xlu1 %1452  ;;  %v1451_v53 = vpop.permute.xlu0 %1450 }
 0x26b   : > { %1473 = vst.msk [vmem:[#allocation2 + $0x148] sm:$0x30] %vm351_vm5, %v1453_v40  ;;  %v1458_v8 = vsel %vm438_vm8, %v3666_v29, %v1451_v53  ;;  %v1459_v10 = vsel %vm438_vm8, %v1451_v53, %v1453_v40 }
 0x26c   : > { %1471 = vst [vmem:[#allocation2 + $0x138] sm:$0x30] %v1458_v8  ;;  %1472 = vst [vmem:[#allocation2 + $0x140] sm:$0x30] %v1459_v10 }
 0x26e   : > { %v1511_v14 = vpop.permute.xlu1 %1510  ;;  %v1509_v4 = vpop.permute.xlu0 %1508 }
 0x26f   : > { %v1519_v11 = vsel %vm4137_vm10, %v3676_v35, %v1509_v4  ;;  %v1520_v16 = vsel %vm4138_vm4, %v1509_v4, %v1511_v14  ;;  %vm4141_vm10 = vmmov %vm4140_vm14 }
 0x270   : > { %1533 = vst [vmem:[#allocation2 + $0x138] sm:$0xc0] %v1519_v11  ;;  %1534 = vst [vmem:[#allocation2 + $0x140] sm:$0xc0] %v1520_v16 }
 0x272   : > { %v1174_v17 = vpop.permute.xlu1 %1173  ;;  %v1120_v57 = vpop.permute.xlu0 %1119 }
 0x273   : > { %v1182_v46 = vsel %vm1175_vm9, %v1172_v7, %v1174_v17  ;;  %v1128_v29 = vsel %vm1121_vm6, %v3949_v24, %v1120_v57  ;;  %vm4142_vm6 = vmmov %vm4138_vm4 }
 0x274   : > { %1196 = vst.msk [vmem:[#allocation2 + $0x110] sm:$0xc] %vm4139_vm2, %v1182_v46  ;;  %vm4143_vm9 = vmmov %vm4141_vm10 }
 0x275   : > { %1142 = vst.msk [vmem:[#allocation2 + $0x110] sm:$0x3] %vm4140_vm14, %v1128_v29  ;;  %vm4146_vm14 = vcmask 900096  }
 0x276   : > { %v1347_v55 = vpop.permute.xlu1 %1346  ;;  %v1285_v19 = vpop.permute.xlu0 %1284  ;;  %vm4149_vm4 = vmmov %vm4146_vm14 }
 0x277   : > { %v1355_v35 = vsel %vm1348_vm12, %v1345_v20, %v1347_v55  ;;  %v1293_v23 = vsel %vm1286_vm11, %v1283_v43, %v1285_v19  ;;  %v2207_v36 = vld [vmem:[#allocation2 + $0x140] sm:$0xff]  ;;  %v2206_v30 = vld [vmem:[#allocation2 + $0x138] sm:$0xff]  ;;  %vm4144_vm11 = vcmask 605184   ;;  %vm4145_vm12 = vmmov %vm4139_vm2 }
 0x278   : > { %1369 = vst.msk [vmem:[#allocation2 + $0x148] sm:$0x3] %vm4141_vm10, %v1355_v35  ;;  %v2697_v7 = vpack.c.bf16 %v2207_v36, %v2200_v13  ;;  %v2699_v24 = vpack.c.bf16 %v2206_v30, %v2199_v28  ;;  %vm4150_vm2 = vmmov %vm4143_vm9  ;;  %vm4151_vm10 = vcmask 719872  }
 0x279   : > { %1307 = vst.msk [vmem:[#allocation2 + $0x110] sm:$0xc0] %vm408_vm7, %v1293_v23 }
 0x27a   : > { %v1568_v12 = vpop.permute.xlu1 %1567  ;;  %v1513_v60 = vpop.permute.xlu0 %1512  ;;  %2698 = vmatprep.subr.bf16.mxu0 %v2697_v7 }
 0x27b   : > { %v1576_v37 = vsel %vm1571_vm15, %v3770_v61, %v1568_v12  ;;  %v1521_v38 = vsel %vm4142_vm6, %v1511_v14, %v1513_v60  ;;  %2700 = vmatpush1.bf16.msra.mxu0 %v2699_v24 }
 0x27c   : > { %1589 = vst [vmem:[#allocation2 + $0x170] sm:$0x3] %v1576_v37  ;;  %1535 = vst.msk [vmem:[#allocation2 + $0x148] sm:$0xc0] %vm408_vm7, %v1521_v38 }
 0x27e   : > { %v1624_v15 = vpop.permute.xlu1 %1623  ;;  %v1570_v25 = vpop.permute.xlu0 %1569 }
 0x27f   : > { %v1632_v31 = vsel %vm1627_vm0, %v3781_v9, %v1624_v15  ;;  %v1577_v26 = vsel %vm1571_vm15, %v1568_v12, %v1570_v25  ;;  %1591 = vst.msk [vmem:[#allocation2 + $0x180] sm:$0x3] %vm4143_vm9, %v1570_v25  ;;  %vm4147_vm15 = vmmov %vm4144_vm11 }
 0x280   : > { %1645 = vst [vmem:[#allocation2 + $0x170] sm:$0xc] %v1632_v31  ;;  %1590 = vst [vmem:[#allocation2 + $0x178] sm:$0x3] %v1577_v26  ;;  %v2201_v54 = vld [vmem:[#allocation2 + $0x110] sm:$0xff] }
 0x281   : > { %vm4153_vm9 = vmmov %vm4145_vm12 }
 0x282   : > { %v1673_v45 = vpop.permute.xlu1 %1672  ;;  %v1626_v51 = vpop.permute.xlu0 %1625 }
 0x283   : > { %v1681_v61 = vsel %vm4144_vm11, %v3800_v6, %v1673_v45  ;;  %v1633_v33 = vsel %vm1627_vm0, %v1624_v15, %v1626_v51  ;;  %1647 = vst.msk [vmem:[#allocation2 + $0x180] sm:$0xc] %vm4145_vm12, %v1626_v51  ;;  %v2208_v49 = vld [vmem:[#allocation2 + $0x148] sm:$0xff]  ;;  %vm4148_vm0 = vcmask 752640   ;;  %vm4154_vm11 = vmmov %vm4151_vm10 }
 0x284   : > { %1694 = vst [vmem:[#allocation2 + $0x170] sm:$0x30] %v1681_v61  ;;  %1646 = vst [vmem:[#allocation2 + $0x178] sm:$0xc] %v1633_v33  ;;  %v2712_v9 = vpack.c.bf16 %v2208_v49, %v2201_v54 }
 0x285   : > { %vm4152_vm6 = vmmov %vm4148_vm0 }
 0x286   : > { %v1743_v47 = vpop.permute.xlu1 %1742  ;;  %v1675_v22 = vpop.permute.xlu0 %1674  ;;  %2713 = vmatpush3.bf16.msra.mxu1 %v2712_v9 }
 0x287   : > { %v1751_v58 = vsel %vm4146_vm14, %v3812_v3, %v1743_v47  ;;  %v1682_v43 = vsel %vm4147_vm15, %v1673_v45, %v1675_v22  ;;  %1696 = vst.msk [vmem:[#allocation2 + $0x180] sm:$0x30] %vm351_vm5, %v1675_v22  ;;  %2714 = vmatprep.subr.bf16.mxu1 %v2939_v34  ;;  %vm4157_vm14 = vmmov %vm4150_vm2 }
 0x288   : > { %1764 = vst [vmem:[#allocation2 + $0x1a8] sm:$0x3] %v1751_v58  ;;  %1695 = vst [vmem:[#allocation2 + $0x178] sm:$0x30] %v1682_v43 }
 0x28a   : > { %v1799_v6 = vpop.permute.xlu1 %1798  ;;  %v1745_v62 = vpop.permute.xlu0 %1744 }
 0x28b   : > { %v1807_v63 = vsel %vm4148_vm0, %v3831_v0, %v1799_v6  ;;  %v1752_v32 = vsel %vm4149_vm4, %v1743_v47, %v1745_v62  ;;  %1766 = vst.msk [vmem:[#allocation2 + $0x1b8] sm:$0x3] %vm4150_vm2, %v1745_v62  ;;  %v2213_v55 = vld [vmem:[#allocation2 + $0x170] sm:$0xff]  ;;  %vm4159_vm0 = vmmov %vm4153_vm9 }
 0x28c   : > { %1820 = vst [vmem:[#allocation2 + $0x1a8] sm:$0xc] %v1807_v63  ;;  %1765 = vst [vmem:[#allocation2 + $0x1b0] sm:$0x3] %v1752_v32 }
 0x28e   : > { %v1855_v3 = vpop.permute.xlu1 %1854  ;;  %v1801_v20 = vpop.permute.xlu0 %1800  ;;  %v2215_v4 = vld [vmem:[#allocation2 + $0x180] sm:$0xff] }
 0x28f   : > { %v1863_v1 = vsel %vm4151_vm10, %v3841_v39, %v1855_v3  ;;  %v1808_v34 = vsel %vm4152_vm6, %v1799_v6, %v1801_v20  ;;  %1822 = vst.msk [vmem:[#allocation2 + $0x1b8] sm:$0xc] %vm4153_vm9, %v1801_v20  ;;  %v2214_v46 = vld [vmem:[#allocation2 + $0x178] sm:$0xff] }
 0x290   : > { %1876 = vst [vmem:[#allocation2 + $0x1a8] sm:$0x30] %v1863_v1  ;;  %1821 = vst [vmem:[#allocation2 + $0x1b0] sm:$0xc] %v1808_v34 }
 0x292   : > { %v1904_v42 = vpop.permute.xlu1 %1903  ;;  %v1857_v2 = vpop.permute.xlu0 %1856 }
 0x293   : > { %v1911_v0 = vsel %vm438_vm8, %v3858_v27, %v1904_v42  ;;  %v1864_v5 = vsel %vm4154_vm11, %v1855_v3, %v1857_v2  ;;  %1878 = vst.msk [vmem:[#allocation2 + $0x1b8] sm:$0x30] %vm351_vm5, %v1857_v2 }
 0x294   : > { %1924 = vst [vmem:[#allocation2 + $0x1a8] sm:$0xc0] %v1911_v0  ;;  %1877 = vst [vmem:[#allocation2 + $0x1b0] sm:$0x30] %v1864_v5 }
 0x296   : > { %v1962_v56 = vpop.permute.xlu1 %1961  ;;  %v1906_v50 = vpop.permute.xlu0 %1905 }
 0x297   : > { %v1972_v39 = vsel %vm1967_vm3, %v3897_v52, %v1962_v56  ;;  %v1912_v48 = vsel %vm438_vm8, %v1904_v42, %v1906_v50  ;;  %1926 = vst.msk [vmem:[#allocation2 + $0x1b8] sm:$0xc0] %vm408_vm7, %v1906_v50  ;;  %vm4155_vm8 = vcmask 244736  }
 0x298   : > { %1986 = vst [vmem:[#allocation2 + $0x1e0] sm:$0x3] %v1972_v39  ;;  %1925 = vst [vmem:[#allocation2 + $0x1b0] sm:$0xc0] %v1912_v48 }
 0x299   : > { %vm4156_vm12 = vmmov %vm4155_vm8 }
 0x29a   : > { %v2024_v40 = vpop.permute.xlu1 %2023  ;;  %v1964_v53 = vpop.permute.xlu0 %1963  ;;  %vm4158_vm15 = vmmov %vm4155_vm8 }
 0x29b   : > { %v2034_v27 = vsel %vm2029_vm13, %v3913_v41, %v2024_v40  ;;  %v1973_v8 = vsel %vm1967_vm3, %v1962_v56, %v1964_v53  ;;  %v2220_v52 = vld [vmem:[#allocation2 + $0x1a8] sm:$0xff] }
 0x29c   : > { %2048 = vst [vmem:[#allocation2 + $0x1e0] sm:$0xc] %v2034_v27  ;;  %1987 = vst [vmem:[#allocation2 + $0x1e8] sm:$0x3] %v1973_v8  ;;  %v2703_v19 = vpack.c.bf16 %v2220_v52, %v2213_v55 }
 0x29e   : > { %v2086_v10 = vpop.permute.xlu1 %2085  ;;  %v2026_v14 = vpop.permute.xlu0 %2025  ;;  %v2222_v11 = vld [vmem:[#allocation2 + $0x1b8] sm:$0xff] }
 0x29f   : > { %v2096_v16 = vsel %vm4155_vm8, %v3920_v59, %v2086_v10  ;;  %v2035_v17 = vsel %vm2029_vm13, %v2024_v40, %v2026_v14  ;;  %v2715_v57 = vpack.c.bf16 %v2222_v11, %v2215_v4  ;;  %v2221_v29 = vld [vmem:[#allocation2 + $0x1b0] sm:$0xff] }
 0x2a0   : > { %2110 = vst [vmem:[#allocation2 + $0x1e0] sm:$0x30] %v2096_v16  ;;  %2049 = vst [vmem:[#allocation2 + $0x1e8] sm:$0xc] %v2035_v17  ;;  %v2701_v41 = vpack.c.bf16 %v2221_v29, %v2214_v46 }
 0x2a1   : > { %2716 = vmatpush3.bf16.msra.mxu1 %v2715_v57 }
 0x2a2   : > { %v2140_v13 = vpop.permute.xlu1 %2139  ;;  %v2088_v35 = vpop.permute.xlu0 %2087  ;;  %2702 = vmatprep.subr.bf16.mxu0 %v2701_v41  ;;  %2652 = vmatprep.subr.mxu1 %v2937_v18 }
 0x2a3   : > { %v2150_v23 = vsel %vm2145_vm1, %v3928_v44, %v2140_v13  ;;  %v2097_v59 = vsel %vm4156_vm12, %v2086_v10, %v2088_v35  ;;  %2704 = vmatpush1.bf16.msra.mxu0 %v2703_v19 }
 0x2a4   : > { %2164 = vst [vmem:[#allocation2 + $0x1e0] sm:$0xc0] %v2150_v23  ;;  %2111 = vst [vmem:[#allocation2 + $0x1e8] sm:$0x30] %v2097_v59 }
 0x2a6   : > { %v1966_v36 = vpop.permute.xlu1 %1965  ;;  %v2142_v28 = vpop.permute.xlu0 %2141 }
 0x2a7   : > { %v1974_v30 = vsel %vm1967_vm3, %v1964_v53, %v1966_v36  ;;  %v2151_v7 = vsel %vm2145_vm1, %v2140_v13, %v2142_v28  ;;  %vm4160_vm3 = vcmask 588800  }
 0x2a8   : > { %1988 = vst.msk [vmem:[#allocation2 + $0x1f0] sm:$0x3] %vm4157_vm14, %v1974_v30  ;;  %2165 = vst [vmem:[#allocation2 + $0x1e8] sm:$0xc0] %v2151_v7 }
 0x2aa   : > { %v2090_v24 = vpop.permute.xlu1 %2089  ;;  %v2028_v12 = vpop.permute.xlu0 %2027 }
 0x2ab   : > { %v2098_v18 = vsel %vm4158_vm15, %v2088_v35, %v2090_v24  ;;  %v2036_v44 = vsel %vm2029_vm13, %v2026_v14, %v2028_v12  ;;  %v2227_v15 = vld [vmem:[#allocation2 + $0x1e0] sm:$0xff]  ;;  %vm4161_vm13 = vmmov %vm4160_vm3 }
 0x2ac   : > { %2112 = vst.msk [vmem:[#allocation2 + $0x1f0] sm:$0x30] %vm351_vm5, %v2098_v18 }
 0x2ad   : > { %2050 = vst.msk [vmem:[#allocation2 + $0x1f0] sm:$0xc] %vm4159_vm0, %v2036_v44 }
 0x2ae   : > { %v2144_v60 = vpop.permute.xlu0 %2143 }
 0x2af   : > { %v2152_v37 = vsel %vm2145_vm1, %v2142_v28, %v2144_v60  ;;  %v2228_v38 = vld [vmem:[#allocation2 + $0x1e8] sm:$0xff]  ;;  %vm4162_vm1 = vcmask 523264  }
 0x2b0   : > { %2166 = vst.msk [vmem:[#allocation2 + $0x1f0] sm:$0xc0] %vm408_vm7, %v2152_v37  ;;  %2397 = vmatprep.subr.mxu0 %v2228_v38 }
 0x2b1   : > { %2398 = vmatpush1.msra.mxu0 %v2227_v15 }
 0x2b2   : > { %2621 = vmatmul.mubr.msk.f32.vlgmr.msra.gmra.mrb[2].mxu0 %vm4160_vm3, %v3937_v21 }
 0x2b7   : > { %v2229_v25 = vld [vmem:[#allocation2 + $0x1f0] sm:$0xff] }
 0x2b8   : > { %2653 = vmatpush3.msra.mxu1 %v2229_v25 }
 0x2b9   : > { %2655 = vmatmul.mubr.msk.f32.vlgmr.msra.gmra.mrb[2].mxu1 %vm4161_vm13, %v3937_v21 }
 0x2bb   : > { %v2233_v31 = vpop.permute.xlu1 %2232 }
 0x320   : > { %v2305_v26 = vpop.f32.mrb[0].mxu0 }
 0x321   : > { %v2307_v45 = vpop.f32.mrb[1].mxu0  ;;  %v2306_v51 = vadd.f32 %v2305_v26, %v2233_v31 }
 0x322   : > { %v2308_v61 = vadd.f32 %v2307_v45, %v2233_v31 }
 0x323   : > { %2522 = vst [vmem:[%s186_s9] sm:$0xff] %v2306_v51 }
 0x324   : > { %2523 = vst [vmem:[%s186_s9 + $0x8] sm:$0xff] %v2308_v61 }
 0x325   : > { %v2376_v33 = vpop.f32.mrb[0].mxu1 }
 0x326   : > { %v2377_v54 = vadd.f32 %v2376_v33, %v2233_v31  ;;  %v2378_v49 = vpop.f32.mrb[1].mxu1 }
 0x327   : > { %v2379_v9 = vadd.f32 %v2378_v49, %v2233_v31 }
 0x328   : > { %2524 = vst [vmem:[%s186_s9 + $0x10] sm:$0xff] %v2377_v54 }
 0x329   : > { %2525 = vst [vmem:[%s186_s9 + $0x18] sm:$0xff] %v2379_v9 }
 0x385   : > { %v2447_v47 = vpop.f32.mrb[2].mxu0 }
 0x386   : > { %v2448_v22 = vadd.f32 %v2447_v47, %v2233_v31  ;;  %v2449_v21 = vpop.f32.mrb[3].mxu0 }
 0x387   : > { %v2450_v58 = vadd.f32 %v2449_v21, %v2233_v31 }
 0x388   : > { %2526 = vst [vmem:[%s186_s9 + $0x20] sm:$0xff] %v2448_v22 }
 0x389   : > { %2527 = vst [vmem:[%s186_s9 + $0x28] sm:$0xff] %v2450_v58 }
 0x38c   : > { %v2518_v43 = vpop.f32.mrb[2].mxu1 }
 0x38d   : > { %v2519_v6 = vadd.f32 %v2518_v43, %v2233_v31  ;;  %v2656_v62 = vpop.f32.mrb[3].mxu1 }
 0x38f   : > { %2528 = vst.msk [vmem:[%s186_s9 + $0x30] sm:$0xff] %vm4162_vm1, %v2519_v6 }
 0x390   : > { %2849 = shalt.err (!%p2846_p4)
}
 0x391   : > { %s2850_s28 = scalar_lea.hbm %s4055_s20, 896  ;;  %s2854_s7 = scalar_lea.hbm %s4103_s3, 1792 }
 0x392   : > { %p2851_p7 = scmp.ne.s32.totalorder %s4055_s20, %s2850_s28  ;;  %p2855_p0 = scmp.lt.u32.totalorder %s4055_s20, %s4103_s3 }
 0x393   : > { %p2856_p1 = scmp.lt.u32.totalorder %s2854_s7, %s2850_s28  ;;  %p2858_p6 = scmp.lt.u32.totalorder %s2850_s28, %s4055_s20 }
 0x394   : > { %p2852_p8 = pnand %p2851_p7, %p4163_p11 }
 0x395   : > { %p2857_p3 = por %p2856_p1, %p2855_p0 }
 0x396   : > { %p2853_p9 = pneg %p2852_p8 }
 0x397   : > { %p2859_p12 = por %p2858_p6, %p2857_p3 }
 0x399   : > { %p2860_p13 = pnand %p2859_p12, %p2853_p9 }
 0x39b   : > { %2863 = shalt.err (!%p2860_p13)
}
 0x39c   : > { %2724 = dma.vmem_to_hbm [thread:$0]  (%p4163_p11), %s4057_s11, 896, %s4055_s20, %s2530_s25  }
 0x39d PF: > { %s2556_s4 = sand.u32 1, %s2890_s12   ;;  %p4164_p5 = scmp.ne.s32.totalorder %s4126_s24, 0 }
 0x39e   : > { %p4165_p10 = scmp.ge.s32.totalorder %s2902_s15, 2  ;;  %s2557_s6 = scalar_lea.sflag [#allocation5], %s2556_s4 }
 0x3a0   : > { %p2731_p2 = pnand %p4165_p10, %p4164_p5 }
 0x3a2   : > { %2885 = dma.done.wait (!%p2731_p2), %s2557_s6, 896  }
 0x3a3   : > { %2887 = vsyncadd (!%p2731_p2), %s2557_s6, 4294966400  ;;  %p16_p4 = scmp.ge.s32.totalorder %s2987_s18, 4   ;;  %s4166_s12 = smov %s2894_s13 }
 0x3a4   : > { %s4167_s13 = smov %s2898_s14  ;;  %s4168_s14 = smov %s2999_s21 }
 0x3a5   : > { %s4169_s15 = smov %s2987_s18  ;;  %18 = sbr.rel (!%p16_p4) target bundleno = 5 (0x5), region = 77 }
 0x3ac   :  { %2562 = vsyncpa [#allocation4], 1 }
 0x3ad   :  { %2564 = vsyncpa [#allocation4 + $0x1], 1 }
 0x3ae   :  { %2565 = vsyncpa [#allocation5], 1 }
 0x3af   :  { %2567 = vsyncpa [#allocation5 + $0x1], 1 }

</bundles_post_ra>
